<compile_context>
chip_gen: v5e
topology: v5e:2x2
jax: 0.10.0
libtpu: 0.0.40
codegen_flags: <defaults>
</compile_context>

<pallas_src>
import functools

import numpy as np
import jax
import jax.numpy as jnp
from jax.experimental import pallas as pl
from jax.experimental.pallas import tpu as pltpu


_FC_BLOCK_N = 640  # fc2 N-tile: 5*128 lanes, 1.25 MB bf16 weight per block, grid=10.


# ---------------------------------------------------------------------------
# Pallas kernels
# ---------------------------------------------------------------------------
def _mlp_fused_kernel(z_ref, w1_ref, b1_ref, w2_ref, b2_ref, o_ref):
    # fc1 is tiny ((B,50)@(50,1024)); recompute it on every grid step so the
    # kernel has no cross-step state and stays correct under 'parallel'
    # (megacore) scheduling.  z/w1/b1 blocks are constant-indexed -> DMA'd once.
    h = jnp.dot(z_ref[...], w1_ref[...], preferred_element_type=jnp.float32)
    h = jnp.maximum(h + b1_ref[...], 0.0).astype(w2_ref.dtype)
    acc = jnp.dot(h, w2_ref[...], preferred_element_type=jnp.float32)
    o_ref[...] = jnp.maximum(acc + b2_ref[...], 0.0)


def _matmul_bias_act_kernel(x_ref, w_ref, b_ref, o_ref, *, act):
    acc = jnp.dot(x_ref[...], w_ref[...], preferred_element_type=jnp.float32)
    acc = acc + b_ref[...]
    if act == "relu":
        acc = jnp.maximum(acc, 0.0)
    elif act == "sigmoid":
        acc = jax.nn.sigmoid(acc)
    o_ref[...] = acc.astype(o_ref.dtype)


# ---------------------------------------------------------------------------
# Pallas wrappers
# ---------------------------------------------------------------------------
def mlp_fused(z, w1, b1, w2, b2, *, block_n=_FC_BLOCK_N):
    """act(z@w1+b1) @ w2 + b2 with ReLU on both, fused into one pallas_call."""
    B, D = z.shape
    _, H1 = w1.shape
    _, N = w2.shape
    assert N % block_n == 0
    grid = (N // block_n,)
    flops = 2 * B * (D * H1 + H1 * N)
    bytes_accessed = (z.size * 2 + w1.size * 2 + b1.size * 4
                      + w2.size * 2 + b2.size * 4 + B * N * 4)
    return pl.pallas_call(
        _mlp_fused_kernel,
        out_shape=jax.ShapeDtypeStruct((B, N), jnp.float32),
        grid=grid,
        in_specs=[
            pl.BlockSpec((B, D), lambda j: (0, 0)),
            pl.BlockSpec((D, H1), lambda j: (0, 0)),
            pl.BlockSpec((1, H1), lambda j: (0, 0)),
            pl.BlockSpec((H1, block_n), lambda j: (0, j)),
            pl.BlockSpec((1, block_n), lambda j: (0, j)),
        ],
        out_specs=pl.BlockSpec((B, block_n), lambda j: (0, j)),
        compiler_params=pltpu.CompilerParams(
            dimension_semantics=("parallel",)),
        cost_estimate=pl.CostEstimate(
            flops=flops, transcendentals=0, bytes_accessed=bytes_accessed),
    )(z, w1, b1, w2, b2)


def matmul_bias_act(x, w, b, *, act="none", block_n=None):
    """out = act(x @ w + b); N optionally split into lane-dense parallel tiles."""
    m, k = x.shape
    k2, n = w.shape
    assert k == k2
    if block_n is None or n % block_n != 0:
        block_n = n
    grid = (n // block_n,)
    if b.shape[1] == n and block_n != n:
        b_spec = pl.BlockSpec((b.shape[0], block_n), lambda j: (0, j))
    else:
        b_spec = pl.BlockSpec(b.shape, lambda j: (0, 0))
    bytes_accessed = (x.size * x.dtype.itemsize + w.size * w.dtype.itemsize
                      + b.size * 4 + m * n * 4)
    return pl.pallas_call(
        functools.partial(_matmul_bias_act_kernel, act=act),
        out_shape=jax.ShapeDtypeStruct((m, n), jnp.float32),
        grid=grid,
        in_specs=[
            pl.BlockSpec((m, k), lambda j: (0, 0)),
            pl.BlockSpec((k, block_n), lambda j: (0, j)),
            b_spec,
        ],
        out_specs=pl.BlockSpec((m, block_n), lambda j: (0, j)),
        compiler_params=pltpu.CompilerParams(
            dimension_semantics=("parallel",)),
        cost_estimate=pl.CostEstimate(
            flops=2 * m * k * n,
            transcendentals=(m * n if act == "sigmoid" else 0),
            bytes_accessed=bytes_accessed),
    )(x, w, b)


# ---------------------------------------------------------------------------
# ConvTranspose2d(k=4, stride=2, pad=1) via parity decomposition (NHWC).
#
# y[b, 2j+rh, 2i+rw, oc] = bias[oc]
#     + sum_{oh,ow in 0..2, ic} xpad[b, j+oh, i+ow, ic] * Wbig[oh,ow,ic,rh,rw,oc]
# where Wbig embeds weight[ic, oc, 3+rh-2*oh, 3+rw-2*ow] when (oh-rh),(ow-rw)
# are in {0,1} and 0 otherwise (the structural zeros of the stride-2 dilation).
# ---------------------------------------------------------------------------
def _convt_pack_weight(w_t):
    """w_t: (IC, OC, 4, 4) PyTorch ConvTranspose2d weight -> (9*IC, 4*OC)."""
    IC, OC, K, _ = w_t.shape
    assert K == 4
    wb = jnp.zeros((3, 3, IC, 2, 2, OC), w_t.dtype)
    for rh in range(2):
        for rw in range(2):
            for dh in range(2):
                for dw in range(2):
                    kh, kw = 3 - rh - 2 * dh, 3 - rw - 2 * dw
                    wb = wb.at[rh + dh, rw + dw, :, rh, rw, :].set(w_t[:, :, kh, kw])
    return wb.reshape(9 * IC, 4 * OC)


def _shifted_slabs(xp, H, W):
    """xp: (B, H+2, W+2, IC) -> 9 slabs of shape (B*H*W, IC), tap order (oh, ow)."""
    B, _, _, IC = xp.shape
    slabs = []
    for oh in range(3):
        for ow in range(3):
            slabs.append(xp[:, oh:oh + H, ow:ow + W, :].reshape(B * H * W, IC))
    return slabs


def convt_up2(x_nhwc, w_packed, b_packed, *, oc, act, block_n=128):
    """ConvTranspose2d(4, s=2, p=1), NHWC in/out.  Output is computed as one
    lane-dense (B*H*W, 4*oc) matmul and interleaved afterwards."""
    B, H, W, _ = x_nhwc.shape
    xp = jnp.pad(x_nhwc, ((0, 0), (1, 1), (1, 1), (0, 0)))
    patches = jnp.concatenate(_shifted_slabs(xp, H, W), axis=1).astype(jnp.bfloat16)
    nout = 4 * oc
    if nout % block_n != 0:
        block_n = nout
    out = matmul_bias_act(patches, w_packed, b_packed, act=act, block_n=block_n)
    out = out.reshape(B, H, W, 2, 2, oc).transpose(0, 1, 3, 2, 4, 5)
    return out.reshape(B, 2 * H, 2 * W, oc)


def convt_up2_transposed(x_nhwc, wT_packed, b_packed, *, oc, act):
    """Same conv-transpose but computed as (4*oc, 9*IC) @ (9*IC, B*H*W): the
    output lane dim is the wide spatial extent (lane-dense stores for tiny oc)."""
    B, H, W, _ = x_nhwc.shape
    xp = jnp.pad(x_nhwc, ((0, 0), (1, 1), (1, 1), (0, 0)))
    patches_t = jnp.concatenate([s.T for s in _shifted_slabs(xp, H, W)], axis=0)
    patches_t = patches_t.astype(jnp.bfloat16)                     # (9*IC, B*H*W)
    out = matmul_bias_act(wT_packed, patches_t, b_packed, act=act)  # (4*oc, B*H*W)
    out = out.reshape(2, 2, oc, B, H, W).transpose(3, 4, 0, 5, 1, 2)
    return out.reshape(B, 2 * H, 2 * W, oc)


# ---------------------------------------------------------------------------
# Parameters: deterministic synthetic init + kernel-friendly packing
# ---------------------------------------------------------------------------
def init_decoder_params(key, latent_dim=50, x_shape=(1, 28, 28), cshape=(128, 7, 7)):
    iels = int(np.prod(cshape))
    keys = jax.random.split(key, 8)

    def dense(kw, kb, fan_in, fan_out, scale):
        s = scale / np.sqrt(fan_in)
        w = jax.random.uniform(kw, (fan_in, fan_out), jnp.float32, -s, s)
        b = jax.random.uniform(kb, (fan_out,), jnp.float32, -s, s)
        return w, b

    def convt(kw, kb, ic, oc, k, scale):
        s = scale / np.sqrt(ic * k * k)
        w = jax.random.uniform(kw, (ic, oc, k, k), jnp.float32, -s, s)
        b = jax.random.uniform(kb, (oc,), jnp.float32, -s, s)
        return w, b

    p = {}
    p["fc1_w"], p["fc1_b"] = dense(keys[0], keys[1], latent_dim, 1024, 1.0)
    p["fc2_w"], p["fc2_b"] = dense(keys[2], keys[3], 1024, iels, 1.0)
    p["ct1_w"], p["ct1_b"] = convt(keys[4], keys[5], cshape[0], 64, 4, 2.0)
    p["ct2_w"], p["ct2_b"] = convt(keys[6], keys[7], 64, x_shape[0], 4, 32.0)
    return p


def pack_params(params, cshape=(128, 7, 7)):
    """One-time host-side packing: bf16 weights, NHWC column permutation for fc2,
    N padding to a multiple of the fc tile, parity-packed conv weights."""
    C, Hc, Wc = cshape
    iels = C * Hc * Wc
    pad = (-iels) % _FC_BLOCK_N

    p = {}
    p["w1"] = params["fc1_w"].astype(jnp.bfloat16)
    p["b1"] = params["fc1_b"].reshape(1, -1).astype(jnp.float32)

    # fc2: permute columns (c,y,x) -> (y,x,c) so the output is directly NHWC.
    w2 = params["fc2_w"].reshape(-1, C, Hc, Wc).transpose(0, 2, 3, 1).reshape(-1, iels)
    b2 = params["fc2_b"].reshape(C, Hc, Wc).transpose(1, 2, 0).reshape(-1)
    p["w2"] = jnp.pad(w2, ((0, 0), (0, pad))).astype(jnp.bfloat16)
    p["b2"] = jnp.pad(b2, (0, pad)).reshape(1, -1).astype(jnp.float32)

    # ConvTranspose layers: parity-packed weights.
    p["cw1"] = _convt_pack_weight(params["ct1_w"]).astype(jnp.bfloat16)   # (1152, 256)
    p["cb1"] = jnp.tile(params["ct1_b"], 4).reshape(1, -1).astype(jnp.float32)
    p["cw2t"] = _convt_pack_weight(params["ct2_w"]).T.astype(jnp.bfloat16)  # (4, 576)
    p["cb2"] = jnp.tile(params["ct2_b"], 4).reshape(-1, 1).astype(jnp.float32)
    return p


# ---------------------------------------------------------------------------
# Decoder forward (Pallas) and pure-JAX reference
# ---------------------------------------------------------------------------
def decoder_forward(packed, z, x_shape=(1, 28, 28), cshape=(128, 7, 7)):
    B = z.shape[0]
    C, Hc, Wc = cshape
    iels = C * Hc * Wc
    # Linear(latent,1024)+ReLU + Linear(1024,iels)+ReLU, fused in one pallas_call.
    h = mlp_fused(z.astype(jnp.bfloat16), packed["w1"], packed["b1"],
                  packed["w2"], packed["b2"])                      # (B, padded N) f32
    h = h[:, :iels].reshape(B, Hc, Wc, C)                          # NHWC directly
    # ConvTranspose2d(128->64) + ReLU, NHWC, parity-decomposed.
    y = convt_up2(h, packed["cw1"], packed["cb1"], oc=64, act="relu")          # (B,14,14,64)
    # ConvTranspose2d(64->1) + Sigmoid, transposed (lane-dense) matmul.
    y = convt_up2_transposed(y, packed["cw2t"], packed["cb2"],
                             oc=x_shape[0], act="sigmoid")                     # (B,28,28,1)
    return jnp.transpose(y, (0, 3, 1, 2)).reshape(B, *x_shape)


def _convt_ref(x, w, b):
    """Reference ConvTranspose2d(4, s=2, p=1): NCHW x, PyTorch (IC,OC,K,K) weight."""
    w_flip = jnp.flip(w, (2, 3)).transpose(1, 0, 2, 3)   # -> (OC, IC, K, K)
    y = jax.lax.conv_general_dilated(
        x, w_flip, window_strides=(1, 1), padding=((2, 2), (2, 2)),
        lhs_dilation=(2, 2), rhs_dilation=(1, 1),
        dimension_numbers=("NCHW", "OIHW", "NCHW"))
    return y + b.reshape(1, -1, 1, 1)


def decoder_reference(params, z, x_shape=(1, 28, 28), cshape=(128, 7, 7)):
    B = z.shape[0]
    h = jnp.maximum(z @ params["fc1_w"] + params["fc1_b"], 0.0)
    h = jnp.maximum(h @ params["fc2_w"] + params["fc2_b"], 0.0)
    h = h.reshape(B, *cshape)
    h = jnp.maximum(_convt_ref(h, params["ct1_w"], params["ct1_b"]), 0.0)
    h = jax.nn.sigmoid(_convt_ref(h, params["ct2_w"], params["ct2_b"]))
    return h.reshape(B, *x_shape)


if __name__ == "__main__":
    key = jax.random.PRNGKey(0)
    kz, kp = jax.random.split(key)

    latent_dim = 50
    batch = 2
    params = init_decoder_params(kp, latent_dim=latent_dim)
    packed = pack_params(params)
    z = jax.random.normal(kz, (batch, latent_dim), jnp.float32)

    out = jax.block_until_ready(jax.jit(decoder_forward)(packed, z))

    assert out.shape == (batch, 1, 28, 28), out.shape
    assert out.dtype == jnp.float32
    assert bool(jnp.all(jnp.isfinite(out)))
    assert bool(jnp.all((out >= 0.0) & (out <= 1.0)))  # sigmoid output range

    # Numerical check vs a pure-JAX f32 reference (bf16 weights => relaxed tol).
    ref = jax.block_until_ready(jax.jit(decoder_reference)(params, z))
    max_err = float(jnp.max(jnp.abs(out - ref)))
    assert max_err < 2e-2, f"max abs err vs reference: {max_err}"

    print("KERNEL_OK")
</pallas_src>

<mosaic_0001>
module attributes {stable_mosaic.version = 11 : i64} {
  func.func @_mlp_fused_kernel(%arg0: i32, %arg1: memref<2x50xbf16, #tpu.memory_space<vmem>>, %arg2: memref<50x1024xbf16, #tpu.memory_space<vmem>>, %arg3: memref<1x1024xf32, #tpu.memory_space<vmem>>, %arg4: memref<1024x640xbf16, #tpu.memory_space<vmem>>, %arg5: memref<1x640xf32, #tpu.memory_space<vmem>>, %arg6: memref<2x640xf32, #tpu.memory_space<vmem>>) attributes {dimension_semantics = [#tpu.dimension_semantics<parallel>], iteration_bounds = array<i64: 10>, scalar_prefetch = 0 : i64, scratch_operands = 0 : i64, tpu.core_type = #tpu.core_type<tc>, window_params = [{pipeline_mode = #tpu.pipeline_mode<synchronous>, transform_indices = @transform_0, window_bounds = array<i64: 2, 50>}, {pipeline_mode = #tpu.pipeline_mode<synchronous>, transform_indices = @transform_1, window_bounds = array<i64: 50, 1024>}, {pipeline_mode = #tpu.pipeline_mode<synchronous>, transform_indices = @transform_2, window_bounds = array<i64: 1, 1024>}, {transform_indices = @transform_3, window_bounds = array<i64: 1024, 640>}, {transform_indices = @transform_4, window_bounds = array<i64: 1, 640>}, {transform_indices = @transform_5, window_bounds = array<i64: 2, 640>}]} {
    %c0 = arith.constant 0 : index
    %c0_0 = arith.constant 0 : index
    %0 = vector.load %arg1[%c0, %c0_0] : memref<2x50xbf16, #tpu.memory_space<vmem>>, vector<2x50xbf16>
    %c0_1 = arith.constant 0 : index
    %c0_2 = arith.constant 0 : index
    %1 = vector.load %arg2[%c0_1, %c0_2] : memref<50x1024xbf16, #tpu.memory_space<vmem>>, vector<50x1024xbf16>
    %cst = arith.constant dense<0.000000e+00> : vector<2x1024xf32>
    %2 = tpu.matmul %0, %1, %cst {dimension_numbers = #tpu.dot_dimension_numbers<[1], [0], [0], [1], [0, 0, 1, 1], [], []>} : vector<2x50xbf16>, vector<50x1024xbf16>, vector<2x1024xf32> -> vector<2x1024xf32>
    %c0_3 = arith.constant 0 : index
    %c0_4 = arith.constant 0 : index
    %3 = vector.load %arg3[%c0_3, %c0_4] : memref<1x1024xf32, #tpu.memory_space<vmem>>, vector<1x1024xf32>
    %4 = vector.broadcast %3 : vector<1x1024xf32> to vector<2x1024xf32>
    %5 = arith.addf %2, %4 : vector<2x1024xf32>
    %cst_5 = arith.constant 0.000000e+00 : f32
    %6 = vector.broadcast %cst_5 : f32 to vector<2x1024xf32>
    %7 = arith.maximumf %5, %6 : vector<2x1024xf32>
    %8 = arith.truncf %7 : vector<2x1024xf32> to vector<2x1024xbf16>
    %c0_6 = arith.constant 0 : index
    %c0_7 = arith.constant 0 : index
    %9 = vector.load %arg4[%c0_6, %c0_7] : memref<1024x640xbf16, #tpu.memory_space<vmem>>, vector<1024x640xbf16>
    %cst_8 = arith.constant dense<0.000000e+00> : vector<2x640xf32>
    %10 = tpu.matmul %8, %9, %cst_8 {dimension_numbers = #tpu.dot_dimension_numbers<[1], [0], [0], [1], [0, 0, 1, 1], [], []>} : vector<2x1024xbf16>, vector<1024x640xbf16>, vector<2x640xf32> -> vector<2x640xf32>
    %c0_9 = arith.constant 0 : index
    %c0_10 = arith.constant 0 : index
    %11 = vector.load %arg5[%c0_9, %c0_10] : memref<1x640xf32, #tpu.memory_space<vmem>>, vector<1x640xf32>
    %12 = vector.broadcast %11 : vector<1x640xf32> to vector<2x640xf32>
    %13 = arith.addf %10, %12 : vector<2x640xf32>
    %cst_11 = arith.constant 0.000000e+00 : f32
    %14 = vector.broadcast %cst_11 : f32 to vector<2x640xf32>
    %15 = arith.maximumf %13, %14 : vector<2x640xf32>
    %c0_12 = arith.constant 0 : index
    %c0_13 = arith.constant 0 : index
    %16 = vector.load %arg6[%c0_12, %c0_13] : memref<2x640xf32, #tpu.memory_space<vmem>>, vector<2x640xf32>
    tpu.vector_store %arg6[%c0_12, %c0_13], %15 {strides = array<i32>} : memref<2x640xf32, #tpu.memory_space<vmem>>, vector<2x640xf32>,
    return
  }
  func.func @transform_0(%arg0: i32) -> (i32, i32) {
    %c0_i32 = arith.constant 0 : i32
    %c0_i32_0 = arith.constant 0 : i32
    %c0_i32_1 = arith.constant 0 : i32
    return %c0_i32, %c0_i32_0 : i32, i32
  }
  func.func @transform_1(%arg0: i32) -> (i32, i32) {
    %c0_i32 = arith.constant 0 : i32
    %c0_i32_0 = arith.constant 0 : i32
    %c0_i32_1 = arith.constant 0 : i32
    return %c0_i32, %c0_i32_0 : i32, i32
  }
  func.func @transform_2(%arg0: i32) -> (i32, i32) {
    %c0_i32 = arith.constant 0 : i32
    %c0_i32_0 = arith.constant 0 : i32
    %c0_i32_1 = arith.constant 0 : i32
    return %c0_i32, %c0_i32_0 : i32, i32
  }
  func.func @transform_3(%arg0: i32) -> (i32, i32) {
    %c0_i32 = arith.constant 0 : i32
    %c0_i32_0 = arith.constant 0 : i32
    return %c0_i32, %arg0 : i32, i32
  }
  func.func @transform_4(%arg0: i32) -> (i32, i32) {
    %c0_i32 = arith.constant 0 : i32
    %c0_i32_0 = arith.constant 0 : i32
    return %c0_i32, %arg0 : i32, i32
  }
  func.func @transform_5(%arg0: i32) -> (i32, i32) {
    %c0_i32 = arith.constant 0 : i32
    %c0_i32_0 = arith.constant 0 : i32
    return %c0_i32, %arg0 : i32, i32
  }
}

module attributes {stable_mosaic.version = 11 : i64} {
  func.func @_matmul_bias_act_kernel(%arg0: i32, %arg1: memref<98x1152xbf16, #tpu.memory_space<vmem>>, %arg2: memref<1152x128xbf16, #tpu.memory_space<vmem>>, %arg3: memref<1x128xf32, #tpu.memory_space<vmem>>, %arg4: memref<98x128xf32, #tpu.memory_space<vmem>>) attributes {dimension_semantics = [#tpu.dimension_semantics<parallel>], iteration_bounds = array<i64: 2>, scalar_prefetch = 0 : i64, scratch_operands = 0 : i64, tpu.core_type = #tpu.core_type<tc>, window_params = [{pipeline_mode = #tpu.pipeline_mode<synchronous>, transform_indices = @transform_0, window_bounds = array<i64: 98, 1152>}, {transform_indices = @transform_1, window_bounds = array<i64: 1152, 128>}, {transform_indices = @transform_2, window_bounds = array<i64: 1, 128>}, {transform_indices = @transform_3, window_bounds = array<i64: 98, 128>}]} {
    %c0 = arith.constant 0 : index
    %c0_0 = arith.constant 0 : index
    %0 = vector.load %arg1[%c0, %c0_0] : memref<98x1152xbf16, #tpu.memory_space<vmem>>, vector<98x1152xbf16>
    %c0_1 = arith.constant 0 : index
    %c0_2 = arith.constant 0 : index
    %1 = vector.load %arg2[%c0_1, %c0_2] : memref<1152x128xbf16, #tpu.memory_space<vmem>>, vector<1152x128xbf16>
    %cst = arith.constant dense<0.000000e+00> : vector<98x128xf32>
    %2 = tpu.matmul %0, %1, %cst {dimension_numbers = #tpu.dot_dimension_numbers<[1], [0], [0], [1], [0, 0, 1, 1], [], []>} : vector<98x1152xbf16>, vector<1152x128xbf16>, vector<98x128xf32> -> vector<98x128xf32>
    %c0_3 = arith.constant 0 : index
    %c0_4 = arith.constant 0 : index
    %3 = vector.load %arg3[%c0_3, %c0_4] : memref<1x128xf32, #tpu.memory_space<vmem>>, vector<1x128xf32>
    %4 = vector.broadcast %3 : vector<1x128xf32> to vector<98x128xf32>
    %5 = arith.addf %2, %4 : vector<98x128xf32>
    %cst_5 = arith.constant 0.000000e+00 : f32
    %6 = vector.broadcast %cst_5 : f32 to vector<98x128xf32>
    %7 = arith.maximumf %5, %6 : vector<98x128xf32>
    %c0_6 = arith.constant 0 : index
    %c0_7 = arith.constant 0 : index
    %8 = vector.load %arg4[%c0_6, %c0_7] : memref<98x128xf32, #tpu.memory_space<vmem>>, vector<98x128xf32>
    tpu.vector_store %arg4[%c0_6, %c0_7], %7 {strides = array<i32>} : memref<98x128xf32, #tpu.memory_space<vmem>>, vector<98x128xf32>,
    return
  }
  func.func @transform_0(%arg0: i32) -> (i32, i32) {
    %c0_i32 = arith.constant 0 : i32
    %c0_i32_0 = arith.constant 0 : i32
    %c0_i32_1 = arith.constant 0 : i32
    return %c0_i32, %c0_i32_0 : i32, i32
  }
  func.func @transform_1(%arg0: i32) -> (i32, i32) {
    %c0_i32 = arith.constant 0 : i32
    %c0_i32_0 = arith.constant 0 : i32
    return %c0_i32, %arg0 : i32, i32
  }
  func.func @transform_2(%arg0: i32) -> (i32, i32) {
    %c0_i32 = arith.constant 0 : i32
    %c0_i32_0 = arith.constant 0 : i32
    return %c0_i32, %arg0 : i32, i32
  }
  func.func @transform_3(%arg0: i32) -> (i32, i32) {
    %c0_i32 = arith.constant 0 : i32
    %c0_i32_0 = arith.constant 0 : i32
    return %c0_i32, %arg0 : i32, i32
  }
}

module attributes {stable_mosaic.version = 11 : i64} {
  func.func @_matmul_bias_act_kernel(%arg0: i32, %arg1: memref<4x576xbf16, #tpu.memory_space<vmem>>, %arg2: memref<576x392xbf16, #tpu.memory_space<vmem>>, %arg3: memref<4x1xf32, #tpu.memory_space<vmem>>, %arg4: memref<4x392xf32, #tpu.memory_space<vmem>>) attributes {dimension_semantics = [#tpu.dimension_semantics<parallel>], iteration_bounds = array<i64: 1>, scalar_prefetch = 0 : i64, scratch_operands = 0 : i64, tpu.core_type = #tpu.core_type<tc>, window_params = [{pipeline_mode = #tpu.pipeline_mode<synchronous>, transform_indices = @transform_0, window_bounds = array<i64: 4, 576>}, {transform_indices = @transform_1, window_bounds = array<i64: 576, 392>}, {pipeline_mode = #tpu.pipeline_mode<synchronous>, transform_indices = @transform_2, window_bounds = array<i64: 4, 1>}, {transform_indices = @transform_3, window_bounds = array<i64: 4, 392>}]} {
    %c0 = arith.constant 0 : index
    %c0_0 = arith.constant 0 : index
    %0 = vector.load %arg1[%c0, %c0_0] : memref<4x576xbf16, #tpu.memory_space<vmem>>, vector<4x576xbf16>
    %c0_1 = arith.constant 0 : index
    %c0_2 = arith.constant 0 : index
    %1 = vector.load %arg2[%c0_1, %c0_2] : memref<576x392xbf16, #tpu.memory_space<vmem>>, vector<576x392xbf16>
    %cst = arith.constant dense<0.000000e+00> : vector<4x392xf32>
    %2 = tpu.matmul %0, %1, %cst {dimension_numbers = #tpu.dot_dimension_numbers<[1], [0], [0], [1], [0, 0, 1, 1], [], []>} : vector<4x576xbf16>, vector<576x392xbf16>, vector<4x392xf32> -> vector<4x392xf32>
    %c0_3 = arith.constant 0 : index
    %c0_4 = arith.constant 0 : index
    %3 = vector.load %arg3[%c0_3, %c0_4] : memref<4x1xf32, #tpu.memory_space<vmem>>, vector<4x1xf32>
    %4 = vector.broadcast %3 : vector<4x1xf32> to vector<4x392xf32>
    %5 = arith.addf %2, %4 : vector<4x392xf32>
    %6 = arith.negf %5 : vector<4x392xf32>
    %7 = math.exp %6 : vector<4x392xf32>
    %cst_5 = arith.constant 1.000000e+00 : f32
    %8 = vector.broadcast %cst_5 : f32 to vector<4x392xf32>
    %9 = arith.addf %8, %7 : vector<4x392xf32>
    %10 = arith.divf %8, %9 : vector<4x392xf32>
    %c0_6 = arith.constant 0 : index
    %c0_7 = arith.constant 0 : index
    %11 = vector.load %arg4[%c0_6, %c0_7] : memref<4x392xf32, #tpu.memory_space<vmem>>, vector<4x392xf32>
    tpu.vector_store %arg4[%c0_6, %c0_7], %10 {strides = array<i32>} : memref<4x392xf32, #tpu.memory_space<vmem>>, vector<4x392xf32>,
    return
  }
  func.func @transform_0(%arg0: i32) -> (i32, i32) {
    %c0_i32 = arith.constant 0 : i32
    %c0_i32_0 = arith.constant 0 : i32
    %c0_i32_1 = arith.constant 0 : i32
    return %c0_i32, %c0_i32_0 : i32, i32
  }
  func.func @transform_1(%arg0: i32) -> (i32, i32) {
    %c0_i32 = arith.constant 0 : i32
    %c0_i32_0 = arith.constant 0 : i32
    return %c0_i32, %arg0 : i32, i32
  }
  func.func @transform_2(%arg0: i32) -> (i32, i32) {
    %c0_i32 = arith.constant 0 : i32
    %c0_i32_0 = arith.constant 0 : i32
    %c0_i32_1 = arith.constant 0 : i32
    return %c0_i32, %c0_i32_0 : i32, i32
  }
  func.func @transform_3(%arg0: i32) -> (i32, i32) {
    %c0_i32 = arith.constant 0 : i32
    %c0_i32_0 = arith.constant 0 : i32
    return %c0_i32, %arg0 : i32, i32
  }
}

</mosaic_0001>

<bundles_post_ra>
// kernel: decoder_forward.4
= control target key start
LH: loop header
LB: loop body
LE: loop exit
PB: predicated region body
PF: predicated region fallthrough
CT: control target
= control target key end

     0   :  { %s3050_s12 = smov 0   ;;  %s3052_s13 = smov 0   ;;  %s3949_s0 = inlined_call_operand.vmem [shape: bf16[98,1152], index: 0, kind: input, shape index: {}]   ;;  %s3950_s1 = inlined_call_operand.vmem [shape: bf16[1152,256], index: 1, kind: input, shape index: {}]   ;;  %s3951_s2 = inlined_call_operand.vmem [shape: f32[1,256], index: 2, kind: input, shape index: {}]   ;;  %s3952_s3 = inlined_call_operand.vmem [shape: f32[98,256], index: 3, kind: output, shape index: {}]  }
   0x1   :  { %s3054_s14 = smov 0  }
   0x2 LB: > { %s3066_s15 = sadd.s32 4294967295, %s3028_s14   ;;  %s3069_s16 = sadd.s32 1, %s3028_s14   ;;  %s3028_s14 = sphi %s3054_s14, %s3956_s14   ;;  %s3024_s13 = sphi %s3052_s13, %s3955_s13   ;;  %s3020_s12 = sphi %s3050_s12, %s3954_s12  }
   0x3   : > { %s38_s17 = ssub.s32 %s3028_s14, %s3069_s16  ;;  %s41_s18 = sadd.s32 1, %s3024_s13 }
   0x4   : > { %p39_p0 = scmp.eq.s32.totalorder %s38_s17, 0  ;;  %p48_p1 = scmp.ne.s32.totalorder %s3024_s13, %s3020_s12 }
   0x5   : > { %p49_p2 = scmp.eq.s32.totalorder %s3028_s14, 0  ;;  %p104_p3 = scmp.eq.s32.totalorder %s3066_s15, 1 }
   0x6   : > { %s3079_s19 = scalar_select %p39_p0, %s3024_s13, %s41_s18  }
   0x7   : > { %p50_p4 = por %p49_p2, %p48_p1  ;;  %p3081_p5 = por %p104_p3, %p48_p1 }
   0x8   : > { %p2318_p6 = scmp.ge.s32.totalorder %s3028_s14, 2 }
   0xa   : > { %129 = sbr.rel (%p2318_p6) target bundleno = 164 (0xa4), region = 20 }
   0xf   : > { %132 = sbr.rel (!%p50_p4) target bundleno = 164 (0xa4), region = 24  ;;  %s134_s21 = sand.u32 (%p50_p4), 1, %s3024_s13  }
  0x10   : > { %s2319_s22 = sshll.u32 (%p50_p4), %s3028_s14, 2  ;;  %s2978_s23 = smul.u32 (%p50_p4), 576, %s134_s21 }
  0x11   : > { %s3091_s26 = scalar_lea.vmem (%p50_p4), %s3950_s1, %s2319_s22 }
  0x12   : > { %v155_v0 = vld [vmem:[%s3091_s26] sm:$0xf] (%p50_p4)  ;;  %v157_v1 = vld [vmem:[%s3091_s26 + $0x8] sm:$0xf] (%p50_p4)  ;;  %v159_v2 = vld [vmem:[%s3091_s26 + $0x10] sm:$0xf] (%p50_p4) }
  0x13   : > { %s3096_s27 = scalar_lea.vmem (%p50_p4), [#allocation2], %s2978_s23  ;;  %v161_v3 = vld [vmem:[%s3091_s26 + $0x18] sm:$0xf] (%p50_p4)  ;;  %v163_v4 = vld [vmem:[%s3091_s26 + $0x20] sm:$0xf] (%p50_p4) }
  0x14   : > { %156 = vst [vmem:[%s3096_s27] sm:$0xf] %v155_v0  ;;  %v165_v5 = vld [vmem:[%s3091_s26 + $0x28] sm:$0xf]  ;;  %v167_v6 = vld [vmem:[%s3091_s26 + $0x30] sm:$0xf] }
  0x15   : > { %158 = vst [vmem:[%s3096_s27 + $0x4] sm:$0xf] %v157_v1  ;;  %v169_v7 = vld [vmem:[%s3091_s26 + $0x38] sm:$0xf]  ;;  %v171_v8 = vld [vmem:[%s3091_s26 + $0x40] sm:$0xf] }
  0x16   : > { %160 = vst [vmem:[%s3096_s27 + $0x8] sm:$0xf] %v159_v2  ;;  %v173_v9 = vld [vmem:[%s3091_s26 + $0x48] sm:$0xf]  ;;  %v175_v10 = vld [vmem:[%s3091_s26 + $0x50] sm:$0xf] }
  0x17   : > { %162 = vst [vmem:[%s3096_s27 + $0xc] sm:$0xf] %v161_v3  ;;  %v177_v11 = vld [vmem:[%s3091_s26 + $0x58] sm:$0xf]  ;;  %v179_v12 = vld [vmem:[%s3091_s26 + $0x60] sm:$0xf] }
  0x18   : > { %164 = vst [vmem:[%s3096_s27 + $0x10] sm:$0xf] %v163_v4  ;;  %v181_v13 = vld [vmem:[%s3091_s26 + $0x68] sm:$0xf]  ;;  %v183_v14 = vld [vmem:[%s3091_s26 + $0x70] sm:$0xf] }
  0x19   : > { %166 = vst [vmem:[%s3096_s27 + $0x14] sm:$0xf] %v165_v5  ;;  %v185_v15 = vld [vmem:[%s3091_s26 + $0x78] sm:$0xf]  ;;  %v187_v16 = vld [vmem:[%s3091_s26 + $0x80] sm:$0xf] }
  0x1a   : > { %168 = vst [vmem:[%s3096_s27 + $0x18] sm:$0xf] %v167_v6  ;;  %v189_v17 = vld [vmem:[%s3091_s26 + $0x88] sm:$0xf]  ;;  %v191_v18 = vld [vmem:[%s3091_s26 + $0x90] sm:$0xf] }
  0x1b   : > { %170 = vst [vmem:[%s3096_s27 + $0x1c] sm:$0xf] %v169_v7  ;;  %v193_v19 = vld [vmem:[%s3091_s26 + $0x98] sm:$0xf]  ;;  %v195_v20 = vld [vmem:[%s3091_s26 + $0xa0] sm:$0xf] }
  0x1c   : > { %172 = vst [vmem:[%s3096_s27 + $0x20] sm:$0xf] %v171_v8  ;;  %v197_v21 = vld [vmem:[%s3091_s26 + $0xa8] sm:$0xf]  ;;  %v199_v22 = vld [vmem:[%s3091_s26 + $0xb0] sm:$0xf] }
  0x1d   : > { %174 = vst [vmem:[%s3096_s27 + $0x24] sm:$0xf] %v173_v9  ;;  %v201_v23 = vld [vmem:[%s3091_s26 + $0xb8] sm:$0xf]  ;;  %v203_v24 = vld [vmem:[%s3091_s26 + $0xc0] sm:$0xf] }
  0x1e   : > { %176 = vst [vmem:[%s3096_s27 + $0x28] sm:$0xf] %v175_v10  ;;  %v205_v25 = vld [vmem:[%s3091_s26 + $0xc8] sm:$0xf]  ;;  %v207_v26 = vld [vmem:[%s3091_s26 + $0xd0] sm:$0xf] }
  0x1f   : > { %178 = vst [vmem:[%s3096_s27 + $0x2c] sm:$0xf] %v177_v11  ;;  %v209_v27 = vld [vmem:[%s3091_s26 + $0xd8] sm:$0xf]  ;;  %v211_v28 = vld [vmem:[%s3091_s26 + $0xe0] sm:$0xf] }
  0x20   : > { %180 = vst [vmem:[%s3096_s27 + $0x30] sm:$0xf] %v179_v12  ;;  %v213_v29 = vld [vmem:[%s3091_s26 + $0xe8] sm:$0xf]  ;;  %v215_v30 = vld [vmem:[%s3091_s26 + $0xf0] sm:$0xf] }
  0x21   : > { %182 = vst [vmem:[%s3096_s27 + $0x34] sm:$0xf] %v181_v13  ;;  %v217_v31 = vld [vmem:[%s3091_s26 + $0xf8] sm:$0xf]  ;;  %v219_v32 = vld [vmem:[%s3091_s26 + $0x100] sm:$0xf] }
  0x22   : > { %184 = vst [vmem:[%s3096_s27 + $0x38] sm:$0xf] %v183_v14  ;;  %v221_v33 = vld [vmem:[%s3091_s26 + $0x108] sm:$0xf]  ;;  %v223_v34 = vld [vmem:[%s3091_s26 + $0x110] sm:$0xf] }
  0x23   : > { %186 = vst [vmem:[%s3096_s27 + $0x3c] sm:$0xf] %v185_v15  ;;  %v225_v35 = vld [vmem:[%s3091_s26 + $0x118] sm:$0xf]  ;;  %v227_v36 = vld [vmem:[%s3091_s26 + $0x120] sm:$0xf] }
  0x24   : > { %188 = vst [vmem:[%s3096_s27 + $0x40] sm:$0xf] %v187_v16  ;;  %v229_v37 = vld [vmem:[%s3091_s26 + $0x128] sm:$0xf]  ;;  %v231_v38 = vld [vmem:[%s3091_s26 + $0x130] sm:$0xf] }
  0x25   : > { %190 = vst [vmem:[%s3096_s27 + $0x44] sm:$0xf] %v189_v17  ;;  %v233_v39 = vld [vmem:[%s3091_s26 + $0x138] sm:$0xf]  ;;  %v235_v40 = vld [vmem:[%s3091_s26 + $0x140] sm:$0xf] }
  0x26   : > { %192 = vst [vmem:[%s3096_s27 + $0x48] sm:$0xf] %v191_v18  ;;  %v237_v41 = vld [vmem:[%s3091_s26 + $0x148] sm:$0xf]  ;;  %v239_v42 = vld [vmem:[%s3091_s26 + $0x150] sm:$0xf] }
  0x27   : > { %194 = vst [vmem:[%s3096_s27 + $0x4c] sm:$0xf] %v193_v19  ;;  %v241_v43 = vld [vmem:[%s3091_s26 + $0x158] sm:$0xf]  ;;  %v243_v44 = vld [vmem:[%s3091_s26 + $0x160] sm:$0xf] }
  0x28   : > { %196 = vst [vmem:[%s3096_s27 + $0x50] sm:$0xf] %v195_v20  ;;  %v245_v45 = vld [vmem:[%s3091_s26 + $0x168] sm:$0xf]  ;;  %v247_v46 = vld [vmem:[%s3091_s26 + $0x170] sm:$0xf] }
  0x29   : > { %198 = vst [vmem:[%s3096_s27 + $0x54] sm:$0xf] %v197_v21  ;;  %v249_v47 = vld [vmem:[%s3091_s26 + $0x178] sm:$0xf]  ;;  %v251_v48 = vld [vmem:[%s3091_s26 + $0x180] sm:$0xf] }
  0x2a   : > { %200 = vst [vmem:[%s3096_s27 + $0x58] sm:$0xf] %v199_v22  ;;  %v253_v49 = vld [vmem:[%s3091_s26 + $0x188] sm:$0xf]  ;;  %v255_v50 = vld [vmem:[%s3091_s26 + $0x190] sm:$0xf] }
  0x2b   : > { %202 = vst [vmem:[%s3096_s27 + $0x5c] sm:$0xf] %v201_v23  ;;  %v257_v51 = vld [vmem:[%s3091_s26 + $0x198] sm:$0xf]  ;;  %v259_v52 = vld [vmem:[%s3091_s26 + $0x1a0] sm:$0xf] }
  0x2c   : > { %204 = vst [vmem:[%s3096_s27 + $0x60] sm:$0xf] %v203_v24  ;;  %v261_v53 = vld [vmem:[%s3091_s26 + $0x1a8] sm:$0xf]  ;;  %v263_v54 = vld [vmem:[%s3091_s26 + $0x1b0] sm:$0xf] }
  0x2d   : > { %206 = vst [vmem:[%s3096_s27 + $0x64] sm:$0xf] %v205_v25  ;;  %v265_v55 = vld [vmem:[%s3091_s26 + $0x1b8] sm:$0xf]  ;;  %v267_v56 = vld [vmem:[%s3091_s26 + $0x1c0] sm:$0xf] }
  0x2e   : > { %208 = vst [vmem:[%s3096_s27 + $0x68] sm:$0xf] %v207_v26  ;;  %v269_v57 = vld [vmem:[%s3091_s26 + $0x1c8] sm:$0xf]  ;;  %v271_v58 = vld [vmem:[%s3091_s26 + $0x1d0] sm:$0xf] }
  0x2f   : > { %210 = vst [vmem:[%s3096_s27 + $0x6c] sm:$0xf] %v209_v27  ;;  %v273_v59 = vld [vmem:[%s3091_s26 + $0x1d8] sm:$0xf]  ;;  %v275_v60 = vld [vmem:[%s3091_s26 + $0x1e0] sm:$0xf] }
  0x30   : > { %212 = vst [vmem:[%s3096_s27 + $0x70] sm:$0xf] %v211_v28  ;;  %v277_v61 = vld [vmem:[%s3091_s26 + $0x1e8] sm:$0xf]  ;;  %v279_v62 = vld [vmem:[%s3091_s26 + $0x1f0] sm:$0xf] }
  0x31   : > { %214 = vst [vmem:[%s3096_s27 + $0x74] sm:$0xf] %v213_v29  ;;  %v281_v63 = vld [vmem:[%s3091_s26 + $0x1f8] sm:$0xf]  ;;  %v283_v0 = vld [vmem:[%s3091_s26 + $0x200] sm:$0xf] }
  0x32   : > { %216 = vst [vmem:[%s3096_s27 + $0x78] sm:$0xf] %v215_v30  ;;  %v285_v1 = vld [vmem:[%s3091_s26 + $0x208] sm:$0xf]  ;;  %v287_v2 = vld [vmem:[%s3091_s26 + $0x210] sm:$0xf] }
  0x33   : > { %218 = vst [vmem:[%s3096_s27 + $0x7c] sm:$0xf] %v217_v31  ;;  %v289_v3 = vld [vmem:[%s3091_s26 + $0x218] sm:$0xf]  ;;  %v291_v4 = vld [vmem:[%s3091_s26 + $0x220] sm:$0xf] }
  0x34   : > { %220 = vst [vmem:[%s3096_s27 + $0x80] sm:$0xf] %v219_v32  ;;  %v293_v5 = vld [vmem:[%s3091_s26 + $0x228] sm:$0xf]  ;;  %v295_v6 = vld [vmem:[%s3091_s26 + $0x230] sm:$0xf] }
  0x35   : > { %222 = vst [vmem:[%s3096_s27 + $0x84] sm:$0xf] %v221_v33  ;;  %v297_v7 = vld [vmem:[%s3091_s26 + $0x238] sm:$0xf]  ;;  %v299_v8 = vld [vmem:[%s3091_s26 + $0x240] sm:$0xf] }
  0x36   : > { %224 = vst [vmem:[%s3096_s27 + $0x88] sm:$0xf] %v223_v34  ;;  %v301_v9 = vld [vmem:[%s3091_s26 + $0x248] sm:$0xf]  ;;  %v303_v10 = vld [vmem:[%s3091_s26 + $0x250] sm:$0xf] }
  0x37   : > { %226 = vst [vmem:[%s3096_s27 + $0x8c] sm:$0xf] %v225_v35  ;;  %v305_v11 = vld [vmem:[%s3091_s26 + $0x258] sm:$0xf]  ;;  %v307_v12 = vld [vmem:[%s3091_s26 + $0x260] sm:$0xf] }
  0x38   : > { %228 = vst [vmem:[%s3096_s27 + $0x90] sm:$0xf] %v227_v36  ;;  %v309_v13 = vld [vmem:[%s3091_s26 + $0x268] sm:$0xf]  ;;  %v311_v14 = vld [vmem:[%s3091_s26 + $0x270] sm:$0xf] }
  0x39   : > { %230 = vst [vmem:[%s3096_s27 + $0x94] sm:$0xf] %v229_v37  ;;  %v313_v15 = vld [vmem:[%s3091_s26 + $0x278] sm:$0xf]  ;;  %v315_v16 = vld [vmem:[%s3091_s26 + $0x280] sm:$0xf] }
  0x3a   : > { %232 = vst [vmem:[%s3096_s27 + $0x98] sm:$0xf] %v231_v38  ;;  %v317_v17 = vld [vmem:[%s3091_s26 + $0x288] sm:$0xf]  ;;  %v319_v18 = vld [vmem:[%s3091_s26 + $0x290] sm:$0xf] }
  0x3b   : > { %234 = vst [vmem:[%s3096_s27 + $0x9c] sm:$0xf] %v233_v39  ;;  %v321_v19 = vld [vmem:[%s3091_s26 + $0x298] sm:$0xf]  ;;  %v323_v20 = vld [vmem:[%s3091_s26 + $0x2a0] sm:$0xf] }
  0x3c   : > { %236 = vst [vmem:[%s3096_s27 + $0xa0] sm:$0xf] %v235_v40  ;;  %v325_v21 = vld [vmem:[%s3091_s26 + $0x2a8] sm:$0xf]  ;;  %v327_v22 = vld [vmem:[%s3091_s26 + $0x2b0] sm:$0xf] }
  0x3d   : > { %238 = vst [vmem:[%s3096_s27 + $0xa4] sm:$0xf] %v237_v41  ;;  %v329_v23 = vld [vmem:[%s3091_s26 + $0x2b8] sm:$0xf]  ;;  %v331_v24 = vld [vmem:[%s3091_s26 + $0x2c0] sm:$0xf] }
  0x3e   : > { %240 = vst [vmem:[%s3096_s27 + $0xa8] sm:$0xf] %v239_v42  ;;  %v333_v25 = vld [vmem:[%s3091_s26 + $0x2c8] sm:$0xf]  ;;  %v335_v26 = vld [vmem:[%s3091_s26 + $0x2d0] sm:$0xf] }
  0x3f   : > { %242 = vst [vmem:[%s3096_s27 + $0xac] sm:$0xf] %v241_v43  ;;  %v337_v27 = vld [vmem:[%s3091_s26 + $0x2d8] sm:$0xf]  ;;  %v339_v28 = vld [vmem:[%s3091_s26 + $0x2e0] sm:$0xf] }
  0x40   : > { %244 = vst [vmem:[%s3096_s27 + $0xb0] sm:$0xf] %v243_v44  ;;  %v341_v29 = vld [vmem:[%s3091_s26 + $0x2e8] sm:$0xf]  ;;  %v343_v30 = vld [vmem:[%s3091_s26 + $0x2f0] sm:$0xf] }
  0x41   : > { %246 = vst [vmem:[%s3096_s27 + $0xb4] sm:$0xf] %v245_v45  ;;  %v345_v31 = vld [vmem:[%s3091_s26 + $0x2f8] sm:$0xf]  ;;  %v347_v32 = vld [vmem:[%s3091_s26 + $0x300] sm:$0xf] }
  0x42   : > { %248 = vst [vmem:[%s3096_s27 + $0xb8] sm:$0xf] %v247_v46  ;;  %v349_v33 = vld [vmem:[%s3091_s26 + $0x308] sm:$0xf]  ;;  %v351_v34 = vld [vmem:[%s3091_s26 + $0x310] sm:$0xf] }
  0x43   : > { %250 = vst [vmem:[%s3096_s27 + $0xbc] sm:$0xf] %v249_v47  ;;  %v353_v35 = vld [vmem:[%s3091_s26 + $0x318] sm:$0xf]  ;;  %v355_v36 = vld [vmem:[%s3091_s26 + $0x320] sm:$0xf] }
  0x44   : > { %252 = vst [vmem:[%s3096_s27 + $0xc0] sm:$0xf] %v251_v48  ;;  %v357_v37 = vld [vmem:[%s3091_s26 + $0x328] sm:$0xf]  ;;  %v359_v38 = vld [vmem:[%s3091_s26 + $0x330] sm:$0xf] }
  0x45   : > { %254 = vst [vmem:[%s3096_s27 + $0xc4] sm:$0xf] %v253_v49  ;;  %v361_v39 = vld [vmem:[%s3091_s26 + $0x338] sm:$0xf]  ;;  %v363_v40 = vld [vmem:[%s3091_s26 + $0x340] sm:$0xf] }
  0x46   : > { %256 = vst [vmem:[%s3096_s27 + $0xc8] sm:$0xf] %v255_v50  ;;  %v365_v41 = vld [vmem:[%s3091_s26 + $0x348] sm:$0xf]  ;;  %v367_v42 = vld [vmem:[%s3091_s26 + $0x350] sm:$0xf] }
  0x47   : > { %258 = vst [vmem:[%s3096_s27 + $0xcc] sm:$0xf] %v257_v51  ;;  %v369_v43 = vld [vmem:[%s3091_s26 + $0x358] sm:$0xf]  ;;  %v371_v44 = vld [vmem:[%s3091_s26 + $0x360] sm:$0xf] }
  0x48   : > { %260 = vst [vmem:[%s3096_s27 + $0xd0] sm:$0xf] %v259_v52  ;;  %v373_v45 = vld [vmem:[%s3091_s26 + $0x368] sm:$0xf]  ;;  %v375_v46 = vld [vmem:[%s3091_s26 + $0x370] sm:$0xf] }
  0x49   : > { %262 = vst [vmem:[%s3096_s27 + $0xd4] sm:$0xf] %v261_v53  ;;  %v377_v47 = vld [vmem:[%s3091_s26 + $0x378] sm:$0xf]  ;;  %v379_v48 = vld [vmem:[%s3091_s26 + $0x380] sm:$0xf] }
  0x4a   : > { %264 = vst [vmem:[%s3096_s27 + $0xd8] sm:$0xf] %v263_v54  ;;  %v381_v49 = vld [vmem:[%s3091_s26 + $0x388] sm:$0xf]  ;;  %v383_v50 = vld [vmem:[%s3091_s26 + $0x390] sm:$0xf] }
  0x4b   : > { %266 = vst [vmem:[%s3096_s27 + $0xdc] sm:$0xf] %v265_v55  ;;  %v385_v51 = vld [vmem:[%s3091_s26 + $0x398] sm:$0xf]  ;;  %v387_v52 = vld [vmem:[%s3091_s26 + $0x3a0] sm:$0xf] }
  0x4c   : > { %268 = vst [vmem:[%s3096_s27 + $0xe0] sm:$0xf] %v267_v56  ;;  %v389_v53 = vld [vmem:[%s3091_s26 + $0x3a8] sm:$0xf]  ;;  %v391_v54 = vld [vmem:[%s3091_s26 + $0x3b0] sm:$0xf] }
  0x4d   : > { %270 = vst [vmem:[%s3096_s27 + $0xe4] sm:$0xf] %v269_v57  ;;  %v393_v55 = vld [vmem:[%s3091_s26 + $0x3b8] sm:$0xf]  ;;  %v395_v56 = vld [vmem:[%s3091_s26 + $0x3c0] sm:$0xf] }
  0x4e   : > { %272 = vst [vmem:[%s3096_s27 + $0xe8] sm:$0xf] %v271_v58  ;;  %v397_v57 = vld [vmem:[%s3091_s26 + $0x3c8] sm:$0xf]  ;;  %v399_v58 = vld [vmem:[%s3091_s26 + $0x3d0] sm:$0xf] }
  0x4f   : > { %274 = vst [vmem:[%s3096_s27 + $0xec] sm:$0xf] %v273_v59  ;;  %v401_v59 = vld [vmem:[%s3091_s26 + $0x3d8] sm:$0xf] }
  0x50   : > { %276 = vst [vmem:[%s3096_s27 + $0xf0] sm:$0xf] %v275_v60  ;;  %v403_v60 = vld [vmem:[%s3091_s26 + $0x3e0] sm:$0xf] }
  0x51   : > { %278 = vst [vmem:[%s3096_s27 + $0xf4] sm:$0xf] %v277_v61  ;;  %v405_v61 = vld [vmem:[%s3091_s26 + $0x3e8] sm:$0xf] }
  0x52   : > { %280 = vst [vmem:[%s3096_s27 + $0xf8] sm:$0xf] %v279_v62  ;;  %v407_v62 = vld [vmem:[%s3091_s26 + $0x3f0] sm:$0xf] }
  0x53   : > { %282 = vst [vmem:[%s3096_s27 + $0xfc] sm:$0xf] %v281_v63  ;;  %v409_v63 = vld [vmem:[%s3091_s26 + $0x3f8] sm:$0xf] }
  0x54   : > { %284 = vst [vmem:[%s3096_s27 + $0x100] sm:$0xf] %v283_v0  ;;  %v411_v0 = vld [vmem:[%s3091_s26 + $0x400] sm:$0xf] }
  0x55   : > { %286 = vst [vmem:[%s3096_s27 + $0x104] sm:$0xf] %v285_v1  ;;  %v413_v1 = vld [vmem:[%s3091_s26 + $0x408] sm:$0xf] }
  0x56   : > { %288 = vst [vmem:[%s3096_s27 + $0x108] sm:$0xf] %v287_v2  ;;  %v415_v2 = vld [vmem:[%s3091_s26 + $0x410] sm:$0xf] }
  0x57   : > { %290 = vst [vmem:[%s3096_s27 + $0x10c] sm:$0xf] %v289_v3  ;;  %v417_v3 = vld [vmem:[%s3091_s26 + $0x418] sm:$0xf] }
  0x58   : > { %292 = vst [vmem:[%s3096_s27 + $0x110] sm:$0xf] %v291_v4  ;;  %v419_v4 = vld [vmem:[%s3091_s26 + $0x420] sm:$0xf] }
  0x59   : > { %294 = vst [vmem:[%s3096_s27 + $0x114] sm:$0xf] %v293_v5  ;;  %v421_v5 = vld [vmem:[%s3091_s26 + $0x428] sm:$0xf] }
  0x5a   : > { %296 = vst [vmem:[%s3096_s27 + $0x118] sm:$0xf] %v295_v6  ;;  %v423_v6 = vld [vmem:[%s3091_s26 + $0x430] sm:$0xf] }
  0x5b   : > { %298 = vst [vmem:[%s3096_s27 + $0x11c] sm:$0xf] %v297_v7  ;;  %v425_v7 = vld [vmem:[%s3091_s26 + $0x438] sm:$0xf] }
  0x5c   : > { %300 = vst [vmem:[%s3096_s27 + $0x120] sm:$0xf] %v299_v8  ;;  %v427_v8 = vld [vmem:[%s3091_s26 + $0x440] sm:$0xf] }
  0x5d   : > { %302 = vst [vmem:[%s3096_s27 + $0x124] sm:$0xf] %v301_v9  ;;  %v429_v9 = vld [vmem:[%s3091_s26 + $0x448] sm:$0xf] }
  0x5e   : > { %304 = vst [vmem:[%s3096_s27 + $0x128] sm:$0xf] %v303_v10  ;;  %v431_v10 = vld [vmem:[%s3091_s26 + $0x450] sm:$0xf] }
  0x5f   : > { %306 = vst [vmem:[%s3096_s27 + $0x12c] sm:$0xf] %v305_v11  ;;  %v433_v11 = vld [vmem:[%s3091_s26 + $0x458] sm:$0xf] }
  0x60   : > { %308 = vst [vmem:[%s3096_s27 + $0x130] sm:$0xf] %v307_v12  ;;  %v435_v12 = vld [vmem:[%s3091_s26 + $0x460] sm:$0xf] }
  0x61   : > { %310 = vst [vmem:[%s3096_s27 + $0x134] sm:$0xf] %v309_v13  ;;  %v437_v13 = vld [vmem:[%s3091_s26 + $0x468] sm:$0xf] }
  0x62   : > { %312 = vst [vmem:[%s3096_s27 + $0x138] sm:$0xf] %v311_v14  ;;  %v439_v14 = vld [vmem:[%s3091_s26 + $0x470] sm:$0xf] }
  0x63   : > { %314 = vst [vmem:[%s3096_s27 + $0x13c] sm:$0xf] %v313_v15  ;;  %v441_v15 = vld [vmem:[%s3091_s26 + $0x478] sm:$0xf] }
  0x64   : > { %316 = vst [vmem:[%s3096_s27 + $0x140] sm:$0xf] %v315_v16 }
  0x65   : > { %318 = vst [vmem:[%s3096_s27 + $0x144] sm:$0xf] %v317_v17 }
  0x66   : > { %320 = vst [vmem:[%s3096_s27 + $0x148] sm:$0xf] %v319_v18 }
  0x67   : > { %322 = vst [vmem:[%s3096_s27 + $0x14c] sm:$0xf] %v321_v19 }
  0x68   : > { %324 = vst [vmem:[%s3096_s27 + $0x150] sm:$0xf] %v323_v20 }
  0x69   : > { %326 = vst [vmem:[%s3096_s27 + $0x154] sm:$0xf] %v325_v21 }
  0x6a   : > { %328 = vst [vmem:[%s3096_s27 + $0x158] sm:$0xf] %v327_v22 }
  0x6b   : > { %330 = vst [vmem:[%s3096_s27 + $0x15c] sm:$0xf] %v329_v23 }
  0x6c   : > { %332 = vst [vmem:[%s3096_s27 + $0x160] sm:$0xf] %v331_v24 }
  0x6d   : > { %334 = vst [vmem:[%s3096_s27 + $0x164] sm:$0xf] %v333_v25 }
  0x6e   : > { %336 = vst [vmem:[%s3096_s27 + $0x168] sm:$0xf] %v335_v26 }
  0x6f   : > { %338 = vst [vmem:[%s3096_s27 + $0x16c] sm:$0xf] %v337_v27 }
  0x70   : > { %340 = vst [vmem:[%s3096_s27 + $0x170] sm:$0xf] %v339_v28 }
  0x71   : > { %342 = vst [vmem:[%s3096_s27 + $0x174] sm:$0xf] %v341_v29 }
  0x72   : > { %344 = vst [vmem:[%s3096_s27 + $0x178] sm:$0xf] %v343_v30 }
  0x73   : > { %346 = vst [vmem:[%s3096_s27 + $0x17c] sm:$0xf] %v345_v31 }
  0x74   : > { %348 = vst [vmem:[%s3096_s27 + $0x180] sm:$0xf] %v347_v32 }
  0x75   : > { %350 = vst [vmem:[%s3096_s27 + $0x184] sm:$0xf] %v349_v33 }
  0x76   : > { %352 = vst [vmem:[%s3096_s27 + $0x188] sm:$0xf] %v351_v34 }
  0x77   : > { %354 = vst [vmem:[%s3096_s27 + $0x18c] sm:$0xf] %v353_v35 }
  0x78   : > { %356 = vst [vmem:[%s3096_s27 + $0x190] sm:$0xf] %v355_v36 }
  0x79   : > { %358 = vst [vmem:[%s3096_s27 + $0x194] sm:$0xf] %v357_v37 }
  0x7a   : > { %360 = vst [vmem:[%s3096_s27 + $0x198] sm:$0xf] %v359_v38 }
  0x7b   : > { %362 = vst [vmem:[%s3096_s27 + $0x19c] sm:$0xf] %v361_v39 }
  0x7c   : > { %364 = vst [vmem:[%s3096_s27 + $0x1a0] sm:$0xf] %v363_v40 }
  0x7d   : > { %366 = vst [vmem:[%s3096_s27 + $0x1a4] sm:$0xf] %v365_v41 }
  0x7e   : > { %368 = vst [vmem:[%s3096_s27 + $0x1a8] sm:$0xf] %v367_v42 }
  0x7f   : > { %370 = vst [vmem:[%s3096_s27 + $0x1ac] sm:$0xf] %v369_v43 }
  0x80   : > { %372 = vst [vmem:[%s3096_s27 + $0x1b0] sm:$0xf] %v371_v44 }
  0x81   : > { %374 = vst [vmem:[%s3096_s27 + $0x1b4] sm:$0xf] %v373_v45 }
  0x82   : > { %376 = vst [vmem:[%s3096_s27 + $0x1b8] sm:$0xf] %v375_v46 }
  0x83   : > { %378 = vst [vmem:[%s3096_s27 + $0x1bc] sm:$0xf] %v377_v47 }
  0x84   : > { %380 = vst [vmem:[%s3096_s27 + $0x1c0] sm:$0xf] %v379_v48 }
  0x85   : > { %382 = vst [vmem:[%s3096_s27 + $0x1c4] sm:$0xf] %v381_v49 }
  0x86   : > { %384 = vst [vmem:[%s3096_s27 + $0x1c8] sm:$0xf] %v383_v50 }
  0x87   : > { %386 = vst [vmem:[%s3096_s27 + $0x1cc] sm:$0xf] %v385_v51 }
  0x88   : > { %388 = vst [vmem:[%s3096_s27 + $0x1d0] sm:$0xf] %v387_v52 }
  0x89   : > { %390 = vst [vmem:[%s3096_s27 + $0x1d4] sm:$0xf] %v389_v53 }
  0x8a   : > { %392 = vst [vmem:[%s3096_s27 + $0x1d8] sm:$0xf] %v391_v54 }
  0x8b   : > { %394 = vst [vmem:[%s3096_s27 + $0x1dc] sm:$0xf] %v393_v55 }
  0x8c   : > { %396 = vst [vmem:[%s3096_s27 + $0x1e0] sm:$0xf] %v395_v56 }
  0x8d   : > { %398 = vst [vmem:[%s3096_s27 + $0x1e4] sm:$0xf] %v397_v57 }
  0x8e   : > { %400 = vst [vmem:[%s3096_s27 + $0x1e8] sm:$0xf] %v399_v58 }
  0x8f   : > { %402 = vst [vmem:[%s3096_s27 + $0x1ec] sm:$0xf] %v401_v59 }
  0x90   : > { %404 = vst [vmem:[%s3096_s27 + $0x1f0] sm:$0xf] %v403_v60 }
  0x91   : > { %406 = vst [vmem:[%s3096_s27 + $0x1f4] sm:$0xf] %v405_v61 }
  0x92   : > { %408 = vst [vmem:[%s3096_s27 + $0x1f8] sm:$0xf] %v407_v62 }
  0x93   : > { %410 = vst [vmem:[%s3096_s27 + $0x1fc] sm:$0xf] %v409_v63 }
  0x94   : > { %412 = vst [vmem:[%s3096_s27 + $0x200] sm:$0xf] %v411_v0 }
  0x95   : > { %414 = vst [vmem:[%s3096_s27 + $0x204] sm:$0xf] %v413_v1 }
  0x96   : > { %416 = vst [vmem:[%s3096_s27 + $0x208] sm:$0xf] %v415_v2 }
  0x97   : > { %418 = vst [vmem:[%s3096_s27 + $0x20c] sm:$0xf] %v417_v3 }
  0x98   : > { %420 = vst [vmem:[%s3096_s27 + $0x210] sm:$0xf] %v419_v4 }
  0x99   : > { %422 = vst [vmem:[%s3096_s27 + $0x214] sm:$0xf] %v421_v5 }
  0x9a   : > { %424 = vst [vmem:[%s3096_s27 + $0x218] sm:$0xf] %v423_v6 }
  0x9b   : > { %426 = vst [vmem:[%s3096_s27 + $0x21c] sm:$0xf] %v425_v7 }
  0x9c   : > { %428 = vst [vmem:[%s3096_s27 + $0x220] sm:$0xf] %v427_v8 }
  0x9d   : > { %430 = vst [vmem:[%s3096_s27 + $0x224] sm:$0xf] %v429_v9 }
  0x9e   : > { %432 = vst [vmem:[%s3096_s27 + $0x228] sm:$0xf] %v431_v10 }
  0x9f   : > { %434 = vst [vmem:[%s3096_s27 + $0x22c] sm:$0xf] %v433_v11 }
  0xa0   : > { %436 = vst [vmem:[%s3096_s27 + $0x230] sm:$0xf] %v435_v12 }
  0xa1   : > { %438 = vst [vmem:[%s3096_s27 + $0x234] sm:$0xf] %v437_v13 }
  0xa2   : > { %440 = vst [vmem:[%s3096_s27 + $0x238] sm:$0xf] %v439_v14 }
  0xa3   : > { %442 = vst [vmem:[%s3096_s27 + $0x23c] sm:$0xf] %v441_v15 }
  0xa4 PF: > { %p2320_p7 = scmp.ge.s32.totalorder %s3028_s14, 1  ;;  %p759_p8 = scmp.lt.s32.totalorder %s3028_s14, 3 }
  0xa6   : > { %p760_p9 = pnand %p2320_p7, %p759_p8 }
  0xa7   : > { %s766_s28 = sand.u32 (!%p760_p9), 1, %s3020_s12   ;;  %p791_p10 = scmp.lt.s32.totalorder (!%p760_p9), %s3066_s15, 1 }
  0xa8   : > { %763 = sbr.rel (%p760_p9) target bundleno = 597 (0x255), region = 69 }
  0xa9   : > { %s2979_s29 = smul.u32 (!%p760_p9), 576, %s766_s28 }
  0xaa   : > { %s2980_s22 = smul.u32 (!%p760_p9), 104, %s766_s28 }
  0xab   : > { %s3388_s30 = scalar_lea.vmem (!%p760_p9), [#allocation2], %s2979_s29 }
  0xac   : > { %s3894_s23 = scalar_lea.vmem (!%p760_p9), [#allocation3], %s2980_s22 }
  0xad   : > { %v2889_v16 = vld [vmem:[%s3388_s30 + $0x38] sm:$0xff]  ;;  %v2888_v17 = vld [vmem:[%s3388_s30 + $0x30] sm:$0xff]  ;;  %v2887_v18 = vld [vmem:[%s3388_s30 + $0x28] sm:$0xff]  ;;  %s3398_s4 = scalar_select %p791_p10, %s3066_s15, 1 }
  0xae   : > { %1747 = vmatpush.bf16.msra.mxu0 %v2889_v16  ;;  %2954 = vmatpush.bf16.msra.mxu1 %v2889_v16  ;;  %v2886_v19 = vld [vmem:[%s3388_s30 + $0x20] sm:$0xff]  ;;  %v2885_v20 = vld [vmem:[%s3388_s30 + $0x18] sm:$0xff]  ;;  %v2884_v21 = vld [vmem:[%s3388_s30 + $0x10] sm:$0xff]  ;;  %s2825_s12 = sshll.u32 (%p3081_p5), %s3066_s15, 3 }
  0xaf   : > { %2955 = vmatpush.bf16.msra.mxu2 %v2889_v16  ;;  %2956 = vmatpush.bf16.msra.mxu3 %v2889_v16  ;;  %v2883_v22 = vld [vmem:[%s3388_s30 + $0x8] sm:$0xff]  ;;  %s793_s7 = scalar_lea.vmem %s3951_s2, %s3398_s4  ;;  %v3408_v23 = vld [vmem:[%s3949_s0 + $0x1b0] sm:$0x11]  ;;  %v2323_v24 = vld [vmem:[%s3949_s0] sm:$0xf]  ;;  %s2168_s25 = scalar_lea.vmem (%p3081_p5), %s3952_s3, %s2825_s12 }
  0xb0   : > { %v2832_v25 = vld [vmem:[%s3949_s0 + $0x20] sm:$0xf0]  ;;  %v2395_v27 = vld [vmem:[%s3949_s0 + $0x90] sm:$0xf]  ;;  %v2850_v28 = vld [vmem:[%s3949_s0 + $0xb0] sm:$0xf0]  ;;  %v1180_v31 = vunpack.c.l.b16 %v3408_v23 }
  0xb1   : > { %v2882_v26 = vld [vmem:[%s3388_s30] sm:$0xff]  ;;  %v2913_v32 = vld [vmem:[%s3388_s30 + $0xf8] sm:$0xff]  ;;  %v2324_v34 = vor.u32 %v2832_v25, %v2323_v24  ;;  %v2396_v35 = vor.u32 %v2850_v28, %v2395_v27  ;;  %v2912_v40 = vld [vmem:[%s3388_s30 + $0xf0] sm:$0xff] }
  0xb2   : > { %1748 = vmatpush.bf16.msra.mxu0 %v2888_v17  ;;  %2957 = vmatpush.bf16.msra.mxu1 %v2888_v17  ;;  %v2467_v29 = vld [vmem:[%s3949_s0 + $0x120] sm:$0xf]  ;;  %v2868_v30 = vld [vmem:[%s3949_s0 + $0x140] sm:$0xf0]  ;;  %v2905_v33 = vld [vmem:[%s3388_s30 + $0xb8] sm:$0xff]  ;;  %v1243_v39 = vpack.c.b16 %v1180_v31, %v1180_v31 }
  0xb3   : > { %2958 = vmatpush.bf16.msra.mxu2 %v2888_v17  ;;  %2959 = vmatpush.bf16.msra.mxu3 %v2888_v17  ;;  %v2468_v36 = vor.u32 %v2868_v30, %v2467_v29  ;;  %v2897_v37 = vld [vmem:[%s3388_s30 + $0x78] sm:$0xff]  ;;  %v2904_v41 = vld [vmem:[%s3388_s30 + $0xb0] sm:$0xff]  ;;  %v2911_v44 = vld [vmem:[%s3388_s30 + $0xe8] sm:$0xff] }
  0xb4   : > { %v2921_v38 = vld [vmem:[%s3388_s30 + $0x138] sm:$0xff]  ;;  %v2896_v42 = vld [vmem:[%s3388_s30 + $0x70] sm:$0xff]  ;;  %v2903_v45 = vld [vmem:[%s3388_s30 + $0xa8] sm:$0xff] }
  0xb5   : > { %v2920_v43 = vld [vmem:[%s3388_s30 + $0x130] sm:$0xff]  ;;  %v2895_v46 = vld [vmem:[%s3388_s30 + $0x68] sm:$0xff]  ;;  %v2910_v48 = vld [vmem:[%s3388_s30 + $0xe0] sm:$0xff] }
  0xb6   : > { %1749 = vmatpush.bf16.msra.mxu0 %v2887_v18  ;;  %2960 = vmatpush.bf16.msra.mxu1 %v2887_v18  ;;  %v2919_v47 = vld [vmem:[%s3388_s30 + $0x128] sm:$0xff]  ;;  %v2902_v49 = vld [vmem:[%s3388_s30 + $0xa0] sm:$0xff]  ;;  %v2431_v53 = vld [vmem:[%s3949_s0 + $0xd8] sm:$0xf] }
  0xb7   : > { %2961 = vmatpush.bf16.msra.mxu2 %v2887_v18  ;;  %2962 = vmatpush.bf16.msra.mxu3 %v2887_v18  ;;  %v2894_v50 = vld [vmem:[%s3388_s30 + $0x60] sm:$0xff]  ;;  %v2359_v51 = vld [vmem:[%s3949_s0 + $0x48] sm:$0xf]  ;;  %v2841_v52 = vld [vmem:[%s3949_s0 + $0x68] sm:$0xf0] }
  0xb8   : > { %v2859_v54 = vld [vmem:[%s3949_s0 + $0xf8] sm:$0xf0]  ;;  %v2918_v55 = vld [vmem:[%s3388_s30 + $0x120] sm:$0xff]  ;;  %v2503_v56 = vld [vmem:[%s3949_s0 + $0x168] sm:$0xf]  ;;  %v2360_v60 = vor.u32 %v2841_v52, %v2359_v51 }
  0xb9   : > { %v2877_v57 = vld [vmem:[%s3949_s0 + $0x188] sm:$0xf0]  ;;  %v2909_v58 = vld [vmem:[%s3388_s30 + $0xd8] sm:$0xff]  ;;  %v2432_v61 = vor.u32 %v2859_v54, %v2431_v53  ;;  %v2908_v1 = vld [vmem:[%s3388_s30 + $0xd0] sm:$0xff] }
  0xba   : > { %1750 = vmatpush.bf16.msra.mxu0 %v2886_v19  ;;  %2963 = vmatpush.bf16.msra.mxu1 %v2886_v19  ;;  %v2901_v59 = vld [vmem:[%s3388_s30 + $0x98] sm:$0xff]  ;;  %v2504_v62 = vor.u32 %v2877_v57, %v2503_v56  ;;  %v2900_v2 = vld [vmem:[%s3388_s30 + $0x90] sm:$0xff]  ;;  %v2907_v5 = vld [vmem:[%s3388_s30 + $0xc8] sm:$0xff] }
  0xbb   : > { %2964 = vmatpush.bf16.msra.mxu2 %v2886_v19  ;;  %2965 = vmatpush.bf16.msra.mxu3 %v2886_v19  ;;  %v2893_v63 = vld [vmem:[%s3388_s30 + $0x58] sm:$0xff]  ;;  %v2892_v3 = vld [vmem:[%s3388_s30 + $0x50] sm:$0xff]  ;;  %v2899_v6 = vld [vmem:[%s3388_s30 + $0x88] sm:$0xff] }
  0xbc   : > { %v2917_v0 = vld [vmem:[%s3388_s30 + $0x118] sm:$0xff]  ;;  %v2916_v4 = vld [vmem:[%s3388_s30 + $0x110] sm:$0xff]  ;;  %v2891_v7 = vld [vmem:[%s3388_s30 + $0x48] sm:$0xff] }
  0xbd   : > { %v2915_v8 = vld [vmem:[%s3388_s30 + $0x108] sm:$0xff]  ;;  %v2906_v9 = vld [vmem:[%s3388_s30 + $0xc0] sm:$0xff]  ;;  %v2333_v13 = vld [vmem:[%s3949_s0 + $0x2c] sm:$0xf0] }
  0xbe   : > { %1751 = vmatpush.bf16.msra.mxu0 %v2885_v20  ;;  %2966 = vmatpush.bf16.msra.mxu1 %v2885_v20  ;;  %v2898_v10 = vld [vmem:[%s3388_s30 + $0x80] sm:$0xff]  ;;  %v2829_v12 = vld [vmem:[%s3949_s0 + $0xc] sm:$0xf]  ;;  %v2937_v15 = vld [vmem:[%s3388_s30 + $0x1b8] sm:$0xff] }
  0xbf   : > { %2967 = vmatpush.bf16.msra.mxu2 %v2885_v20  ;;  %2968 = vmatpush.bf16.msra.mxu3 %v2885_v20  ;;  %v2890_v11 = vld [vmem:[%s3388_s30 + $0x40] sm:$0xff]  ;;  %v2945_v16 = vld [vmem:[%s3388_s30 + $0x1f8] sm:$0xff]  ;;  %v2325_v18 = vld [vmem:[%s3949_s0 + $0x24] sm:$0xf0]  ;;  %v2336_v20 = vor.u32 %v2829_v12, %v2333_v13 }
  0xc0   : > { %v2914_v14 = vld [vmem:[%s3388_s30 + $0x100] sm:$0xff]  ;;  %v2331_v19 = vld [vmem:[%s3949_s0 + $0x8] sm:$0xf]  ;;  %v2834_v24 = vld [vmem:[%s3949_s0 + $0x30] sm:$0xf0] }
  0xc1   : > { %v2828_v17 = vld [vmem:[%s3949_s0 + $0x4] sm:$0xf]  ;;  %v2929_v25 = vld [vmem:[%s3388_s30 + $0x178] sm:$0xff]  ;;  %v2936_v28 = vld [vmem:[%s3388_s30 + $0x1b0] sm:$0xff] }
  0xc2   : > { %1752 = vmatpush.bf16.msra.mxu0 %v2884_v21  ;;  %2969 = vmatpush.bf16.msra.mxu1 %v2884_v21  ;;  %v2328_v27 = vor.u32 %v2828_v17, %v2325_v18  ;;  %v2944_v31 = vld [vmem:[%s3388_s30 + $0x1f0] sm:$0xff]  ;;  %v2926_v52 = vld [vmem:[%s3388_s30 + $0x160] sm:$0xff]  ;;  %v2933_v54 = vld [vmem:[%s3388_s30 + $0x198] sm:$0xff] }
  0xc3   : > { %2970 = vmatpush.bf16.msra.mxu2 %v2884_v21  ;;  %2971 = vmatpush.bf16.msra.mxu3 %v2884_v21  ;;  %v2833_v21 = vld [vmem:[%s3949_s0 + $0x28] sm:$0xf0]  ;;  %v2950_v53 = vld [vmem:[%s3388_s30 + $0x220] sm:$0xff]  ;;  %v2925_v56 = vld [vmem:[%s3388_s30 + $0x158] sm:$0xff] }
  0xc4   : > { %v2332_v29 = vor.u32 %v2833_v21, %v2331_v19  ;;  %v2847_v57 = vld [vmem:[%s3949_s0 + $0x9c] sm:$0xf]  ;;  %v2433_v12 = vld [vmem:[%s3949_s0 + $0xfc] sm:$0xf0]  ;;  %v2861_v17 = vld [vmem:[%s3949_s0 + $0x108] sm:$0xf0] }
  0xc5   : > { %v2439_v13 = vld [vmem:[%s3949_s0 + $0xe0] sm:$0xf]  ;;  %v2948_v21 = vld [vmem:[%s3388_s30 + $0x210] sm:$0xff] }
  0xc6   : > { %1753 = vmatpush.bf16.msra.mxu0 %v2883_v22  ;;  %2972 = vmatpush.bf16.msra.mxu1 %v2883_v22 }
  0xc7   : > { %2973 = vmatpush.bf16.msra.mxu2 %v2883_v22  ;;  %2974 = vmatpush.bf16.msra.mxu3 %v2883_v22  ;;  %v2339_v22 = vld [vmem:[%s3949_s0 + $0x10] sm:$0xf] }
  0xc8   : > { %v2340_v30 = vor.u32 %v2834_v24, %v2339_v22  ;;  %v2931_v22 = vld [vmem:[%s3388_s30 + $0x188] sm:$0xff] }
  0xc9   : > { %v2939_v24 = vld [vmem:[%s3388_s30 + $0x1c8] sm:$0xff] }
  0xca   : > { %1754 = vmatpush.bf16.msra.mxu0 %v2882_v26  ;;  %2975 = vmatpush.bf16.msra.mxu1 %v2882_v26 }
  0xcb   : > { %2976 = vmatpush.bf16.msra.mxu2 %v2882_v26  ;;  %2977 = vmatpush.bf16.msra.mxu3 %v2882_v26  ;;  %v2953_v26 = vld [vmem:[%s3388_s30 + $0x238] sm:$0xff] }
  0xcd   : > { %1755 = vmatmul.bf16.vlgmr.msra.gmra.mxu0 %v2324_v34  ;;  %1765 = vmatmul.bf16.vlgmr.msra.gmra.mxu1 %v2396_v35  ;;  %v2935_v34 = vld [vmem:[%s3388_s30 + $0x1a8] sm:$0xff] }
  0xce   : > { %1775 = vmatmul.bf16.vlgmr.msra.gmra.mxu2 %v2468_v36  ;;  %1790 = vmatpush.bf16.msrb.mxu1 %v2897_v37  ;;  %v2943_v35 = vld [vmem:[%s3388_s30 + $0x1e8] sm:$0xff] }
  0xcf   : > { %1876 = vmatpush.bf16.msrb.mxu3 %v2913_v32  ;;  %1833 = vmatpush.bf16.msrb.mxu2 %v2905_v33  ;;  %v2928_v32 = vld [vmem:[%s3388_s30 + $0x170] sm:$0xff]  ;;  %v2927_v36 = vld [vmem:[%s3388_s30 + $0x168] sm:$0xff] }
  0xd0   : > { %1919 = vmatpush.bf16.msrb.mxu0 %v2921_v38  ;;  %1785 = vmatmul.bf16.vlgmr.msra.gmra.mxu3 %v1243_v39  ;;  %v2952_v33 = vld [vmem:[%s3388_s30 + $0x230] sm:$0xff]  ;;  %v2951_v37 = vld [vmem:[%s3388_s30 + $0x228] sm:$0xff]  ;;  %v2934_v38 = vld [vmem:[%s3388_s30 + $0x1a0] sm:$0xff] }
  0xd1   : > { %v2942_v39 = vld [vmem:[%s3388_s30 + $0x1e0] sm:$0xff] }
  0xd2   : > { %1791 = vmatpush.bf16.msrb.mxu1 %v2896_v42  ;;  %v2837_v42 = vld [vmem:[%s3949_s0 + $0x4c] sm:$0xf] }
  0xd3   : > { %1877 = vmatpush.bf16.msrb.mxu3 %v2912_v40  ;;  %1834 = vmatpush.bf16.msrb.mxu2 %v2904_v41  ;;  %v2838_v40 = vld [vmem:[%s3949_s0 + $0x54] sm:$0xf]  ;;  %v2369_v41 = vld [vmem:[%s3949_s0 + $0x74] sm:$0xf0] }
  0xd4   : > { %1920 = vmatpush.bf16.msrb.mxu0 %v2920_v43  ;;  %v2361_v43 = vld [vmem:[%s3949_s0 + $0x6c] sm:$0xf0] }
  0xd6   : > { %1792 = vmatpush.bf16.msrb.mxu1 %v2895_v46  ;;  %v2842_v46 = vld [vmem:[%s3949_s0 + $0x70] sm:$0xf0] }
  0xd7   : > { %1878 = vmatpush.bf16.msrb.mxu3 %v2911_v44  ;;  %1835 = vmatpush.bf16.msrb.mxu2 %v2903_v45  ;;  %v2367_v44 = vld [vmem:[%s3949_s0 + $0x50] sm:$0xf]  ;;  %v2372_v45 = vor.u32 %v2838_v40, %v2369_v41  ;;  %v2938_v40 = vld [vmem:[%s3388_s30 + $0x1c0] sm:$0xff] }
  0xd8   : > { %1921 = vmatpush.bf16.msrb.mxu0 %v2919_v47  ;;  %v2375_v47 = vld [vmem:[%s3949_s0 + $0x58] sm:$0xf]  ;;  %v2922_v41 = vld [vmem:[%s3388_s30 + $0x140] sm:$0xff] }
  0xda   : > { %1793 = vmatpush.bf16.msrb.mxu1 %v2894_v50  ;;  %v2368_v50 = vor.u32 %v2842_v46, %v2367_v44  ;;  %v2513_v44 = vld [vmem:[%s3949_s0 + $0x194] sm:$0xf0]  ;;  %v2505_v46 = vld [vmem:[%s3949_s0 + $0x18c] sm:$0xf0] }
  0xdb   : > { %1879 = vmatpush.bf16.msrb.mxu3 %v2910_v48  ;;  %1836 = vmatpush.bf16.msrb.mxu2 %v2902_v49  ;;  %v2843_v48 = vld [vmem:[%s3949_s0 + $0x78] sm:$0xf0]  ;;  %v2364_v49 = vor.u32 %v2837_v42, %v2361_v43  ;;  %v2946_v42 = vld [vmem:[%s3388_s30 + $0x200] sm:$0xff]  ;;  %v2874_v43 = vld [vmem:[%s3949_s0 + $0x174] sm:$0xf] }
  0xdc   : > { %1922 = vmatpush.bf16.msrb.mxu0 %v2918_v55  ;;  %v2376_v51 = vor.u32 %v2843_v48, %v2375_v47  ;;  %v2941_v55 = vld [vmem:[%s3388_s30 + $0x1d8] sm:$0xff]  ;;  %v2511_v47 = vld [vmem:[%s3949_s0 + $0x170] sm:$0xf]  ;;  %v2516_v48 = vor.u32 %v2874_v43, %v2513_v44 }
  0xdd   : > { %1760 = vmatmul.bf16.gmra.mxu0 %v2360_v60  ;;  %1770 = vmatmul.bf16.gmra.mxu1 %v2432_v61  ;;  %v2397_v60 = vld [vmem:[%s3949_s0 + $0xb4] sm:$0xf0] }
  0xde   : > { %1780 = vmatmul.bf16.gmra.mxu2 %v2504_v62  ;;  %1794 = vmatpush.bf16.msrb.mxu1 %v2893_v63  ;;  %v2403_v61 = vld [vmem:[%s3949_s0 + $0x98] sm:$0xf]  ;;  %v2851_v63 = vld [vmem:[%s3949_s0 + $0xb8] sm:$0xf0] }
  0xdf   : > { %1880 = vmatpush.bf16.msrb.mxu3 %v2909_v58  ;;  %1837 = vmatpush.bf16.msrb.mxu2 %v2901_v59  ;;  %v2405_v58 = vld [vmem:[%s3949_s0 + $0xbc] sm:$0xf0]  ;;  %v2846_v59 = vld [vmem:[%s3949_s0 + $0x94] sm:$0xf] }
  0xe0   : > { %1923 = vmatpush.bf16.msrb.mxu0 %v2917_v0  ;;  %v2408_v62 = vor.u32 %v2847_v57, %v2405_v58  ;;  %v2411_v0 = vld [vmem:[%s3949_s0 + $0xa0] sm:$0xf]  ;;  %v1181_v58 = vunpack.c.h.b16 %v3408_v23 }
  0xe1   : > { %v3662_v57 = vld [vmem:[%s3949_s0 + $0x1c0] sm:$0x11] }
  0xe2   : > { %1795 = vmatpush.bf16.msrb.mxu1 %v2892_v3  ;;  %v2404_v3 = vor.u32 %v2851_v63, %v2403_v61 }
  0xe3   : > { %1881 = vmatpush.bf16.msrb.mxu3 %v2908_v1  ;;  %1838 = vmatpush.bf16.msrb.mxu2 %v2900_v2  ;;  %v2852_v1 = vld [vmem:[%s3949_s0 + $0xc0] sm:$0xf0]  ;;  %v2400_v2 = vor.u32 %v2846_v59, %v2397_v60  ;;  %v1184_v60 = vunpack.c.l.b16 %v3662_v57 }
  0xe4   : > { %1924 = vmatpush.bf16.msrb.mxu0 %v2916_v4  ;;  %v2412_v4 = vor.u32 %v2852_v1, %v2411_v0 }
  0xe6   : > { %1796 = vmatpush.bf16.msrb.mxu1 %v2891_v7  ;;  %v2940_v7 = vld [vmem:[%s3388_s30 + $0x1d0] sm:$0xff] }
  0xe7   : > { %1882 = vmatpush.bf16.msrb.mxu3 %v2907_v5  ;;  %1839 = vmatpush.bf16.msrb.mxu2 %v2899_v6  ;;  %v2949_v5 = vld [vmem:[%s3388_s30 + $0x218] sm:$0xff]  ;;  %v2932_v6 = vld [vmem:[%s3388_s30 + $0x190] sm:$0xff] }
  0xe8   : > { %1925 = vmatpush.bf16.msrb.mxu0 %v2915_v8  ;;  %v2924_v8 = vld [vmem:[%s3388_s30 + $0x150] sm:$0xff] }
  0xea   : > { %1797 = vmatpush.bf16.msrb.mxu1 %v2890_v11  ;;  %v2855_v11 = vld [vmem:[%s3949_s0 + $0xdc] sm:$0xf] }
  0xeb   : > { %1883 = vmatpush.bf16.msrb.mxu3 %v2906_v9  ;;  %1840 = vmatpush.bf16.msrb.mxu2 %v2898_v10  ;;  %v2856_v9 = vld [vmem:[%s3949_s0 + $0xe4] sm:$0xf]  ;;  %v2441_v10 = vld [vmem:[%s3949_s0 + $0x104] sm:$0xf0]  ;;  %v2436_v18 = vor.u32 %v2855_v11, %v2433_v12  ;;  %v2830_v11 = vld [vmem:[%s3949_s0 + $0x14] sm:$0xf] }
  0xec   : > { %1926 = vmatpush.bf16.msrb.mxu0 %v2914_v14  ;;  %v2444_v14 = vor.u32 %v2856_v9, %v2441_v10  ;;  %v2831_v9 = vld [vmem:[%s3949_s0 + $0x1c] sm:$0xf]  ;;  %v2349_v10 = vld [vmem:[%s3949_s0 + $0x3c] sm:$0xf0]  ;;  %v2341_v12 = vld [vmem:[%s3949_s0 + $0x34] sm:$0xf0] }
  0xed   : > { %1798 = vmatmul.bf16.vlgmr.msrb.gmra.mxu1 %v2328_v27  ;;  %v2865_v27 = vld [vmem:[%s3949_s0 + $0x12c] sm:$0xf] }
  0xee   : > { %1884 = vmatmul.bf16.vlgmr.msrb.gmra.mxu3 %v2336_v20  ;;  %1962 = vmatpush.bf16.msra.mxu1 %v2929_v25  ;;  %v2923_v25 = vld [vmem:[%s3388_s30 + $0x148] sm:$0xff] }
  0xef   : > { %2005 = vmatpush.bf16.msra.mxu2 %v2937_v15  ;;  %2048 = vmatpush.bf16.msra.mxu3 %v2945_v16  ;;  %v2860_v15 = vld [vmem:[%s3949_s0 + $0x100] sm:$0xf0]  ;;  %v2447_v16 = vld [vmem:[%s3949_s0 + $0xe8] sm:$0xf] }
  0xf0   : > { %2091 = vmatpush.bf16.msra.mxu0 %v2953_v26  ;;  %1841 = vmatmul.bf16.vlgmr.msrb.gmra.mxu2 %v2332_v29  ;;  %v2440_v19 = vor.u32 %v2860_v15, %v2439_v13  ;;  %v2448_v20 = vor.u32 %v2861_v17, %v2447_v16  ;;  %v2947_v26 = vld [vmem:[%s3388_s30 + $0x208] sm:$0xff]  ;;  %v2864_v29 = vld [vmem:[%s3949_s0 + $0x124] sm:$0xf]  ;;  %v2347_v13 = vld [vmem:[%s3949_s0 + $0x18] sm:$0xf] }
  0xf1   : > { %1927 = vmatmul.bf16.vlgmr.msrb.gmra.mxu0 %v2340_v30  ;;  %v2469_v30 = vld [vmem:[%s3949_s0 + $0x144] sm:$0xf0]  ;;  %v2835_v15 = vld [vmem:[%s3949_s0 + $0x38] sm:$0xf0]  ;;  %v2355_v16 = vld [vmem:[%s3949_s0 + $0x20] sm:$0xf] }
  0xf2   : > { %1963 = vmatpush.bf16.msra.mxu1 %v2928_v32  ;;  %v2836_v17 = vld [vmem:[%s3949_s0 + $0x40] sm:$0xf0] }
  0xf3   : > { %2006 = vmatpush.bf16.msra.mxu2 %v2936_v28  ;;  %2049 = vmatpush.bf16.msra.mxu3 %v2944_v31  ;;  %v2477_v28 = vld [vmem:[%s3949_s0 + $0x14c] sm:$0xf0]  ;;  %v2475_v31 = vld [vmem:[%s3949_s0 + $0x128] sm:$0xf] }
  0xf4   : > { %2092 = vmatpush.bf16.msra.mxu0 %v2952_v33  ;;  %v2480_v32 = vor.u32 %v2865_v27, %v2477_v28  ;;  %v2869_v33 = vld [vmem:[%s3949_s0 + $0x148] sm:$0xf0] }
  0xf6   : > { %1964 = vmatpush.bf16.msra.mxu1 %v2927_v36  ;;  %v2472_v36 = vor.u32 %v2864_v29, %v2469_v30 }
  0xf7   : > { %2007 = vmatpush.bf16.msra.mxu2 %v2935_v34  ;;  %2050 = vmatpush.bf16.msra.mxu3 %v2943_v35  ;;  %v2483_v34 = vld [vmem:[%s3949_s0 + $0x130] sm:$0xf]  ;;  %v2870_v35 = vld [vmem:[%s3949_s0 + $0x150] sm:$0xf0] }
  0xf8   : > { %2093 = vmatpush.bf16.msra.mxu0 %v2951_v37  ;;  %v2476_v37 = vor.u32 %v2869_v33, %v2475_v31  ;;  %v2840_v31 = vld [vmem:[%s3949_s0 + $0x64] sm:$0xf]  ;;  %v2839_v33 = vld [vmem:[%s3949_s0 + $0x5c] sm:$0xf] }
  0xfa   : > { %1965 = vmatpush.bf16.msra.mxu1 %v2926_v52 }
  0xfb   : > { %2008 = vmatpush.bf16.msra.mxu2 %v2934_v38  ;;  %2051 = vmatpush.bf16.msra.mxu3 %v2942_v39  ;;  %v2484_v38 = vor.u32 %v2870_v35, %v2483_v34  ;;  %v2930_v39 = vld [vmem:[%s3388_s30 + $0x180] sm:$0xff] }
  0xfc   : > { %2094 = vmatpush.bf16.msra.mxu0 %v2950_v53  ;;  %v2377_v34 = vld [vmem:[%s3949_s0 + $0x7c] sm:$0xf0] }
  0xfd   : > { %1803 = vmatmul.bf16.gmra.mxu1 %v2364_v49  ;;  %v2878_v49 = vld [vmem:[%s3949_s0 + $0x190] sm:$0xf0]  ;;  %v2383_v35 = vld [vmem:[%s3949_s0 + $0x60] sm:$0xf] }
  0xfe   : > { %1889 = vmatmul.bf16.gmra.mxu3 %v2372_v45  ;;  %1966 = vmatpush.bf16.msra.mxu1 %v2925_v56  ;;  %v2873_v45 = vld [vmem:[%s3949_s0 + $0x16c] sm:$0xf]  ;;  %v2512_v53 = vor.u32 %v2878_v49, %v2511_v47 }
  0xff   : > { %2009 = vmatpush.bf16.msra.mxu2 %v2933_v54  ;;  %2052 = vmatpush.bf16.msra.mxu3 %v2941_v55  ;;  %v2508_v52 = vor.u32 %v2873_v45, %v2505_v46  ;;  %v855_v55 = vld [vmem:[%s3949_s0 + $0x1b8] sm:$0x11] }
 0x100   : > { %1846 = vmatmul.bf16.gmra.mxu2 %v2368_v50  ;;  %2095 = vmatpush.bf16.msra.mxu0 %v2949_v5  ;;  %v2519_v50 = vld [vmem:[%s3949_s0 + $0x178] sm:$0xf]  ;;  %v1183_v56 = vunpack.c.h.b16 %v855_v55  ;;  %v1182_v59 = vunpack.c.l.b16 %v855_v55 }
 0x101   : > { %1932 = vmatmul.bf16.gmra.mxu0 %v2376_v51  ;;  %v2879_v51 = vld [vmem:[%s3949_s0 + $0x198] sm:$0xf0] }
 0x102   : > { %1967 = vmatpush.bf16.msra.mxu1 %v2924_v8  ;;  %v2520_v54 = vor.u32 %v2879_v51, %v2519_v50  ;;  %v1246_v61 = vpack.c.b16 %v1183_v56, %v1183_v56  ;;  %v1245_v1 = vpack.c.b16 %v1182_v59, %v1182_v59  ;;  %v2421_v59 = vld [vmem:[%s3949_s0 + $0xcc] sm:$0xf0] }
 0x103   : > { %2010 = vmatpush.bf16.msra.mxu2 %v2932_v6  ;;  %2053 = vmatpush.bf16.msra.mxu3 %v2940_v7 }
 0x104   : > { %2096 = vmatpush.bf16.msra.mxu0 %v2948_v21 }
 0x106   : > { %1968 = vmatpush.bf16.msra.mxu1 %v2923_v25  ;;  %v2356_v25 = vor.u32 %v2836_v17, %v2355_v16 }
 0x107   : > { %2011 = vmatpush.bf16.msra.mxu2 %v2931_v22  ;;  %2054 = vmatpush.bf16.msra.mxu3 %v2939_v24  ;;  %v2348_v24 = vor.u32 %v2835_v15, %v2347_v13 }
 0x108   : > { %2097 = vmatpush.bf16.msra.mxu0 %v2947_v26 }
 0x10a   : > { %1969 = vmatpush.bf16.msra.mxu1 %v2922_v41 }
 0x10b   : > { %2012 = vmatpush.bf16.msra.mxu2 %v2930_v39  ;;  %2055 = vmatpush.bf16.msra.mxu3 %v2938_v40  ;;  %v2845_v39 = vld [vmem:[%s3949_s0 + $0x88] sm:$0xf0] }
 0x10c   : > { %2098 = vmatpush.bf16.msra.mxu0 %v2946_v42  ;;  %v2380_v42 = vor.u32 %v2839_v33, %v2377_v34  ;;  %v2858_v34 = vld [vmem:[%s3949_s0 + $0xf4] sm:$0xf] }
 0x10d   : > { %1808 = vmatmul.bf16.gmra.mxu1 %v2400_v2  ;;  %v1247_v2 = vpack.c.b16 %v1184_v60, %v1184_v60 }
 0x10e   : > { %1894 = vmatmul.bf16.gmra.mxu3 %v2408_v62  ;;  %v1244_v62 = vpack.c.b16 %v1181_v58, %v1181_v58  ;;  %v2849_v58 = vld [vmem:[%s3949_s0 + $0xac] sm:$0xf] }
 0x110   : > { %1851 = vmatmul.bf16.gmra.mxu2 %v2404_v3  ;;  %v3673_v3 = vld [vmem:[%s793_s7] ss:$0 sm:$0xff] }
 0x111   : > { %1937 = vmatmul.bf16.gmra.mxu0 %v2412_v4 }
 0x11d   : > { %1813 = vmatmul.bf16.gmra.mxu1 %v2436_v18 }
 0x11e   : > { %1899 = vmatmul.bf16.gmra.mxu3 %v2444_v14  ;;  %v2352_v14 = vor.u32 %v2831_v9, %v2349_v10 }
 0x120   : > { %1856 = vmatmul.bf16.gmra.mxu2 %v2440_v19  ;;  %v2344_v19 = vor.u32 %v2830_v11, %v2341_v12 }
 0x121   : > { %1942 = vmatmul.bf16.gmra.mxu0 %v2448_v20 }
 0x12d   : > { %1818 = vmatmul.bf16.gmra.mxu1 %v2472_v36 }
 0x12e   : > { %1904 = vmatmul.bf16.gmra.mxu3 %v2480_v32  ;;  %v2385_v32 = vld [vmem:[%s3949_s0 + $0x84] sm:$0xf0] }
 0x12f   : > { %v2388_v36 = vor.u32 %v2840_v31, %v2385_v32 }
 0x130   : > { %1861 = vmatmul.bf16.gmra.mxu2 %v2476_v37  ;;  %v2844_v37 = vld [vmem:[%s3949_s0 + $0x80] sm:$0xf0] }
 0x131   : > { %1947 = vmatmul.bf16.gmra.mxu0 %v2484_v38  ;;  %v2391_v38 = vld [vmem:[%s3949_s0 + $0x68] sm:$0xf]  ;;  %v2384_v45 = vor.u32 %v2844_v37, %v2383_v35  ;;  %v2457_v35 = vld [vmem:[%s3949_s0 + $0x114] sm:$0xf0]  ;;  %v2857_v37 = vld [vmem:[%s3949_s0 + $0xec] sm:$0xf] }
 0x132   : > { %v2392_v46 = vor.u32 %v2845_v39, %v2391_v38  ;;  %v2455_v38 = vld [vmem:[%s3949_s0 + $0xf0] sm:$0xf] }
 0x13d   : > { %1823 = vmatmul.bf16.gmra.mxu1 %v2508_v52 }
 0x13e   : > { %1909 = vmatmul.bf16.gmra.mxu3 %v2516_v48 }
 0x140   : > { %1866 = vmatmul.bf16.gmra.mxu2 %v2512_v53 }
 0x141   : > { %1952 = vmatmul.bf16.gmra.mxu0 %v2520_v54 }
 0x14a   : > { %v1756_v63 = vpop.f32.mrf.mxu0  ;;  %v3666_v0 = vpop.f32.mrf.mxu1 }
 0x14b   : > { %v1757_v40 = vadd.f32 %v3673_v3, %v1756_v63  ;;  %v2419_v63 = vld [vmem:[%s3949_s0 + $0xa8] sm:$0xf] }
 0x14d   : > { %1828 = vmatmul.bf16.gmra.mxu1 %v1244_v62  ;;  %v2413_v62 = vld [vmem:[%s3949_s0 + $0xc4] sm:$0xf0] }
 0x14e   : > { %1914 = vmatmul.bf16.gmra.mxu3 %v1246_v61  ;;  %v2848_v61 = vld [vmem:[%s3949_s0 + $0xa4] sm:$0xf] }
 0x14f   : > { %v2416_v11 = vor.u32 %v2848_v61, %v2413_v62 }
 0x150   : > { %1871 = vmatmul.bf16.gmra.mxu2 %v1245_v1 }
 0x151   : > { %1957 = vmatmul.bf16.gmra.mxu0 %v1247_v2  ;;  %v1776_v23 = vpop.f32.mrf.mxu2  ;;  %v2424_v2 = vor.u32 %v2849_v58, %v2421_v59 }
 0x152   : > { %v3676_v4 = vadd.f32 %v3673_v3, %v1776_v23  ;;  %v1758_v5 = vpop.f32.mrf.mxu0  ;;  %v3678_v6 = vpop.f32.mrf.mxu1  ;;  %v2853_v23 = vld [vmem:[%s3949_s0 + $0xc8] sm:$0xf0] }
 0x153   : > { %v1786_v7 = vpop.f32.mrf.mxu3  ;;  %v1759_v50 = vadd.f32 %v3673_v3, %v1758_v5  ;;  %v2427_v5 = vld [vmem:[%s3949_s0 + $0xb0] sm:$0xf]  ;;  %v1769_v58 = vadd.f32 %v3673_v3, %v3678_v6  ;;  %v2485_v6 = vld [vmem:[%s3949_s0 + $0x154] sm:$0xf0] }
 0x154   : > { %v3681_v8 = vadd.f32 %v3673_v3, %v1786_v7  ;;  %v2854_v7 = vld [vmem:[%s3949_s0 + $0xd0] sm:$0xf0] }
 0x155   : > { %v2428_v15 = vor.u32 %v2854_v7, %v2427_v5  ;;  %v2866_v7 = vld [vmem:[%s3949_s0 + $0x134] sm:$0xf] }
 0x159   : > { %v1778_v18 = vpop.f32.mrf.mxu2 }
 0x15a   : > { %v3708_v20 = vadd.f32 %v3673_v3, %v1778_v18  ;;  %v1761_v21 = vpop.f32.mrf.mxu0  ;;  %v3710_v22 = vpop.f32.mrf.mxu1 }
 0x15b   : > { %v1788_v26 = vpop.f32.mrf.mxu3  ;;  %v1762_v9 = vadd.f32 %v3673_v3, %v1761_v21 }
 0x15d   : > { %1970 = vmatmul.bf16.vlgmr.msra.gmra.mxu1 %v2344_v19 }
 0x15e   : > { %2056 = vmatmul.bf16.vlgmr.msra.gmra.mxu3 %v2352_v14  ;;  %v2420_v14 = vor.u32 %v2853_v23, %v2419_v63  ;;  %v2493_v23 = vld [vmem:[%s3949_s0 + $0x15c] sm:$0xf0] }
 0x160   : > { %2013 = vmatmul.bf16.vlgmr.msra.gmra.mxu2 %v2348_v24 }
 0x161   : > { %2099 = vmatmul.bf16.vlgmr.msra.gmra.mxu0 %v2356_v25  ;;  %v1781_v27 = vpop.f32.mrf.mxu2 }
 0x162   : > { %v3713_v28 = vadd.f32 %v3673_v3, %v1781_v27  ;;  %v1763_v29 = vpop.f32.mrf.mxu0  ;;  %v3715_v30 = vpop.f32.mrf.mxu1 }
 0x163   : > { %v1764_v25 = vadd.f32 %v3673_v3, %v1763_v29  ;;  %v2449_v29 = vld [vmem:[%s3949_s0 + $0x10c] sm:$0xf0] }
 0x169   : > { %v1783_v41 = vpop.f32.mrf.mxu2 }
 0x16a   : > { %v3743_v43 = vadd.f32 %v3673_v3, %v1783_v41  ;;  %v1799_v44 = vpop.f32.mrf.mxu1  ;;  %v2862_v41 = vld [vmem:[%s3949_s0 + $0x110] sm:$0xf0] }
 0x16b   : > { %v1800_v47 = vadd.f32 %v1799_v44, %v1757_v40  ;;  %v2460_v40 = vor.u32 %v2858_v34, %v2457_v35  ;;  %v2863_v44 = vld [vmem:[%s3949_s0 + $0x118] sm:$0xf0]  ;;  %v1774_v34 = vadd.f32 %v3673_v3, %v3715_v30  ;;  %v2527_v30 = vld [vmem:[%s3949_s0 + $0x180] sm:$0xf] }
 0x16d   : > { %1975 = vmatmul.bf16.gmra.mxu1 %v2380_v42  ;;  %v2463_v42 = vld [vmem:[%s3949_s0 + $0xf8] sm:$0xf] }
 0x16e   : > { %v1928_v48 = vpop.f32.mrf.mxu0  ;;  %2061 = vmatmul.bf16.gmra.mxu3 %v2388_v36 }
 0x170   : > { %2018 = vmatmul.bf16.gmra.mxu2 %v2384_v45  ;;  %v1767_v45 = vadd.f32 %v3673_v3, %v3666_v0 }
 0x171   : > { %v1885_v49 = vpop.f32.mrf.mxu3  ;;  %2104 = vmatmul.bf16.gmra.mxu0 %v2392_v46 }
 0x172   : > { %v1801_v53 = vpop.f32.mrf.mxu1 }
 0x173   : > { %v1842_v51 = vpop.f32.mrf.mxu2  ;;  %v1802_v54 = vadd.f32 %v1801_v53, %v1759_v50  ;;  %v2456_v50 = vor.u32 %v2862_v41, %v2455_v38  ;;  %v2529_v41 = vld [vmem:[%s3949_s0 + $0x1a4] sm:$0xf0] }
 0x174   : > { %v1843_v52 = vadd.f32 %v1842_v51, %v1800_v47  ;;  %v2452_v47 = vor.u32 %v2857_v37, %v2449_v29  ;;  %v2464_v51 = vor.u32 %v2863_v44, %v2463_v42  ;;  %v2875_v44 = vld [vmem:[%s3949_s0 + $0x17c] sm:$0xf] }
 0x176   : > { %v1930_v55 = vpop.f32.mrf.mxu0  ;;  %v1886_v56 = vadd.f32 %v1885_v49, %v1843_v52 }
 0x178   : > { %v3761_v1 = vadd.f32 %v1928_v48, %v1886_v56 }
 0x179   : > { %v1887_v60 = vpop.f32.mrf.mxu3 }
 0x17a   : > { %v1804_v13 = vpop.f32.mrf.mxu1 }
 0x17b   : > { %v1844_v10 = vpop.f32.mrf.mxu2  ;;  %v1805_v16 = vadd.f32 %v1804_v13, %v1762_v9  ;;  %v2491_v9 = vld [vmem:[%s3949_s0 + $0x138] sm:$0xf]  ;;  %v2499_v13 = vld [vmem:[%s3949_s0 + $0x140] sm:$0xf] }
 0x17c   : > { %v1845_v12 = vadd.f32 %v1844_v10, %v1802_v54 }
 0x17d   : > { %1980 = vmatmul.bf16.gmra.mxu1 %v2416_v11 }
 0x17e   : > { %v1933_v17 = vpop.f32.mrf.mxu0  ;;  %2066 = vmatmul.bf16.gmra.mxu3 %v2424_v2  ;;  %v1888_v18 = vadd.f32 %v1887_v60, %v1845_v12  ;;  %v2867_v2 = vld [vmem:[%s3949_s0 + $0x13c] sm:$0xf] }
 0x17f   : > { %v2496_v11 = vor.u32 %v2867_v2, %v2493_v23  ;;  %v2871_v12 = vld [vmem:[%s3949_s0 + $0x158] sm:$0xf0] }
 0x180   : > { %2023 = vmatmul.bf16.gmra.mxu2 %v2420_v14  ;;  %v3773_v24 = vadd.f32 %v1930_v55, %v1888_v18  ;;  %v2872_v14 = vld [vmem:[%s3949_s0 + $0x160] sm:$0xf0] }
 0x181   : > { %v1890_v19 = vpop.f32.mrf.mxu3  ;;  %2109 = vmatmul.bf16.gmra.mxu0 %v2428_v15  ;;  %v1772_v15 = vadd.f32 %v3673_v3, %v3710_v22  ;;  %v2521_v3 = vld [vmem:[%s3949_s0 + $0x19c] sm:$0xf0] }
 0x182   : > { %v1806_v27 = vpop.f32.mrf.mxu1 }
 0x183   : > { %v1847_v26 = vpop.f32.mrf.mxu2  ;;  %v1807_v31 = vadd.f32 %v1806_v27, %v1764_v25  ;;  %v2492_v25 = vor.u32 %v2871_v12, %v2491_v9 }
 0x184   : > { %v1848_v21 = vadd.f32 %v1847_v26, %v1805_v16  ;;  %v2500_v26 = vor.u32 %v2872_v14, %v2499_v13 }
 0x186   : > { %v1935_v32 = vpop.f32.mrf.mxu0  ;;  %v1891_v33 = vadd.f32 %v1890_v19, %v1848_v21 }
 0x188   : > { %v3791_v39 = vadd.f32 %v1933_v17, %v1891_v33  ;;  %v2488_v17 = vor.u32 %v2866_v7, %v2485_v6  ;;  %v858_v6 = vld [vmem:[%s3949_s0 + $0x1d0] sm:$0x1] }
 0x189   : > { %v1892_v36 = vpop.f32.mrf.mxu3  ;;  %v1188_v14 = vunpack.c.l.b16 %v858_v6 }
 0x18a   : > { %v1809_v49 = vpop.f32.mrf.mxu1 }
 0x18b   : > { %v1849_v46 = vpop.f32.mrf.mxu2  ;;  %v1810_v52 = vadd.f32 %v1809_v49, %v1767_v45  ;;  %v2881_v49 = vld [vmem:[%s3949_s0 + $0x1a8] sm:$0xf0] }
 0x18c   : > { %v1850_v48 = vadd.f32 %v1849_v46, %v1807_v31 }
 0x18d   : > { %1985 = vmatmul.bf16.gmra.mxu1 %v2452_v47  ;;  %v2880_v47 = vld [vmem:[%s3949_s0 + $0x1a0] sm:$0xf0] }
 0x18e   : > { %v1938_v53 = vpop.f32.mrf.mxu0  ;;  %2071 = vmatmul.bf16.gmra.mxu3 %v2460_v40  ;;  %v1893_v54 = vadd.f32 %v1892_v36, %v1850_v48  ;;  %v2876_v40 = vld [vmem:[%s3949_s0 + $0x184] sm:$0xf]  ;;  %v2535_v48 = vld [vmem:[%s3949_s0 + $0x188] sm:$0xf] }
 0x18f   : > { %v2532_v46 = vor.u32 %v2876_v40, %v2529_v41 }
 0x190   : > { %2028 = vmatmul.bf16.gmra.mxu2 %v2456_v50  ;;  %v3804_v56 = vadd.f32 %v1935_v32, %v1893_v54  ;;  %v2528_v54 = vor.u32 %v2880_v47, %v2527_v30 }
 0x191   : > { %v1895_v55 = vpop.f32.mrf.mxu3  ;;  %2114 = vmatmul.bf16.gmra.mxu0 %v2464_v51  ;;  %v2524_v51 = vor.u32 %v2875_v44, %v2521_v3 }
 0x192   : > { %v1811_v60 = vpop.f32.mrf.mxu1 }
 0x193   : > { %v1852_v0 = vpop.f32.mrf.mxu2  ;;  %v1812_v61 = vadd.f32 %v1811_v60, %v1769_v58 }
 0x194   : > { %v1853_v59 = vadd.f32 %v1852_v0, %v1810_v52 }
 0x196   : > { %v1940_v62 = vpop.f32.mrf.mxu0  ;;  %v1896_v63 = vadd.f32 %v1895_v55, %v1853_v59  ;;  %v2536_v55 = vor.u32 %v2881_v49, %v2535_v48 }
 0x198   : > { %v3823_v10 = vadd.f32 %v1938_v53, %v1896_v63 }
 0x199   : > { %v1897_v5 = vpop.f32.mrf.mxu3 }
 0x19a   : > { %v1814_v19 = vpop.f32.mrf.mxu1 }
 0x19b   : > { %v1854_v16 = vpop.f32.mrf.mxu2  ;;  %v1815_v21 = vadd.f32 %v1814_v19, %v1772_v15 }
 0x19c   : > { %v1855_v18 = vadd.f32 %v1854_v16, %v1812_v61 }
 0x19d   : > { %1990 = vmatmul.bf16.gmra.mxu1 %v2488_v17 }
 0x19e   : > { %v1943_v27 = vpop.f32.mrf.mxu0  ;;  %2076 = vmatmul.bf16.gmra.mxu3 %v2496_v11  ;;  %v1898_v31 = vadd.f32 %v1897_v5, %v1855_v18  ;;  %v1185_v11 = vunpack.c.h.b16 %v3662_v57 }
 0x1a0   : > { %2033 = vmatmul.bf16.gmra.mxu2 %v2492_v25  ;;  %v3836_v33 = vadd.f32 %v1940_v62, %v1898_v31  ;;  %v857_v62 = vld [vmem:[%s3949_s0 + $0x1c8] sm:$0x11]  ;;  %v1248_v18 = vpack.c.b16 %v1185_v11, %v1185_v11 }
 0x1a1   : > { %v1900_v32 = vpop.f32.mrf.mxu3  ;;  %2119 = vmatmul.bf16.gmra.mxu0 %v2500_v26  ;;  %v1186_v13 = vunpack.c.l.b16 %v857_v62  ;;  %v1251_v26 = vpack.c.b16 %v1188_v14, %v1188_v14 }
 0x1a2   : > { %v1816_v36 = vpop.f32.mrf.mxu1 }
 0x1a3   : > { %v1857_v22 = vpop.f32.mrf.mxu2  ;;  %v1817_v37 = vadd.f32 %v1816_v36, %v1774_v34 }
 0x1a4   : > { %v1858_v35 = vadd.f32 %v1857_v22, %v1815_v21 }
 0x1a6   : > { %v1945_v29 = vpop.f32.mrf.mxu0  ;;  %v1901_v38 = vadd.f32 %v1900_v32, %v1858_v35 }
 0x1a8   : > { %v3855_v45 = vadd.f32 %v1943_v27, %v1901_v38 }
 0x1a9   : > { %v1902_v42 = vpop.f32.mrf.mxu3 }
 0x1aa   : > { %v1819_v53 = vpop.f32.mrf.mxu1 }
 0x1ab   : > { %v1859_v50 = vpop.f32.mrf.mxu2  ;;  %v1820_v58 = vadd.f32 %v1819_v53, %v3676_v4  ;;  %v1187_v4 = vunpack.c.h.b16 %v857_v62 }
 0x1ac   : > { %v1860_v52 = vadd.f32 %v1859_v50, %v1817_v37 }
 0x1ad   : > { %1995 = vmatmul.bf16.gmra.mxu1 %v2524_v51  ;;  %v1250_v16 = vpack.c.b16 %v1187_v4, %v1187_v4 }
 0x1ae   : > { %v1948_v0 = vpop.f32.mrf.mxu0  ;;  %2081 = vmatmul.bf16.gmra.mxu3 %v2532_v46  ;;  %v1903_v59 = vadd.f32 %v1902_v42, %v1860_v52 }
 0x1b0   : > { %2038 = vmatmul.bf16.gmra.mxu2 %v2528_v54  ;;  %v3867_v61 = vadd.f32 %v1945_v29, %v1903_v59 }
 0x1b1   : > { %v1905_v60 = vpop.f32.mrf.mxu3  ;;  %2124 = vmatmul.bf16.gmra.mxu0 %v2536_v55 }
 0x1b2   : > { %v1821_v23 = vpop.f32.mrf.mxu1 }
 0x1b3   : > { %v1862_v63 = vpop.f32.mrf.mxu2  ;;  %v1822_v5 = vadd.f32 %v1821_v23, %v3708_v20  ;;  %v1249_v20 = vpack.c.b16 %v1186_v13, %v1186_v13 }
 0x1b4   : > { %v1863_v2 = vadd.f32 %v1862_v63, %v1820_v58 }
 0x1b6   : > { %v1950_v7 = vpop.f32.mrf.mxu0  ;;  %v1906_v9 = vadd.f32 %v1905_v60, %v1863_v2 }
 0x1b8   : > { %v3877_v15 = vadd.f32 %v1948_v0, %v1906_v9 }
 0x1b9   : > { %v1907_v12 = vpop.f32.mrf.mxu3 }
 0x1ba   : > { %v1824_v25 = vpop.f32.mrf.mxu1 }
 0x1bb   : > { %v1864_v17 = vpop.f32.mrf.mxu2  ;;  %v1825_v21 = vadd.f32 %v1824_v25, %v3713_v28 }
 0x1bc   : > { %v1865_v19 = vadd.f32 %v1864_v17, %v1822_v5 }
 0x1bd   : > { %2000 = vmatmul.bf16.gmra.mxu1 %v1248_v18 }
 0x1be   : > { %v1953_v27 = vpop.f32.mrf.mxu0  ;;  %2086 = vmatmul.bf16.gmra.mxu3 %v1250_v16  ;;  %v1908_v31 = vadd.f32 %v1907_v12, %v1865_v19 }
 0x1c0   : > { %2043 = vmatmul.bf16.gmra.mxu2 %v1249_v20  ;;  %v3880_v57 = vadd.f32 %v1950_v7, %v1908_v31 }
 0x1c1   : > { %v1910_v32 = vpop.f32.mrf.mxu3  ;;  %2129 = vmatmul.bf16.gmra.mxu0 %v1251_v26 }
 0x1c2   : > { %v1826_v35 = vpop.f32.mrf.mxu1 }
 0x1c3   : > { %v1867_v34 = vpop.f32.mrf.mxu2  ;;  %v1827_v36 = vadd.f32 %v1826_v35, %v3743_v43 }
 0x1c4   : > { %v1868_v22 = vadd.f32 %v1867_v34, %v1825_v21 }
 0x1c6   : > { %v1955_v37 = vpop.f32.mrf.mxu0  ;;  %v1911_v29 = vadd.f32 %v1910_v32, %v1868_v22 }
 0x1c8   : > { %v3883_v40 = vadd.f32 %v1953_v27, %v1911_v29 }
 0x1c9   : > { %v1912_v38 = vpop.f32.mrf.mxu3 }
 0x1ca   : > { %v1829_v42 = vpop.f32.mrf.mxu1 }
 0x1cb   : > { %v1869_v28 = vpop.f32.mrf.mxu2  ;;  %v1830_v44 = vadd.f32 %v1829_v42, %v3681_v8 }
 0x1cc   : > { %v1870_v41 = vadd.f32 %v1869_v28, %v1827_v36 }
 0x1ce   : > { %v1958_v3 = vpop.f32.mrf.mxu0  ;;  %v1913_v30 = vadd.f32 %v1912_v38, %v1870_v41 }
 0x1d0   : > { %v3886_v47 = vadd.f32 %v1955_v37, %v1913_v30 }
 0x1d1   : > { %v1915_v46 = vpop.f32.mrf.mxu3 }
 0x1d2   : > { %v1831_v50 = vpop.f32.mrf.mxu1 }
 0x1d3   : > { %v1872_v48 = vpop.f32.mrf.mxu2 }
 0x1d4   : > { %v1873_v49 = vadd.f32 %v1872_v48, %v1830_v44 }
 0x1d6   : > { %v1960_v43 = vpop.f32.mrf.mxu0  ;;  %v1916_v51 = vadd.f32 %v1915_v46, %v1873_v49 }
 0x1d8   : > { %v3888_v53 = vadd.f32 %v1958_v3, %v1916_v51 }
 0x1d9   : > { %v1917_v52 = vpop.f32.mrf.mxu3 }
 0x1da   : > { %v1971_v55 = vpop.f32.mrf.mxu1 }
 0x1db   : > { %v1874_v54 = vpop.f32.mrf.mxu2  ;;  %v1972_v8 = vadd.f32 %v1971_v55, %v3761_v1 }
 0x1de   : > { %v2100_v58 = vpop.f32.mrf.mxu0 }
 0x1e1   : > { %v2057_v0 = vpop.f32.mrf.mxu3 }
 0x1e2   : > { %v1973_v62 = vpop.f32.mrf.mxu1 }
 0x1e3   : > { %v2014_v59 = vpop.f32.mrf.mxu2  ;;  %v1974_v4 = vadd.f32 %v1973_v62, %v3773_v24 }
 0x1e4   : > { %v2015_v60 = vadd.f32 %v2014_v59, %v1972_v8 }
 0x1e6   : > { %v2102_v63 = vpop.f32.mrf.mxu0  ;;  %v2058_v2 = vadd.f32 %v2057_v0, %v2015_v60 }
 0x1e8   : > { %v2101_v23 = vadd.f32 %v2100_v58, %v2058_v2 }
 0x1e9   : > { %v2059_v5 = vpop.f32.mrf.mxu3 }
 0x1ea   : > { %v2134_v7 = vmax.f32 %v2101_v23, 0.0  ;;  %v1976_v1 = vpop.f32.mrf.mxu1 }
 0x1eb   : > { %v2016_v6 = vpop.f32.mrf.mxu2  ;;  %v1977_v17 = vadd.f32 %v1976_v1, %v3791_v39 }
 0x1ec   : > { %2147 = vst [vmem:[%s3894_s23] sm:$0xff] %v2134_v7  ;;  %v2017_v9 = vadd.f32 %v2016_v6, %v1974_v4 }
 0x1ee   : > { %v2105_v11 = vpop.f32.mrf.mxu0  ;;  %v2060_v12 = vadd.f32 %v2059_v5, %v2017_v9 }
 0x1f0   : > { %v2103_v13 = vadd.f32 %v2102_v63, %v2060_v12 }
 0x1f1   : > { %v2062_v14 = vpop.f32.mrf.mxu3 }
 0x1f2   : > { %v2135_v16 = vmax.f32 %v2103_v13, 0.0  ;;  %v1978_v24 = vpop.f32.mrf.mxu1 }
 0x1f3   : > { %v2019_v18 = vpop.f32.mrf.mxu2  ;;  %v1979_v31 = vadd.f32 %v1978_v24, %v3804_v56 }
 0x1f4   : > { %2148 = vst [vmem:[%s3894_s23 + $0x8] sm:$0xff] %v2135_v16  ;;  %v2020_v19 = vadd.f32 %v2019_v18, %v1977_v17 }
 0x1f6   : > { %v2107_v25 = vpop.f32.mrf.mxu0  ;;  %v2063_v20 = vadd.f32 %v2062_v14, %v2020_v19 }
 0x1f8   : > { %v2106_v26 = vadd.f32 %v2105_v11, %v2063_v20 }
 0x1f9   : > { %v2064_v21 = vpop.f32.mrf.mxu3 }
 0x1fa   : > { %v2136_v27 = vmax.f32 %v2106_v26, 0.0  ;;  %v1981_v22 = vpop.f32.mrf.mxu1 }
 0x1fb   : > { %v2021_v32 = vpop.f32.mrf.mxu2  ;;  %v1982_v38 = vadd.f32 %v1981_v22, %v3823_v10 }
 0x1fc   : > { %2149 = vst [vmem:[%s3894_s23 + $0x10] sm:$0xff] %v2136_v27  ;;  %v2022_v34 = vadd.f32 %v2021_v32, %v1979_v31 }
 0x1fe   : > { %v2110_v35 = vpop.f32.mrf.mxu0  ;;  %v2065_v36 = vadd.f32 %v2064_v21, %v2022_v34 }
 0x200   : > { %v2108_v39 = vadd.f32 %v2107_v25, %v2065_v36 }
 0x201   : > { %v2067_v37 = vpop.f32.mrf.mxu3 }
 0x202   : > { %v2137_v29 = vmax.f32 %v2108_v39, 0.0  ;;  %v1983_v42 = vpop.f32.mrf.mxu1 }
 0x203   : > { %v2024_v28 = vpop.f32.mrf.mxu2  ;;  %v1984_v48 = vadd.f32 %v1983_v42, %v3836_v33 }
 0x204   : > { %2150 = vst [vmem:[%s3894_s23 + $0x18] sm:$0xff] %v2137_v29  ;;  %v2025_v41 = vadd.f32 %v2024_v28, %v1982_v38 }
 0x206   : > { %v2112_v44 = vpop.f32.mrf.mxu0  ;;  %v2068_v3 = vadd.f32 %v2067_v37, %v2025_v41 }
 0x208   : > { %v2111_v56 = vadd.f32 %v2110_v35, %v2068_v3 }
 0x209   : > { %v2069_v30 = vpop.f32.mrf.mxu3 }
 0x20a   : > { %v2138_v46 = vmax.f32 %v2111_v56, 0.0  ;;  %v1986_v43 = vpop.f32.mrf.mxu1 }
 0x20b   : > { %v2026_v49 = vpop.f32.mrf.mxu2  ;;  %v1987_v58 = vadd.f32 %v1986_v43, %v3855_v45 }
 0x20c   : > { %2151 = vst [vmem:[%s3894_s23 + $0x20] sm:$0xff] %v2138_v46  ;;  %v2027_v50 = vadd.f32 %v2026_v49, %v1984_v48 }
 0x20e   : > { %v2115_v51 = vpop.f32.mrf.mxu0  ;;  %v2070_v52 = vadd.f32 %v2069_v30, %v2027_v50 }
 0x210   : > { %v2113_v10 = vadd.f32 %v2112_v44, %v2070_v52 }
 0x211   : > { %v2072_v54 = vpop.f32.mrf.mxu3 }
 0x212   : > { %v2139_v55 = vmax.f32 %v2113_v10, 0.0  ;;  %v1988_v59 = vpop.f32.mrf.mxu1 }
 0x213   : > { %v2029_v0 = vpop.f32.mrf.mxu2  ;;  %v1989_v23 = vadd.f32 %v1988_v59, %v3867_v61  ;;  %v2227_v59 = vld [vmem:[%s3894_s23 + $0x18] sm:$0xff] (%p3081_p5) }
 0x214   : > { %2152 = vst [vmem:[%s3894_s23 + $0x28] sm:$0xff] %v2139_v55  ;;  %v2030_v8 = vadd.f32 %v2029_v0, %v1987_v58  ;;  %v2223_v0 = vld [vmem:[%s3894_s23 + $0x8] sm:$0xff] (%p3081_p5) }
 0x215   : > { %2224 = vst [vmem:[%s2168_s25 + $0x10] sm:$0xff] (%p3081_p5), %v2223_v0 }
 0x216   : > { %v2117_v60 = vpop.f32.mrf.mxu0  ;;  %v2073_v62 = vadd.f32 %v2072_v54, %v2030_v8  ;;  %v2225_v8 = vld [vmem:[%s3894_s23 + $0x10] sm:$0xff] (%p3081_p5)  ;;  %2228 = vst [vmem:[%s2168_s25 + $0x30] sm:$0xff] (%p3081_p5), %v2227_v59 }
 0x217   : > { %2226 = vst [vmem:[%s2168_s25 + $0x20] sm:$0xff] (%p3081_p5), %v2225_v8 }
 0x218   : > { %v2116_v33 = vadd.f32 %v2115_v51, %v2073_v62 }
 0x219   : > { %v2074_v63 = vpop.f32.mrf.mxu3 }
 0x21a   : > { %v2140_v2 = vmax.f32 %v2116_v33, 0.0  ;;  %v1991_v4 = vpop.f32.mrf.mxu1 }
 0x21b   : > { %v2031_v5 = vpop.f32.mrf.mxu2  ;;  %v1992_v12 = vadd.f32 %v1991_v4, %v3877_v15  ;;  %v2231_v62 = vld [vmem:[%s3894_s23 + $0x28] sm:$0xff] (%p3081_p5) }
 0x21c   : > { %2153 = vst [vmem:[%s3894_s23 + $0x30] sm:$0xff] %v2140_v2  ;;  %v2032_v7 = vadd.f32 %v2031_v5, %v1989_v23 }
 0x21d   : > { %2232 = vst [vmem:[%s2168_s25 + $0x50] sm:$0xff] (%p3081_p5), %v2231_v62 }
 0x21e   : > { %v2120_v6 = vpop.f32.mrf.mxu0  ;;  %v2075_v9 = vadd.f32 %v2074_v63, %v2032_v7 }
 0x220   : > { %v2118_v45 = vadd.f32 %v2117_v60, %v2075_v9  ;;  %v2229_v60 = vld [vmem:[%s3894_s23 + $0x20] sm:$0xff] (%p3081_p5) }
 0x221   : > { %v2077_v1 = vpop.f32.mrf.mxu3  ;;  %2230 = vst [vmem:[%s2168_s25 + $0x40] sm:$0xff] (%p3081_p5), %v2229_v60 }
 0x222   : > { %v2141_v11 = vmax.f32 %v2118_v45, 0.0  ;;  %v1993_v16 = vpop.f32.mrf.mxu1 }
 0x223   : > { %v2034_v13 = vpop.f32.mrf.mxu2  ;;  %v1994_v25 = vadd.f32 %v1993_v16, %v3880_v57  ;;  %v2233_v33 = vld [vmem:[%s3894_s23 + $0x30] sm:$0xff] (%p3081_p5) }
 0x224   : > { %2154 = vst [vmem:[%s3894_s23 + $0x38] sm:$0xff] %v2141_v11  ;;  %v2035_v14 = vadd.f32 %v2034_v13, %v1992_v12 }
 0x225   : > { %2234 = vst [vmem:[%s2168_s25 + $0x60] sm:$0xff] (%p3081_p5), %v2233_v33 }
 0x226   : > { %v2122_v17 = vpop.f32.mrf.mxu0  ;;  %v2078_v18 = vadd.f32 %v2077_v1, %v2035_v14 }
 0x228   : > { %v2121_v61 = vadd.f32 %v2120_v6, %v2078_v18 }
 0x229   : > { %v2079_v19 = vpop.f32.mrf.mxu3 }
 0x22a   : > { %v2142_v24 = vmax.f32 %v2121_v61, 0.0  ;;  %v1996_v21 = vpop.f32.mrf.mxu1 }
 0x22b   : > { %v2036_v20 = vpop.f32.mrf.mxu2  ;;  %v1997_v22 = vadd.f32 %v1996_v21, %v3883_v40  ;;  %v2235_v63 = vld [vmem:[%s3894_s23 + $0x38] sm:$0xff] (%p3081_p5) }
 0x22c   : > { %2155 = vst [vmem:[%s3894_s23 + $0x40] sm:$0xff] %v2142_v24  ;;  %v2037_v26 = vadd.f32 %v2036_v20, %v1994_v25 }
 0x22d   : > { %2236 = vst [vmem:[%s2168_s25 + $0x70] sm:$0xff] (%p3081_p5), %v2235_v63 }
 0x22e   : > { %v2125_v27 = vpop.f32.mrf.mxu0  ;;  %v2080_v31 = vadd.f32 %v2079_v19, %v2037_v26 }
 0x230   : > { %v2123_v15 = vadd.f32 %v2122_v17, %v2080_v31 }
 0x231   : > { %v2082_v32 = vpop.f32.mrf.mxu3 }
 0x232   : > { %v2143_v34 = vmax.f32 %v2123_v15, 0.0  ;;  %v1998_v39 = vpop.f32.mrf.mxu1 }
 0x233   : > { %v2039_v35 = vpop.f32.mrf.mxu2  ;;  %v1999_v41 = vadd.f32 %v1998_v39, %v3886_v47  ;;  %v2237_v2 = vld [vmem:[%s3894_s23 + $0x40] sm:$0xff] (%p3081_p5) }
 0x234   : > { %2156 = vst [vmem:[%s3894_s23 + $0x48] sm:$0xff] %v2143_v34  ;;  %v2040_v36 = vadd.f32 %v2039_v35, %v1997_v22 }
 0x235   : > { %2238 = vst [vmem:[%s2168_s25 + $0x80] sm:$0xff] (%p3081_p5), %v2237_v2 }
 0x236   : > { %v2127_v37 = vpop.f32.mrf.mxu0  ;;  %v2083_v29 = vadd.f32 %v2082_v32, %v2040_v36 }
 0x238   : > { %v2126_v57 = vadd.f32 %v2125_v27, %v2083_v29 }
 0x239   : > { %v2084_v38 = vpop.f32.mrf.mxu3 }
 0x23a   : > { %v2144_v28 = vmax.f32 %v2126_v57, 0.0  ;;  %v2001_v3 = vpop.f32.mrf.mxu1 }
 0x23b   : > { %v2041_v42 = vpop.f32.mrf.mxu2  ;;  %v2002_v49 = vadd.f32 %v2001_v3, %v3888_v53  ;;  %v2221_v53 = vld [vmem:[%s3894_s23] sm:$0xff] (%p3081_p5)  ;;  %v2239_v23 = vld [vmem:[%s3894_s23 + $0x48] sm:$0xff] (%p3081_p5) }
 0x23c   : > { %2157 = vst [vmem:[%s3894_s23 + $0x50] sm:$0xff] %v2144_v28  ;;  %v2042_v44 = vadd.f32 %v2041_v42, %v1999_v41 }
 0x23d   : > { %2222 = vst [vmem:[%s2168_s25] sm:$0xff] (%p3081_p5), %v2221_v53 }
 0x23e   : > { %v2130_v56 = vpop.f32.mrf.mxu0  ;;  %v2085_v30 = vadd.f32 %v2084_v38, %v2042_v44  ;;  %2240 = vst [vmem:[%s2168_s25 + $0x90] sm:$0xff] (%p3081_p5), %v2239_v23 }
 0x240   : > { %v2128_v40 = vadd.f32 %v2127_v37, %v2085_v30 }
 0x241   : > { %v2087_v46 = vpop.f32.mrf.mxu3 }
 0x242   : > { %v2145_v48 = vmax.f32 %v2128_v40, 0.0  ;;  %v2003_v51 = vpop.f32.mrf.mxu1 }
 0x243   : > { %v2044_v50 = vpop.f32.mrf.mxu2  ;;  %v2241_v5 = vld [vmem:[%s3894_s23 + $0x50] sm:$0xff] (%p3081_p5) }
 0x244   : > { %2158 = vst [vmem:[%s3894_s23 + $0x58] sm:$0xff] %v2145_v48  ;;  %v2045_v43 = vadd.f32 %v2044_v50, %v2002_v49 }
 0x245   : > { %2242 = vst [vmem:[%s2168_s25 + $0xa0] sm:$0xff] (%p3081_p5), %v2241_v5 }
 0x246   : > { %v2132_v52 = vpop.f32.mrf.mxu0  ;;  %v2088_v10 = vadd.f32 %v2087_v46, %v2045_v43 }
 0x248   : > { %v2131_v54 = vadd.f32 %v2130_v56, %v2088_v10  ;;  %2166 = sbr.rel (!%p3081_p5) target bundleno = 597 (0x255), region = 77 }
 0x249   : > { %v2089_v47 = vpop.f32.mrf.mxu3 }
 0x24a   : > { %v2146_v55 = vmax.f32 %v2131_v54, 0.0 }
 0x24b   : > { %v2046_v58 = vpop.f32.mrf.mxu2  ;;  %v2243_v7 = vld [vmem:[%s3894_s23 + $0x58] sm:$0xff] (%p3081_p5) }
 0x24c   : > { %2159 = vst [vmem:[%s3894_s23 + $0x60] sm:$0x3] %v2146_v55 }
 0x24d   : > { %2244 = vst [vmem:[%s2168_s25 + $0xb0] sm:$0xff] %v2243_v7 }
 0x253   : > { %v2245_v4 = vld [vmem:[%s3894_s23 + $0x60] sm:$0xff] }
 0x254   : > { %2246 = vst [vmem:[%s2168_s25 + $0xc0] sm:$0xff] %v2245_v4 }
 0x255 PF: > { %p10_p11 = scmp.ge.s32.totalorder %s3069_s16, 4   ;;  %s3954_s12 = smov %s3024_s13 }
 0x256   : > { %s3955_s13 = smov %s3079_s19  ;;  %s3956_s14 = smov %s3069_s16 }
 0x257   :  { %12 = sbr.rel (!%p10_p11) target bundleno = 2 (0x2), region = 149 }

// kernel: decoder_forward.3
= control target key start
LH: loop header
LB: loop body
LE: loop exit
PB: predicated region body
PF: predicated region fallthrough
CT: control target
= control target key end

     0   :  { %s6291_s0 = inlined_call_operand.vmem [shape: bf16[2,50], index: 0, kind: input, shape index: {}]   ;;  %s6292_s1 = inlined_call_operand.hbm [shape: bf16[50,1024], index: 1, kind: input, shape index: {}]   ;;  %s6293_s2 = inlined_call_operand.hbm [shape: f32[1,1024], index: 2, kind: input, shape index: {}]   ;;  %s6294_s3 = inlined_call_operand.hbm [shape: bf16[1024,6400], index: 3, kind: input, shape index: {}]   ;;  %s6295_s4 = inlined_call_operand.hbm [shape: f32[1,6400], index: 4, kind: input, shape index: {}]   ;;  %s6296_s5 = inlined_call_operand.vmem [shape: f32[2,6400], index: 5, kind: output, shape index: {}]  }
   0x1   :  { %6297 = sst [smem:[#allocation11_spill]] %s6292_s1 }
   0x2   :  { %6298 = sst [smem:[#allocation12_spill]] %s6293_s2 }
   0x3   :  { %6299 = sst [smem:[#allocation13_spill]] %s6294_s3 }
   0x4   :  { %10 = vsyncpa [#allocation3], 0 }
   0x5   :  { %11 = vsyncpa [#allocation5], 0  ;;  %s5377_s18 = smov 0   ;;  %s5379_s19 = smov 0  }
   0x6   :  { %s5381_s20 = smov 0   ;;  %s5383_s21 = smov 0  }
   0x7 LB: > { %s5396_s22 = sadd.s32 4294967295, %s5338_s21   ;;  %s5399_s23 = sadd.s32 1, %s5338_s21   ;;  %s5338_s21 = sphi %s5383_s21, %s6311_s21   ;;  %s5334_s20 = sphi %s5381_s20, %s6310_s20   ;;  %s5330_s19 = sphi %s5379_s19, %s6309_s19   ;;  %s5326_s18 = sphi %s5377_s18, %s6308_s18  }
   0x8   : > { %s84_s24 = ssub.s32 %s5338_s21, %s5399_s23  ;;  %s87_s25 = sadd.s32 1, %s5334_s20 }
   0x9   : > { %p85_p0 = scmp.eq.s32.totalorder %s84_s24, 0  ;;  %p94_p1 = scmp.ne.s32.totalorder %s5334_s20, %s5330_s19 }
   0xa   : > { %p95_p2 = scmp.eq.s32.totalorder %s5338_s21, 0  ;;  %p100_p3 = scmp.ne.s32.totalorder %s5330_s19, %s5326_s18 }
   0xb   : > { %s5409_s26 = scalar_select %p85_p0, %s5334_s20, %s87_s25  }
   0xc   : > { %p5411_p4 = por %p95_p2, %p94_p1  ;;  %p101_p5 = scmp.eq.s32.totalorder %s5396_s22, 0 }
   0xd   : > { %p3361_p6 = scmp.ge.s32.totalorder %s5338_s21, 1  ;;  %p163_p7 = scmp.lt.s32.totalorder %s5338_s21, 11 }
   0xe   : > { %p5420_p8 = por %p101_p5, %p100_p3  ;;  %s6303_s1 = sld [smem:[#allocation11_spill]] }
   0xf   : > { %p5424_p9 = pnand %p3361_p6, %p163_p7  ;;  %s5340_s8 = smov [#allocation2]  }
  0x10   : > { %s179_s9 = sshll.u32 %s5340_s8, 4  ;;  %p5133_p12 = scmp.lt.s32.totalorder %s5338_s21, 10  ;;  %s180_s9 = int_to_ptr.vmem [resolvable:$true] %s179_s9 }
  0x11   : > { %p5117_p10 = pneg %p5424_p9  ;;  %s205_s11 = sand.u32 1, %s5338_s21  }
  0x12   : > { %s5341_s12 = smov 512   ;;  %s5342_s13 = smov 32  }
  0x13   : > { %p5435_p11 = pnand %p5117_p10, %p101_p5  ;;  %p5445_p13 = pnand %p5133_p12, %p5411_p4 }
  0x14   : > { %s177_s7 = sshll.u32 %s6303_s1, 4  ;;  %s207_s15 = sand.u32 1, %s5334_s20   ;;  %s178_s7 = int_to_ptr.hbm [resolvable:$true] %s177_s7 }
  0x15   : > { %5120 = dma.hbm_to_vmem [thread:$0]  (!%p5435_p11), %s178_s7, 3584, %s180_s9, [#allocation3], %s5341_s12, %s5341_s12, %s5342_s13  }
  0x16   : > { %s4756_s16 = smul.u32 20, %s5338_s21  ;;  %s6306_s3 = sld [smem:[#allocation13_spill]] }
  0x17   : > { %s5101_s17 = smul.u32 2560, %s207_s15  ;;  %s6307_s2 = sld [smem:[#allocation12_spill]] }
  0x18   : > { %s5459_s12 = scalar_lea.sflag [#allocation3], %s205_s11  ;;  %p5210_p1 = pneg %p5445_p13 }
  0x19   : > { %s209_s6 = scalar_lea.vmem [#allocation6], %s5101_s17 }
  0x1a   : > { %s217_s8 = sshll.u32 %s209_s6, 4  ;;  %s218_s8 = int_to_ptr.vmem [resolvable:$true] %s217_s8 }
  0x1c   : > { %s214_s25 = scalar_lea.hbm %s6306_s3, %s4756_s16  ;;  %s5213_s18 = scalar_lea.hbm %s6306_s3, 25600 }
  0x1d   : > { %s215_s30 = sshll.u32 %s214_s25, 4  ;;  %s192_s9 = sshll.u32 %s6307_s2, 4  ;;  %s216_s30 = int_to_ptr.hbm [resolvable:$true] %s215_s30  ;;  %s193_s9 = int_to_ptr.hbm [resolvable:$true] %s192_s9 }
  0x1e   : > { %s5206_s13 = sshra.s32 %s216_s30, 4  ;;  %s5207_s13 = int_to_ptr.hbm [resolvable:$true] %s5206_s13 }
  0x1f   : > { %s5208_s1 = scalar_lea.hbm %s5207_s13, 2560  ;;  %p5214_p4 = scmp.lt.s32.totalorder %s5207_s13, %s6306_s3 }
  0x20   : > { %p5209_p0 = scmp.ne.s32.totalorder %s5207_s13, %s5208_s1  ;;  %p5215_p6 = scmp.lt.s32.totalorder %s5213_s18, %s5208_s1 }
  0x22   : > { %p5211_p2 = pnand %p5210_p1, %p5209_p0  ;;  %p5216_p7 = por %p5215_p6, %p5214_p4 }
  0x24   : > { %p5212_p3 = pneg %p5211_p2 }
  0x26   : > { %p5217_p10 = pnand %p5216_p7, %p5212_p3 }
  0x28   : > { %5220 = shalt.err (!%p5217_p10)
}
  0x29   : > { %s5343_s11 = smov 3200   ;;  %s5344_s6 = smov 320  }
  0x2a   : > { %s5345_s27 = smov 20   ;;  %s5346_s7 = smov [#allocation4]  }
  0x2b   : > { %5127 = dma.hbm_to_vmem [thread:$0]  (!%p5445_p13), %s216_s30, 40960, %s218_s8, %s5459_s12, %s5343_s11, %s5344_s6, %s5345_s27  }
  0x2c   : > { %s194_s16 = sshll.u32 %s5346_s7, 4  ;;  %s5102_s13 = smul.u32 5, %s207_s15  ;;  %s195_s16 = int_to_ptr.vmem [resolvable:$true] %s194_s16 }
  0x2d   : > { %s232_s1 = smul.u32 5, %s5338_s21  ;;  %s5273_s15 = scalar_lea.hbm %s6295_s4, 50 }
  0x2e   : > { %5123 = dma.hbm_to_vmem [thread:$0]  (!%p5435_p11), %s193_s9, 128, %s195_s16, [#allocation5]  }
  0x2f   : > { %s235_s24 = scalar_lea.hbm %s6295_s4, %s232_s1  ;;  %s231_s2 = scalar_lea.vmem [#allocation7], %s5102_s13 }
  0x30   : > { %s237_s25 = sshll.u32 %s235_s24, 4  ;;  %s239_s3 = sshll.u32 %s231_s2, 4  ;;  %s238_s25 = int_to_ptr.hbm [resolvable:$true] %s237_s25  ;;  %s240_s3 = int_to_ptr.vmem [resolvable:$true] %s239_s3 }
  0x31   : > { %s5266_s30 = sshra.s32 %s238_s25, 4  ;;  %s5267_s30 = int_to_ptr.hbm [resolvable:$true] %s5266_s30 }
  0x32   : > { %s5268_s8 = scalar_lea.hbm %s5267_s30, 5  ;;  %p5274_p11 = scmp.lt.s32.totalorder %s5267_s30, %s6295_s4 }
  0x33   : > { %p5269_p12 = scmp.ne.s32.totalorder %s5267_s30, %s5268_s8  ;;  %p5275_p3 = scmp.lt.s32.totalorder %s5273_s15, %s5268_s8 }
  0x35   : > { %p5271_p0 = pnand %p5269_p12, %p5210_p1  ;;  %p5276_p4 = por %p5275_p3, %p5274_p11 }
  0x37   : > { %p5272_p2 = pneg %p5271_p0 }
  0x39   : > { %p5277_p6 = pnand %p5276_p4, %p5272_p2 }
  0x3b   : > { %5280 = shalt.err (!%p5277_p6)
}
  0x3c   : > { %5130 = dma.hbm_to_vmem [thread:$0]  (!%p5445_p13), %s238_s25, 80, %s240_s3, %s5459_s12  }
  0x3d   : > { %248 = sbr.rel (%p5424_p9) target bundleno = 631 (0x277), region = 40 }
  0x42   : > { %5313 = dma.done.wait (%p101_p5), [#allocation3], 3584  }
  0x43   : > { %5315 = vsyncadd (%p101_p5), [#allocation3], 4294963712 }
  0x44   : > { %5317 = dma.done.wait (%p101_p5), [#allocation5], 128  }
  0x45   : > { %5319 = vsyncadd (%p101_p5), [#allocation5], 4294967168  ;;  %s260_s2 = sand.u32 1, %s5396_s22   ;;  %s262_s3 = sand.u32 1, %s5330_s19  }
  0x46   : > { %s5103_s29 = smul.u32 2560, %s262_s3  ;;  %s261_s14 = scalar_lea.sflag [#allocation3], %s260_s2 }
  0x48   : > { %s5509_s12 = scalar_lea.vmem [#allocation6], %s5103_s29 }
  0x49   : > { %5321 = dma.done.wait (%p5420_p8), %s261_s14, 41040  }
  0x4a   : > { %5323 = vsyncadd (%p5420_p8), %s261_s14, 4294926256  ;;  %v341_v0 = vld [vmem:[#allocation2 + $0xc0] sm:$0x11]  ;;  %v342_v1 = vld [vmem:[#allocation2 + $0xc8] sm:$0x11]  ;;  %vm507_vm0 = vcmask 1040384  }
  0x4b   : > { %v439_v2 = vunpack.c.l.b16 %v341_v0  ;;  %v440_v3 = vunpack.c.h.b16 %v341_v0  ;;  %v441_v4 = vunpack.c.l.b16 %v342_v1  ;;  %v442_v5 = vunpack.c.h.b16 %v342_v1  ;;  %v3436_v6 = vld [vmem:[#allocation2 + $0x80] sm:$0xf]  ;;  %v4773_v12 = vld [vmem:[#allocation2 + $0x84] sm:$0xf]  ;;  %v3444_v14 = vld [vmem:[#allocation2 + $0x88] sm:$0xf] }
  0x4c   : > { %v4777_v7 = vld [vmem:[#allocation2 + $0x9c] sm:$0xf0]  ;;  %v3438_v13 = vld [vmem:[#allocation2 + $0xa0] sm:$0xf0]  ;;  %v4778_v15 = vld [vmem:[#allocation2 + $0xa4] sm:$0xf0] }
  0x4d   : > { %v471_v8 = vpack.c.b16 %v439_v2, %v439_v2  ;;  %v472_v9 = vpack.c.b16 %v440_v3, %v440_v3  ;;  %v473_v10 = vpack.c.b16 %v441_v4, %v441_v4  ;;  %v474_v11 = vpack.c.b16 %v442_v5, %v442_v5  ;;  %v4774_v16 = vld [vmem:[#allocation2 + $0x8c] sm:$0xf]  ;;  %v3404_v24 = vld [vmem:[#allocation2 + $0x40] sm:$0xf]  ;;  %v4765_v28 = vld [vmem:[#allocation2 + $0x44] sm:$0xf] }
  0x4e   : > { %v3446_v17 = vld [vmem:[#allocation2 + $0xa8] sm:$0xf0]  ;;  %v3437_v22 = vor.u32 %v4777_v7, %v3436_v6  ;;  %v3441_v23 = vor.u32 %v4773_v12, %v3438_v13  ;;  %v4769_v25 = vld [vmem:[#allocation2 + $0x5c] sm:$0xf0]  ;;  %v3445_v26 = vor.u32 %v4778_v15, %v3444_v14  ;;  %v3406_v29 = vld [vmem:[#allocation2 + $0x60] sm:$0xf0] }
  0x4f   : > { %v509_v18 = vsel %vm507_vm0, %v471_v8, 0  ;;  %v512_v19 = vsel %vm507_vm0, %v472_v9, 0  ;;  %v515_v20 = vsel %vm507_vm0, %v473_v10, 0  ;;  %v518_v21 = vsel %vm507_vm0, %v474_v11, 0  ;;  %v3412_v30 = vld [vmem:[#allocation2 + $0x48] sm:$0xf] }
  0x50   : > { %536 = vmatpush.bf16.msra.mxu0 %v509_v18  ;;  %549 = vmatpush.bf16.msra.mxu1 %v512_v19  ;;  %v3449_v27 = vor.u32 %v4774_v16, %v3446_v17  ;;  %v4770_v31 = vld [vmem:[#allocation2 + $0x64] sm:$0xf0]  ;;  %v4766_v32 = vld [vmem:[#allocation2 + $0x4c] sm:$0xf]  ;;  %v343_v34 = vld [vmem:[#allocation2 + $0xd0] sm:$0x11]  ;;  %v3405_v35 = vor.u32 %v4769_v25, %v3404_v24  ;;  %v3409_v36 = vor.u32 %v4765_v28, %v3406_v29 }
  0x51   : > { %562 = vmatpush.bf16.msra.mxu2 %v515_v20  ;;  %575 = vmatpush.bf16.msra.mxu3 %v518_v21  ;;  %v3414_v33 = vld [vmem:[#allocation2 + $0x68] sm:$0xf0]  ;;  %v3372_v37 = vld [vmem:[#allocation2] sm:$0xf]  ;;  %v443_v39 = vunpack.c.l.b16 %v343_v34  ;;  %v444_v40 = vunpack.c.h.b16 %v343_v34  ;;  %v344_v41 = vld [vmem:[#allocation2 + $0xd8] sm:$0x11]  ;;  %v3413_v42 = vor.u32 %v4770_v31, %v3412_v30 }
  0x52   : > { %v4761_v38 = vld [vmem:[#allocation2 + $0x1c] sm:$0xf0]  ;;  %v3417_v43 = vor.u32 %v4766_v32, %v3414_v33  ;;  %v4757_v44 = vld [vmem:[#allocation2 + $0x4] sm:$0xf]  ;;  %v3380_v46 = vld [vmem:[#allocation2 + $0x8] sm:$0xf]  ;;  %v445_v50 = vunpack.c.l.b16 %v344_v41  ;;  %v446_v51 = vunpack.c.h.b16 %v344_v41 }
  0x53   : > { %v3374_v45 = vld [vmem:[#allocation2 + $0x20] sm:$0xf0]  ;;  %v4762_v47 = vld [vmem:[#allocation2 + $0x24] sm:$0xf0]  ;;  %v4758_v48 = vld [vmem:[#allocation2 + $0xc] sm:$0xf]  ;;  %v475_v52 = vpack.c.b16 %v443_v39, %v443_v39  ;;  %v476_v53 = vpack.c.b16 %v444_v40, %v444_v40  ;;  %v3373_v54 = vor.u32 %v4761_v38, %v3372_v37 }
  0x54   : > { %537 = vmatpush.bf16.msra.mxu0 %v3437_v22  ;;  %550 = vmatpush.bf16.msra.mxu1 %v3441_v23  ;;  %v3382_v49 = vld [vmem:[#allocation2 + $0x28] sm:$0xf0]  ;;  %v3377_v55 = vor.u32 %v4757_v44, %v3374_v45  ;;  %v3381_v56 = vor.u32 %v4762_v47, %v3380_v46  ;;  %v477_v58 = vpack.c.b16 %v445_v50, %v445_v50  ;;  %v3452_v60 = vld [vmem:[#allocation2 + $0x90] sm:$0xf]  ;;  %v4775_v0 = vld [vmem:[#allocation2 + $0x94] sm:$0xf] }
  0x55   : > { %563 = vmatpush.bf16.msra.mxu2 %v3445_v26  ;;  %576 = vmatpush.bf16.msra.mxu3 %v3449_v27  ;;  %v3385_v57 = vor.u32 %v4758_v48, %v3382_v49  ;;  %v478_v59 = vpack.c.b16 %v446_v51, %v446_v51  ;;  %v4779_v61 = vld [vmem:[#allocation2 + $0xac] sm:$0xf0]  ;;  %v521_v62 = vsel %vm507_vm0, %v475_v52, 0  ;;  %v524_v63 = vsel %vm507_vm0, %v476_v53, 0  ;;  %v3454_v1 = vld [vmem:[#allocation2 + $0xb0] sm:$0xf0] }
  0x56   : > { %v5524_v2 = vld [vmem:[%s6291_s0] sm:$0x1]  ;;  %vm503_vm1 = vcmask 408576   ;;  %v3460_v3 = vld [vmem:[#allocation2 + $0x98] sm:$0xf]  ;;  %v527_v6 = vsel %vm507_vm0, %v477_v58, 0  ;;  %v3453_v8 = vor.u32 %v4779_v61, %v3452_v60  ;;  %v3457_v9 = vor.u32 %v4775_v0, %v3454_v1 }
  0x57   : > { %v4780_v4 = vld [vmem:[#allocation2 + $0xb4] sm:$0xf0]  ;;  %v4776_v5 = vld [vmem:[#allocation2 + $0x9c] sm:$0xf]  ;;  %v530_v7 = vsel %vm507_vm0, %v478_v59, 0  ;;  %s5964_s27 = smul.u32 5, %s262_s3 }
  0x58   : > { %538 = vmatpush.bf16.msra.mxu0 %v3405_v35  ;;  %551 = vmatpush.bf16.msra.mxu1 %v3409_v36  ;;  %v3462_v10 = vld [vmem:[#allocation2 + $0xb8] sm:$0xf0]  ;;  %v3420_v11 = vld [vmem:[#allocation2 + $0x50] sm:$0xf]  ;;  %v4767_v13 = vld [vmem:[#allocation2 + $0x54] sm:$0xf]  ;;  %v3461_v15 = vor.u32 %v4780_v4, %v3460_v3 }
  0x59   : > { %564 = vmatpush.bf16.msra.mxu2 %v3413_v42  ;;  %577 = vmatpush.bf16.msra.mxu3 %v3417_v43  ;;  %v4771_v12 = vld [vmem:[#allocation2 + $0x6c] sm:$0xf0]  ;;  %v3422_v14 = vld [vmem:[#allocation2 + $0x70] sm:$0xf0]  ;;  %v3465_v16 = vor.u32 %v4776_v5, %v3462_v10  ;;  %v3428_v17 = vld [vmem:[#allocation2 + $0x58] sm:$0xf] }
  0x5a   : > { %v4772_v18 = vld [vmem:[#allocation2 + $0x74] sm:$0xf0]  ;;  %v4768_v19 = vld [vmem:[#allocation2 + $0x5c] sm:$0xf]  ;;  %v3421_v20 = vor.u32 %v4771_v12, %v3420_v11  ;;  %v3425_v21 = vor.u32 %v4767_v13, %v3422_v14  ;;  %v3388_v23 = vld [vmem:[#allocation2 + $0x10] sm:$0xf] }
  0x5b   : > { %v3430_v22 = vld [vmem:[#allocation2 + $0x78] sm:$0xf0]  ;;  %v4763_v24 = vld [vmem:[#allocation2 + $0x2c] sm:$0xf0]  ;;  %v4759_v25 = vld [vmem:[#allocation2 + $0x14] sm:$0xf]  ;;  %v3429_v31 = vor.u32 %v4772_v18, %v3428_v17 }
  0x5c   : > { %539 = vmatpush.bf16.msra.mxu0 %v3373_v54  ;;  %552 = vmatpush.bf16.msra.mxu1 %v3377_v55  ;;  %v3390_v26 = vld [vmem:[#allocation2 + $0x30] sm:$0xf0]  ;;  %v3616_v27 = vld [vmem:[%s5509_s12 + $0x118] sm:$0xf]  ;;  %v3433_v32 = vor.u32 %v4768_v19, %v3430_v22  ;;  %v3396_v33 = vld [vmem:[#allocation2 + $0x18] sm:$0xf]  ;;  %v3389_v35 = vor.u32 %v4763_v24, %v3388_v23 }
  0x5d   : > { %565 = vmatpush.bf16.msra.mxu2 %v3381_v56  ;;  %578 = vmatpush.bf16.msra.mxu3 %v3385_v57  ;;  %v4818_v28 = vld [vmem:[%s5509_s12 + $0x128] sm:$0xf0]  ;;  %v3776_v29 = vld [vmem:[%s5509_s12 + $0x258] sm:$0xf]  ;;  %v4764_v34 = vld [vmem:[#allocation2 + $0x34] sm:$0xf0]  ;;  %v3393_v36 = vor.u32 %v4759_v25, %v3390_v26 }
  0x5e   : > { %v4858_v30 = vld [vmem:[%s5509_s12 + $0x268] sm:$0xf0]  ;;  %v4760_v37 = vld [vmem:[#allocation2 + $0x1c] sm:$0xf]  ;;  %v3936_v39 = vld [vmem:[%s5509_s12 + $0x398] sm:$0xf]  ;;  %v3617_v40 = vor.u32 %v4818_v28, %v3616_v27  ;;  %v3397_v45 = vor.u32 %v4764_v34, %v3396_v33 }
  0x5f   : > { %3466 = vmatmul.msk.bf16.vlgmr.msra.gmra.mxu0 %vm503_vm1, %v5524_v2  ;;  %3467 = vmatmul.msk.bf16.vlgmr.msra.gmra.mxu1 %vm503_vm1, %v5524_v2  ;;  %v3398_v38 = vld [vmem:[#allocation2 + $0x38] sm:$0xf0]  ;;  %v3777_v41 = vor.u32 %v4858_v30, %v3776_v29  ;;  %v4898_v42 = vld [vmem:[%s5509_s12 + $0x3a8] sm:$0xf0]  ;;  %v4096_v43 = vld [vmem:[%s5509_s12 + $0x4d8] sm:$0xf] }
  0x60   : > { %588 = vmatpush.bf16.msrb.mxu0 %v521_v62  ;;  %601 = vmatpush.bf16.msrb.mxu1 %v524_v63  ;;  %v4938_v44 = vld [vmem:[%s5509_s12 + $0x4e8] sm:$0xf0]  ;;  %v3401_v46 = vor.u32 %v4760_v37, %v3398_v38  ;;  %v3596_v47 = vld [vmem:[%s5509_s12 + $0xf0] sm:$0xf]  ;;  %v4813_v48 = vld [vmem:[%s5509_s12 + $0x100] sm:$0xf0]  ;;  %v3937_v51 = vor.u32 %v4898_v42, %v3936_v39 }
  0x61   : > { %3468 = vmatmul.msk.bf16.vlgmr.msra.gmra.mxu2 %vm503_vm1, %v5524_v2  ;;  %3469 = vmatmul.msk.bf16.vlgmr.msra.gmra.mxu3 %vm503_vm1, %v5524_v2  ;;  %v3756_v49 = vld [vmem:[%s5509_s12 + $0x230] sm:$0xf]  ;;  %v4853_v50 = vld [vmem:[%s5509_s12 + $0x240] sm:$0xf0]  ;;  %v4097_v52 = vor.u32 %v4938_v44, %v4096_v43  ;;  %v3597_v57 = vor.u32 %v4813_v48, %v3596_v47  ;;  %v3576_v59 = vld [vmem:[%s5509_s12 + $0xc8] sm:$0xf] }
  0x62   : > { %614 = vmatpush.bf16.msrb.mxu2 %v527_v6  ;;  %627 = vmatpush.bf16.msrb.mxu3 %v530_v7  ;;  %v3916_v53 = vld [vmem:[%s5509_s12 + $0x370] sm:$0xf]  ;;  %v4893_v54 = vld [vmem:[%s5509_s12 + $0x380] sm:$0xf0]  ;;  %v3757_v58 = vor.u32 %v4853_v50, %v3756_v49  ;;  %v4808_v60 = vld [vmem:[%s5509_s12 + $0xd8] sm:$0xf0] }
  0x63   : > { %v4076_v55 = vld [vmem:[%s5509_s12 + $0x4b0] sm:$0xf]  ;;  %v4933_v56 = vld [vmem:[%s5509_s12 + $0x4c0] sm:$0xf0]  ;;  %v3736_v61 = vld [vmem:[%s5509_s12 + $0x208] sm:$0xf]  ;;  %v3917_v63 = vor.u32 %v4893_v54, %v3916_v53  ;;  %v3577_v6 = vor.u32 %v4808_v60, %v3576_v59 }
  0x64   : > { %589 = vmatpush.bf16.msrb.mxu0 %v3453_v8  ;;  %602 = vmatpush.bf16.msrb.mxu1 %v3457_v9  ;;  %v4848_v62 = vld [vmem:[%s5509_s12 + $0x218] sm:$0xf0]  ;;  %v4077_v0 = vor.u32 %v4933_v56, %v4076_v55  ;;  %v3896_v1 = vld [vmem:[%s5509_s12 + $0x348] sm:$0xf]  ;;  %v3556_v8 = vld [vmem:[%s5509_s12 + $0xa0] sm:$0xf] }
  0x65   : > { %v4888_v3 = vld [vmem:[%s5509_s12 + $0x358] sm:$0xf0]  ;;  %v4056_v4 = vld [vmem:[%s5509_s12 + $0x488] sm:$0xf]  ;;  %v3737_v7 = vor.u32 %v4848_v62, %v3736_v61  ;;  %v4803_v9 = vld [vmem:[%s5509_s12 + $0xb0] sm:$0xf0] }
  0x66   : > { %615 = vmatpush.bf16.msrb.mxu2 %v3461_v15  ;;  %628 = vmatpush.bf16.msrb.mxu3 %v3465_v16  ;;  %v4928_v5 = vld [vmem:[%s5509_s12 + $0x498] sm:$0xf0]  ;;  %v3716_v10 = vld [vmem:[%s5509_s12 + $0x1e0] sm:$0xf]  ;;  %v4843_v11 = vld [vmem:[%s5509_s12 + $0x1f0] sm:$0xf0]  ;;  %v3897_v12 = vor.u32 %v4888_v3, %v3896_v1  ;;  %v3557_v17 = vor.u32 %v4803_v9, %v3556_v8 }
  0x67   : > { %v4057_v13 = vor.u32 %v4928_v5, %v4056_v4  ;;  %v3876_v14 = vld [vmem:[%s5509_s12 + $0x320] sm:$0xf]  ;;  %v4923_v16 = vld [vmem:[%s5509_s12 + $0x470] sm:$0xf0]  ;;  %v3717_v18 = vor.u32 %v4843_v11, %v3716_v10  ;;  %v3536_v19 = vld [vmem:[%s5509_s12 + $0x78] sm:$0xf] }
  0x68   : > { %590 = vmatpush.bf16.msrb.mxu0 %v3421_v20  ;;  %603 = vmatpush.bf16.msrb.mxu1 %v3425_v21  ;;  %v4036_v15 = vld [vmem:[%s5509_s12 + $0x460] sm:$0xf]  ;;  %v4798_v20 = vld [vmem:[%s5509_s12 + $0x88] sm:$0xf0]  ;;  %v3696_v21 = vld [vmem:[%s5509_s12 + $0x1b8] sm:$0xf] }
  0x69   : > { %v4838_v22 = vld [vmem:[%s5509_s12 + $0x1c8] sm:$0xf0]  ;;  %v4037_v24 = vor.u32 %v4923_v16, %v4036_v15  ;;  %v3856_v25 = vld [vmem:[%s5509_s12 + $0x2f8] sm:$0xf]  ;;  %v3537_v29 = vor.u32 %v4798_v20, %v3536_v19  ;;  %v3676_v33 = vld [vmem:[%s5509_s12 + $0x190] sm:$0xf] }
  0x6a   : > { %616 = vmatpush.bf16.msrb.mxu2 %v3429_v31  ;;  %629 = vmatpush.bf16.msrb.mxu3 %v3433_v32  ;;  %v4878_v26 = vld [vmem:[%s5509_s12 + $0x308] sm:$0xf0]  ;;  %v4016_v27 = vld [vmem:[%s5509_s12 + $0x438] sm:$0xf]  ;;  %v3697_v30 = vor.u32 %v4838_v22, %v3696_v21  ;;  %v3516_v31 = vld [vmem:[%s5509_s12 + $0x50] sm:$0xf] }
  0x6b   : > { %v4918_v28 = vld [vmem:[%s5509_s12 + $0x448] sm:$0xf0]  ;;  %v4793_v32 = vld [vmem:[%s5509_s12 + $0x60] sm:$0xf0]  ;;  %v3836_v37 = vld [vmem:[%s5509_s12 + $0x2d0] sm:$0xf] }
  0x6c   : > { %591 = vmatpush.bf16.msrb.mxu0 %v3389_v35  ;;  %604 = vmatpush.bf16.msrb.mxu1 %v3393_v36  ;;  %v4833_v34 = vld [vmem:[%s5509_s12 + $0x1a0] sm:$0xf0]  ;;  %v3857_v35 = vor.u32 %v4878_v26, %v3856_v25  ;;  %v4017_v36 = vor.u32 %v4918_v28, %v4016_v27  ;;  %v3996_v39 = vld [vmem:[%s5509_s12 + $0x410] sm:$0xf]  ;;  %v3496_v43 = vld [vmem:[%s5509_s12 + $0x28] sm:$0xf] }
  0x6d   : > { %v4873_v38 = vld [vmem:[%s5509_s12 + $0x2e0] sm:$0xf0]  ;;  %v3677_v42 = vor.u32 %v4833_v34, %v3676_v33  ;;  %v4788_v44 = vld [vmem:[%s5509_s12 + $0x38] sm:$0xf0]  ;;  %v3816_v49 = vld [vmem:[%s5509_s12 + $0x2a8] sm:$0xf] }
  0x6e   : > { %617 = vmatpush.bf16.msrb.mxu2 %v3397_v45  ;;  %630 = vmatpush.bf16.msrb.mxu3 %v3401_v46  ;;  %v3656_v45 = vld [vmem:[%s5509_s12 + $0x168] sm:$0xf]  ;;  %v4828_v46 = vld [vmem:[%s5509_s12 + $0x178] sm:$0xf0]  ;;  %v3837_v47 = vor.u32 %v4873_v38, %v3836_v37  ;;  %v3476_v53 = vld [vmem:[%s5509_s12] sm:$0xf]  ;;  %v3497_v54 = vor.u32 %v4788_v44, %v3496_v43 }
  0x6f   : > { %3470 = vmatmul.msk.bf16.vlgmr.msrb.gmra.mxu0 %vm503_vm1, %v5524_v2  ;;  %3471 = vmatmul.msk.bf16.vlgmr.msrb.gmra.mxu1 %vm503_vm1, %v5524_v2  ;;  %v4868_v50 = vld [vmem:[%s5509_s12 + $0x2b8] sm:$0xf0]  ;;  %v3657_v55 = vor.u32 %v4828_v46, %v3656_v45  ;;  %v4783_v56 = vld [vmem:[%s5509_s12 + $0x10] sm:$0xf0]  ;;  %v4256_v59 = vld [vmem:[%s5509_s12 + $0x618] sm:$0xf] }
  0x70   : > { %2712 = vmatpush.bf16.msra.mxu0 %v3617_v40  ;;  %2725 = vmatpush.bf16.msra.mxu1 %v3777_v41  ;;  %v4913_v40 = vld [vmem:[%s5509_s12 + $0x420] sm:$0xf0]  ;;  %v3517_v41 = vor.u32 %v4793_v32, %v3516_v31  ;;  %v4978_v60 = vld [vmem:[%s5509_s12 + $0x628] sm:$0xf0]  ;;  %v4416_v61 = vld [vmem:[%s5509_s12 + $0x758] sm:$0xf]  ;;  %v3817_v62 = vor.u32 %v4868_v50, %v3816_v49 }
  0x71   : > { %3472 = vmatmul.msk.bf16.vlgmr.msrb.gmra.mxu2 %vm503_vm1, %v5524_v2  ;;  %3473 = vmatmul.msk.bf16.vlgmr.msrb.gmra.mxu3 %vm503_vm1, %v5524_v2  ;;  %v4883_v2 = vld [vmem:[%s5509_s12 + $0x330] sm:$0xf0]  ;;  %v3997_v48 = vor.u32 %v4913_v40, %v3996_v39  ;;  %v3796_v1 = vld [vmem:[%s5509_s12 + $0x280] sm:$0xf]  ;;  %v5058_v9 = vld [vmem:[%s5509_s12 + $0x8a8] sm:$0xf0] }
  0x72   : > { %2738 = vmatpush.bf16.msra.mxu2 %v3937_v51  ;;  %2751 = vmatpush.bf16.msra.mxu3 %v4097_v52  ;;  %v3877_v23 = vor.u32 %v4883_v2, %v3876_v14  ;;  %v3976_v51 = vld [vmem:[%s5509_s12 + $0x3e8] sm:$0xf]  ;;  %v4908_v52 = vld [vmem:[%s5509_s12 + $0x3f8] sm:$0xf0]  ;;  %v4863_v3 = vld [vmem:[%s5509_s12 + $0x290] sm:$0xf0] }
  0x73   : > { %v3956_v4 = vld [vmem:[%s5509_s12 + $0x3c0] sm:$0xf]  ;;  %v4903_v5 = vld [vmem:[%s5509_s12 + $0x3d0] sm:$0xf0]  ;;  %v4736_v10 = vld [vmem:[%s5509_s12 + $0x9d8] sm:$0xf] }
  0x74   : > { %2713 = vmatpush.bf16.msra.mxu0 %v3597_v57  ;;  %2726 = vmatpush.bf16.msra.mxu1 %v3757_v58  ;;  %v3636_v57 = vld [vmem:[%s5509_s12 + $0x140] sm:$0xf]  ;;  %v4823_v58 = vld [vmem:[%s5509_s12 + $0x150] sm:$0xf0]  ;;  %v5098_v11 = vld [vmem:[%s5509_s12 + $0x9e8] sm:$0xf0] }
  0x75   : > { %v3637_v8 = vor.u32 %v4823_v58, %v3636_v57  ;;  %v4236_v14 = vld [vmem:[%s5509_s12 + $0x5f0] sm:$0xf]  ;;  %v4973_v2 = vld [vmem:[%s5509_s12 + $0x600] sm:$0xf0]  ;;  %v4737_v20 = vor.u32 %v5098_v11, %v4736_v10  ;;  %v4216_v27 = vld [vmem:[%s5509_s12 + $0x5c8] sm:$0xf] }
  0x76   : > { %2739 = vmatpush.bf16.msra.mxu2 %v3917_v63  ;;  %2752 = vmatpush.bf16.msra.mxu3 %v4077_v0  ;;  %v3977_v63 = vor.u32 %v4908_v52, %v3976_v51  ;;  %v5018_v0 = vld [vmem:[%s5509_s12 + $0x768] sm:$0xf0]  ;;  %v4396_v15 = vld [vmem:[%s5509_s12 + $0x730] sm:$0xf]  ;;  %v5013_v16 = vld [vmem:[%s5509_s12 + $0x740] sm:$0xf0]  ;;  %v4237_v25 = vor.u32 %v4973_v2, %v4236_v14 }
  0x77   : > { %v4556_v21 = vld [vmem:[%s5509_s12 + $0x870] sm:$0xf]  ;;  %v5053_v22 = vld [vmem:[%s5509_s12 + $0x880] sm:$0xf0]  ;;  %v4397_v26 = vor.u32 %v5013_v16, %v4396_v15  ;;  %v4968_v28 = vld [vmem:[%s5509_s12 + $0x5d8] sm:$0xf0] }
  0x78   : > { %2714 = vmatpush.bf16.msra.mxu0 %v3577_v6  ;;  %2727 = vmatpush.bf16.msra.mxu1 %v3737_v7  ;;  %v4576_v6 = vld [vmem:[%s5509_s12 + $0x898] sm:$0xf]  ;;  %v3477_v7 = vor.u32 %v4783_v56, %v3476_v53  ;;  %v4557_v31 = vor.u32 %v5053_v22, %v4556_v21  ;;  %v4536_v33 = vld [vmem:[%s5509_s12 + $0x848] sm:$0xf]  ;;  %v5048_v34 = vld [vmem:[%s5509_s12 + $0x858] sm:$0xf0]  ;;  %v4217_v37 = vor.u32 %v4968_v28, %v4216_v27 }
  0x79   : > { %v4577_v19 = vor.u32 %v5058_v9, %v4576_v6  ;;  %v4196_v39 = vld [vmem:[%s5509_s12 + $0x5a0] sm:$0xf]  ;;  %v4963_v40 = vld [vmem:[%s5509_s12 + $0x5b0] sm:$0xf0]  ;;  %v4537_v43 = vor.u32 %v5048_v34, %v4536_v33  ;;  %v4176_v51 = vld [vmem:[%s5509_s12 + $0x578] sm:$0xf] }
  0x7a   : > { %2740 = vmatpush.bf16.msra.mxu2 %v3897_v12  ;;  %2753 = vmatpush.bf16.msra.mxu3 %v4057_v13  ;;  %v4257_v12 = vor.u32 %v4978_v60, %v4256_v59  ;;  %v4417_v13 = vor.u32 %v5018_v0, %v4416_v61  ;;  %v4516_v45 = vld [vmem:[%s5509_s12 + $0x820] sm:$0xf]  ;;  %v5043_v46 = vld [vmem:[%s5509_s12 + $0x830] sm:$0xf0]  ;;  %v4197_v49 = vor.u32 %v4963_v40, %v4196_v39  ;;  %v4958_v52 = vld [vmem:[%s5509_s12 + $0x588] sm:$0xf0] }
  0x7b   : > { %v4336_v53 = vld [vmem:[%s5509_s12 + $0x6b8] sm:$0xf]  ;;  %v4177_v57 = vor.u32 %v4958_v52, %v4176_v51  ;;  %v4156_v59 = vld [vmem:[%s5509_s12 + $0x550] sm:$0xf]  ;;  %v4953_v60 = vld [vmem:[%s5509_s12 + $0x560] sm:$0xf0] }
  0x7c   : > { %2715 = vmatpush.bf16.msra.mxu0 %v3557_v17  ;;  %2728 = vmatpush.bf16.msra.mxu1 %v3717_v18  ;;  %v3797_v17 = vor.u32 %v4863_v3, %v3796_v1  ;;  %v3957_v18 = vor.u32 %v4903_v5, %v3956_v4  ;;  %v4316_v61 = vld [vmem:[%s5509_s12 + $0x690] sm:$0xf]  ;;  %v4496_v1 = vld [vmem:[%s5509_s12 + $0x7f8] sm:$0xf]  ;;  %v5038_v3 = vld [vmem:[%s5509_s12 + $0x808] sm:$0xf0] }
  0x7d   : > { %v4656_v4 = vld [vmem:[%s5509_s12 + $0x938] sm:$0xf]  ;;  %v4497_v5 = vor.u32 %v5038_v3, %v4496_v1  ;;  %v5078_v6 = vld [vmem:[%s5509_s12 + $0x948] sm:$0xf0]  ;;  %v4948_v9 = vld [vmem:[%s5509_s12 + $0x538] sm:$0xf0] }
  0x7e   : > { %2741 = vmatpush.bf16.msra.mxu2 %v3877_v23  ;;  %2754 = vmatpush.bf16.msra.mxu3 %v4037_v24  ;;  %v4716_v23 = vld [vmem:[%s5509_s12 + $0x9b0] sm:$0xf]  ;;  %v5093_v24 = vld [vmem:[%s5509_s12 + $0x9c0] sm:$0xf0]  ;;  %v4296_v11 = vld [vmem:[%s5509_s12 + $0x668] sm:$0xf] }
  0x7f   : > { %v4717_v32 = vor.u32 %v5093_v24, %v4716_v23  ;;  %v4476_v14 = vld [vmem:[%s5509_s12 + $0x7d0] sm:$0xf]  ;;  %v5033_v2 = vld [vmem:[%s5509_s12 + $0x7e0] sm:$0xf0]  ;;  %v4276_v21 = vld [vmem:[%s5509_s12 + $0x640] sm:$0xf] }
  0x80   : > { %2716 = vmatpush.bf16.msra.mxu0 %v3537_v29  ;;  %2729 = vmatpush.bf16.msra.mxu1 %v3697_v30  ;;  %v4376_v29 = vld [vmem:[%s5509_s12 + $0x708] sm:$0xf]  ;;  %v5008_v30 = vld [vmem:[%s5509_s12 + $0x718] sm:$0xf0]  ;;  %v4636_v15 = vld [vmem:[%s5509_s12 + $0x910] sm:$0xf]  ;;  %v4477_v16 = vor.u32 %v5033_v2, %v4476_v14 }
  0x81   : > { %v4377_v38 = vor.u32 %v5008_v30, %v4376_v29  ;;  %v4983_v23 = vld [vmem:[%s5509_s12 + $0x650] sm:$0xf0]  ;;  %v4616_v28 = vld [vmem:[%s5509_s12 + $0x8e8] sm:$0xf]  ;;  %v5068_v29 = vld [vmem:[%s5509_s12 + $0x8f8] sm:$0xf0] }
  0x82   : > { %2742 = vmatpush.bf16.msra.mxu2 %v3857_v35  ;;  %2755 = vmatpush.bf16.msra.mxu3 %v4017_v36  ;;  %v4696_v35 = vld [vmem:[%s5509_s12 + $0x988] sm:$0xf]  ;;  %v5088_v36 = vld [vmem:[%s5509_s12 + $0x998] sm:$0xf0]  ;;  %v4277_v24 = vor.u32 %v4983_v23, %v4276_v21  ;;  %v4617_v30 = vor.u32 %v5068_v29, %v4616_v28  ;;  %v4596_v34 = vld [vmem:[%s5509_s12 + $0x8c0] sm:$0xf] }
  0x83   : > { %v4697_v44 = vor.u32 %v5088_v36, %v4696_v35  ;;  %v5063_v35 = vld [vmem:[%s5509_s12 + $0x8d0] sm:$0xf0]  ;;  %v4936_v1 = vld [vmem:[%s5509_s12 + $0x4dc] sm:$0xf]  ;;  %v4841_v28 = vld [vmem:[%s5509_s12 + $0x1e4] sm:$0xf] }
  0x84   : > { %2717 = vmatpush.bf16.msra.mxu0 %v3517_v41  ;;  %2730 = vmatpush.bf16.msra.mxu1 %v3677_v42  ;;  %v4356_v41 = vld [vmem:[%s5509_s12 + $0x6e0] sm:$0xf]  ;;  %v5003_v42 = vld [vmem:[%s5509_s12 + $0x6f0] sm:$0xf0]  ;;  %v4597_v36 = vor.u32 %v5063_v35, %v4596_v34  ;;  %v3718_v29 = vld [vmem:[%s5509_s12 + $0x1f4] sm:$0xf0] }
  0x85   : > { %v4357_v50 = vor.u32 %v5003_v42, %v4356_v41  ;;  %v4816_v42 = vld [vmem:[%s5509_s12 + $0x11c] sm:$0xf]  ;;  %v3898_v35 = vld [vmem:[%s5509_s12 + $0x35c] sm:$0xf0]  ;;  %s274_s7 = scalar_lea.vmem [#allocation7], %s5964_s27  ;;  %vm3244_vm2 = vcmask 1041408  }
  0x86   : > { %2743 = vmatpush.bf16.msra.mxu2 %v3837_v47  ;;  %2756 = vmatpush.bf16.msra.mxu3 %v3997_v48  ;;  %v4676_v47 = vld [vmem:[%s5509_s12 + $0x960] sm:$0xf]  ;;  %v5083_v48 = vld [vmem:[%s5509_s12 + $0x970] sm:$0xf0]  ;;  %s309_s16 = smul.u32 5, %s5396_s22  ;;  %vm3246_vm3 = vcmask 1045508  }
  0x87   : > { %v4677_v56 = vor.u32 %v5083_v48, %v4676_v47  ;;  %v3778_v47 = vld [vmem:[%s5509_s12 + $0x26c] sm:$0xf0]  ;;  %vm3248_vm4 = vcmask 1043456  }
  0x88   : > { %2718 = vmatpush.bf16.msra.mxu0 %v3497_v54  ;;  %2731 = vmatpush.bf16.msra.mxu1 %v3657_v55  ;;  %v4998_v54 = vld [vmem:[%s5509_s12 + $0x6c8] sm:$0xf0]  ;;  %v4517_v55 = vor.u32 %v5043_v46, %v4516_v45  ;;  %v3618_v45 = vld [vmem:[%s5509_s12 + $0x12c] sm:$0xf0]  ;;  %v4856_v46 = vld [vmem:[%s5509_s12 + $0x25c] sm:$0xf] }
  0x89   : > { %v4337_v58 = vor.u32 %v4998_v54, %v4336_v53  ;;  %v3621_v52 = vor.u32 %v4816_v42, %v3618_v45  ;;  %v3781_v53 = vor.u32 %v4856_v46, %v3778_v47  ;;  %v4811_v54 = vld [vmem:[%s5509_s12 + $0xf4] sm:$0xf]  ;;  %v3721_v42 = vor.u32 %v4841_v28, %v3718_v29  ;;  %v4796_v45 = vld [vmem:[%s5509_s12 + $0x7c] sm:$0xf]  ;;  %p310_p5 = scmp.lt.s32.totalorder %s309_s16, 49 }
  0x8a   : > { %2744 = vmatpush.bf16.msra.mxu2 %v3817_v62  ;;  %2757 = vmatpush.bf16.msra.mxu3 %v3977_v63  ;;  %v4993_v62 = vld [vmem:[%s5509_s12 + $0x6a0] sm:$0xf0]  ;;  %v4157_v63 = vor.u32 %v4953_v60, %v4156_v59  ;;  %v3758_v59 = vld [vmem:[%s5509_s12 + $0x244] sm:$0xf0]  ;;  %v4871_v28 = vld [vmem:[%s5509_s12 + $0x2d4] sm:$0xf] }
  0x8b   : > { %v4317_v0 = vor.u32 %v4993_v62, %v4316_v61  ;;  %s6313_s16 = smov (!%p310_p5, %s309_s16), 49 }
  0x8c   : > { %2719 = vmatpush.bf16.msra.mxu0 %v3477_v7  ;;  %2732 = vmatpush.bf16.msra.mxu1 %v3637_v8  ;;  %v4657_v7 = vor.u32 %v5078_v6, %v4656_v4  ;;  %v4136_v8 = vld [vmem:[%s5509_s12 + $0x528] sm:$0xf]  ;;  %s3369_s13 = sshll.u32 %s6313_s16, 1 }
  0x8d   : > { %v4137_v10 = vor.u32 %v4948_v9, %v4136_v8  ;;  %v4098_v8 = vld [vmem:[%s5509_s12 + $0x4ec] sm:$0xf0]  ;;  %v4806_v9 = vld [vmem:[%s5509_s12 + $0xcc] sm:$0xf]  ;;  %s313_s17 = scalar_lea.vmem %s6296_s5, %s3369_s13 }
  0x8e   : > { %2745 = vmatpush.bf16.msra.mxu2 %v3797_v17  ;;  %2758 = vmatpush.bf16.msra.mxu3 %v3957_v18  ;;  %v5073_v17 = vld [vmem:[%s5509_s12 + $0x920] sm:$0xf0] }
  0x8f   : > { %v4637_v18 = vor.u32 %v5073_v17, %v4636_v15  ;;  %v4101_v15 = vor.u32 %v4936_v1, %v4098_v8  ;;  %v4791_v1 = vld [vmem:[%s5509_s12 + $0x54] sm:$0xf] }
  0x90   : > { %2764 = vmatpush.bf16.msrb.mxu0 %v4257_v12  ;;  %2777 = vmatpush.bf16.msrb.mxu1 %v4417_v13  ;;  %v4988_v12 = vld [vmem:[%s5509_s12 + $0x678] sm:$0xf0] }
  0x91   : > { %v4297_v13 = vor.u32 %v4988_v12, %v4296_v11  ;;  %v4846_v11 = vld [vmem:[%s5509_s12 + $0x20c] sm:$0xf]  ;;  %v3738_v12 = vld [vmem:[%s5509_s12 + $0x21c] sm:$0xf0] }
  0x92   : > { %2790 = vmatpush.bf16.msrb.mxu2 %v4577_v19  ;;  %2803 = vmatpush.bf16.msrb.mxu3 %v4737_v20  ;;  %v4116_v19 = vld [vmem:[%s5509_s12 + $0x500] sm:$0xf]  ;;  %v4943_v20 = vld [vmem:[%s5509_s12 + $0x510] sm:$0xf0]  ;;  %v3741_v23 = vor.u32 %v4846_v11, %v3738_v12  ;;  %v3858_v12 = vld [vmem:[%s5509_s12 + $0x30c] sm:$0xf0] }
  0x93   : > { %v4117_v22 = vor.u32 %v4943_v20, %v4116_v19  ;;  %v4891_v19 = vld [vmem:[%s5509_s12 + $0x374] sm:$0xf]  ;;  %v3918_v20 = vld [vmem:[%s5509_s12 + $0x384] sm:$0xf0] }
  0x94   : > { %2765 = vmatpush.bf16.msrb.mxu0 %v4237_v25  ;;  %2778 = vmatpush.bf16.msrb.mxu1 %v4397_v26  ;;  %v4456_v25 = vld [vmem:[%s5509_s12 + $0x7a8] sm:$0xf]  ;;  %v5028_v26 = vld [vmem:[%s5509_s12 + $0x7b8] sm:$0xf0] }
  0x95   : > { %v4457_v27 = vor.u32 %v5028_v26, %v4456_v25  ;;  %v4078_v25 = vld [vmem:[%s5509_s12 + $0x4c4] sm:$0xf0]  ;;  %v4801_v26 = vld [vmem:[%s5509_s12 + $0xa4] sm:$0xf] }
  0x96   : > { %2791 = vmatpush.bf16.msrb.mxu2 %v4557_v31  ;;  %2804 = vmatpush.bf16.msrb.mxu3 %v4717_v32  ;;  %v4436_v31 = vld [vmem:[%s5509_s12 + $0x780] sm:$0xf]  ;;  %v5023_v32 = vld [vmem:[%s5509_s12 + $0x790] sm:$0xf0] }
  0x97   : > { %v4437_v33 = vor.u32 %v5023_v32, %v4436_v31 }
  0x98   : > { %2766 = vmatpush.bf16.msrb.mxu0 %v4217_v37  ;;  %2779 = vmatpush.bf16.msrb.mxu1 %v4377_v38  ;;  %v5672_v37 = vld [vmem:[#allocation4] sm:$0xff] }
  0x99   : > { %v347_v38 = vperm.slane %v5672_v37, 0  ;;  %v348_v39 = vperm.slane %v5672_v37, 1  ;;  %v350_v51 = vperm.slane %v5672_v37, 3  ;;  %v351_v17 = vperm.slane %v5672_v37, 4 }
  0x9a   : > { %2792 = vmatpush.bf16.msrb.mxu2 %v4537_v43  ;;  %2805 = vmatpush.bf16.msrb.mxu3 %v4697_v44 }
  0x9c   : > { %2767 = vmatpush.bf16.msrb.mxu0 %v4197_v49  ;;  %2780 = vmatpush.bf16.msrb.mxu1 %v4357_v50  ;;  %v349_v50 = vperm.slane %v5672_v37, 2 }
  0x9e   : > { %2793 = vmatpush.bf16.msrb.mxu2 %v4517_v55  ;;  %2806 = vmatpush.bf16.msrb.mxu3 %v4677_v56  ;;  %v3598_v55 = vld [vmem:[%s5509_s12 + $0x104] sm:$0xf0] }
  0x9f   : > { %v3601_v62 = vor.u32 %v4811_v54, %v3598_v55  ;;  %v354_v54 = vperm.slane %v5672_v37, 7  ;;  %v4881_v55 = vld [vmem:[%s5509_s12 + $0x324] sm:$0xf] }
  0xa0   : > { %2768 = vmatpush.bf16.msrb.mxu0 %v4177_v57  ;;  %2781 = vmatpush.bf16.msrb.mxu1 %v4337_v58  ;;  %v4851_v58 = vld [vmem:[%s5509_s12 + $0x234] sm:$0xf] }
  0xa2   : > { %2794 = vmatpush.bf16.msrb.mxu2 %v4497_v5  ;;  %2807 = vmatpush.bf16.msrb.mxu3 %v4657_v7  ;;  %v3761_v7 = vor.u32 %v4851_v58, %v3758_v59  ;;  %v3878_v58 = vld [vmem:[%s5509_s12 + $0x334] sm:$0xf0]  ;;  %v4921_v59 = vld [vmem:[%s5509_s12 + $0x464] sm:$0xf] }
  0xa4   : > { %2769 = vmatpush.bf16.msrb.mxu0 %v4157_v63  ;;  %2782 = vmatpush.bf16.msrb.mxu1 %v4317_v0  ;;  %v4896_v63 = vld [vmem:[%s5509_s12 + $0x39c] sm:$0xf]  ;;  %v3938_v0 = vld [vmem:[%s5509_s12 + $0x3ac] sm:$0xf0] }
  0xa5   : > { %v3941_v2 = vor.u32 %v4896_v63, %v3938_v0 }
  0xa6   : > { %2795 = vmatpush.bf16.msrb.mxu2 %v4477_v16  ;;  %2808 = vmatpush.bf16.msrb.mxu3 %v4637_v18  ;;  %v352_v18 = vperm.slane %v5672_v37, 5 }
  0xa8   : > { %2770 = vmatpush.bf16.msrb.mxu0 %v4137_v10  ;;  %2783 = vmatpush.bf16.msrb.mxu1 %v4297_v13  ;;  %v3578_v10 = vld [vmem:[%s5509_s12 + $0xdc] sm:$0xf0] }
  0xa9   : > { %v3581_v16 = vor.u32 %v4806_v9, %v3578_v10  ;;  %v4876_v9 = vld [vmem:[%s5509_s12 + $0x2fc] sm:$0xf] }
  0xaa   : > { %2796 = vmatpush.bf16.msrb.mxu2 %v4457_v27  ;;  %2809 = vmatpush.bf16.msrb.mxu3 %v4617_v30  ;;  %v3558_v27 = vld [vmem:[%s5509_s12 + $0xb4] sm:$0xf0]  ;;  %v4886_v30 = vld [vmem:[%s5509_s12 + $0x34c] sm:$0xf] }
  0xab   : > { %v3901_v46 = vor.u32 %v4886_v30, %v3898_v35 }
  0xac   : > { %2771 = vmatpush.bf16.msrb.mxu0 %v4117_v22  ;;  %2784 = vmatpush.bf16.msrb.mxu1 %v4277_v24  ;;  %v4931_v24 = vld [vmem:[%s5509_s12 + $0x4b4] sm:$0xf] }
  0xad   : > { %v4081_v34 = vor.u32 %v4931_v24, %v4078_v25  ;;  %v4826_v24 = vld [vmem:[%s5509_s12 + $0x16c] sm:$0xf]  ;;  %v3658_v25 = vld [vmem:[%s5509_s12 + $0x17c] sm:$0xf0] }
  0xae   : > { %2797 = vmatpush.bf16.msrb.mxu2 %v4437_v33  ;;  %2810 = vmatpush.bf16.msrb.mxu3 %v4597_v36  ;;  %v3921_v33 = vor.u32 %v4891_v19, %v3918_v20  ;;  %v4926_v36 = vld [vmem:[%s5509_s12 + $0x48c] sm:$0xf]  ;;  %v3498_v19 = vld [vmem:[%s5509_s12 + $0x3c] sm:$0xf0]  ;;  %v3661_v35 = vor.u32 %v4826_v24, %v3658_v25  ;;  %v5091_v24 = vld [vmem:[%s5509_s12 + $0x9b4] sm:$0xf] }
  0xaf   : > { %v4718_v25 = vld [vmem:[%s5509_s12 + $0x9c4] sm:$0xf0] }
  0xdc   : > { %v541_v40 = vpop.f32.mrf.mxu0  ;;  %v554_v41 = vpop.f32.mrf.mxu1 }
  0xdd   : > { %v542_v43 = vadd.f32 %v541_v40, %v347_v38  ;;  %v555_v44 = vadd.f32 %v554_v41, %v348_v39  ;;  %v4058_v38 = vld [vmem:[%s5509_s12 + $0x49c] sm:$0xf0]  ;;  %v3561_v41 = vor.u32 %v4801_v26, %v3558_v27  ;;  %v3861_v26 = vor.u32 %v4876_v9, %v3858_v12  ;;  %v5096_v9 = vld [vmem:[%s5509_s12 + $0x9dc] sm:$0xf] }
  0xde   : > { %v4061_v47 = vor.u32 %v4926_v36, %v4058_v38  ;;  %v4781_v36 = vld [vmem:[%s5509_s12 + $0x4] sm:$0xf]  ;;  %v3478_v38 = vld [vmem:[%s5509_s12 + $0x14] sm:$0xf0] }
  0xdf   : > { %v636_v48 = vmax.f32 %v542_v43, 0.0  ;;  %v637_v49 = vmax.f32 %v555_v44, 0.0 }
  0xe1   : > { %v5684_v56 = vpack.c.bf16 %v636_v48, %v636_v48  ;;  %v5686_v57 = vpack.c.bf16 %v637_v49, %v637_v49  ;;  %v3538_v48 = vld [vmem:[%s5509_s12 + $0x8c] sm:$0xf0]  ;;  %v4836_v49 = vld [vmem:[%s5509_s12 + $0x1bc] sm:$0xf] }
  0xe2   : > { %v3541_v63 = vor.u32 %v4796_v45, %v3538_v48  ;;  %v4418_v48 = vld [vmem:[%s5509_s12 + $0x76c] sm:$0xf0] }
  0xe3   : > { %2720 = vmatmul.bf16.vlgmr.msra.gmra.mxu0 %v5684_v56  ;;  %2733 = vmatmul.bf16.vlgmr.msra.gmra.mxu1 %v5686_v57 }
  0xe4   : > { %v567_v60 = vpop.f32.mrf.mxu2  ;;  %v580_v61 = vpop.f32.mrf.mxu3  ;;  %2816 = vmatpush.bf16.msra.mxu0 %v3621_v52  ;;  %2829 = vmatpush.bf16.msra.mxu1 %v3781_v53  ;;  %v353_v53 = vperm.slane %v5672_v37, 6  ;;  %v3678_v37 = vld [vmem:[%s5509_s12 + $0x1a4] sm:$0xf0] }
  0xe5   : > { %v568_v3 = vadd.f32 %v567_v60, %v349_v50  ;;  %v581_v4 = vadd.f32 %v580_v61, %v350_v51  ;;  %v543_v5 = vpop.f32.mrf.mxu0  ;;  %v556_v6 = vpop.f32.mrf.mxu1  ;;  %v3698_v50 = vld [vmem:[%s5509_s12 + $0x1cc] sm:$0xf0]  ;;  %v4038_v60 = vld [vmem:[%s5509_s12 + $0x474] sm:$0xf0] }
  0xe6   : > { %v3701_v0 = vor.u32 %v4836_v49, %v3698_v50  ;;  %v4041_v8 = vor.u32 %v4921_v59, %v4038_v60  ;;  %v4866_v49 = vld [vmem:[%s5509_s12 + $0x2ac] sm:$0xf]  ;;  %v3818_v50 = vld [vmem:[%s5509_s12 + $0x2bc] sm:$0xf0]  ;;  %v4971_v59 = vld [vmem:[%s5509_s12 + $0x5f4] sm:$0xf] }
  0xe7   : > { %v638_v13 = vmax.f32 %v568_v3, 0.0  ;;  %v639_v14 = vmax.f32 %v581_v4, 0.0  ;;  %v3518_v3 = vld [vmem:[%s5509_s12 + $0x64] sm:$0xf0]  ;;  %v4831_v4 = vld [vmem:[%s5509_s12 + $0x194] sm:$0xf] }
  0xe8   : > { %2817 = vmatpush.bf16.msra.mxu0 %v3601_v62  ;;  %2830 = vmatpush.bf16.msra.mxu1 %v3761_v7  ;;  %v3881_v7 = vor.u32 %v4881_v55, %v3878_v58  ;;  %v4238_v60 = vld [vmem:[%s5509_s12 + $0x604] sm:$0xf0] }
  0xe9   : > { %v5704_v21 = vpack.c.bf16 %v638_v13, %v638_v13  ;;  %v5706_v22 = vpack.c.bf16 %v639_v14, %v639_v14  ;;  %v4916_v13 = vld [vmem:[%s5509_s12 + $0x43c] sm:$0xf]  ;;  %v4018_v14 = vld [vmem:[%s5509_s12 + $0x44c] sm:$0xf0] }
  0xea   : > { %v4021_v27 = vor.u32 %v4916_v13, %v4018_v14  ;;  %v4966_v13 = vld [vmem:[%s5509_s12 + $0x5cc] sm:$0xf] }
  0xeb   : > { %2746 = vmatmul.bf16.vlgmr.msra.gmra.mxu2 %v5704_v21  ;;  %2759 = vmatmul.bf16.vlgmr.msra.gmra.mxu3 %v5706_v22 }
  0xec   : > { %2842 = vmatpush.bf16.msra.mxu2 %v3941_v2  ;;  %2855 = vmatpush.bf16.msra.mxu3 %v4101_v15  ;;  %v569_v31 = vpop.f32.mrf.mxu2  ;;  %v582_v32 = vpop.f32.mrf.mxu3 }
  0xed   : > { %2818 = vmatpush.bf16.msra.mxu0 %v3581_v16  ;;  %2831 = vmatpush.bf16.msra.mxu1 %v3741_v23  ;;  %v593_v39 = vpop.f32.mrf.mxu0  ;;  %v606_v40 = vpop.f32.mrf.mxu1  ;;  %v3521_v16 = vor.u32 %v4791_v1, %v3518_v3  ;;  %v3838_v31 = vld [vmem:[%s5509_s12 + $0x2e4] sm:$0xf0]  ;;  %v4911_v32 = vld [vmem:[%s5509_s12 + $0x414] sm:$0xf] }
  0xee   : > { %v594_v43 = vadd.f32 %v593_v39, %v351_v17  ;;  %v607_v44 = vadd.f32 %v606_v40, %v352_v18  ;;  %v3681_v17 = vor.u32 %v4831_v4, %v3678_v37  ;;  %v4786_v18 = vld [vmem:[%s5509_s12 + $0x2c] sm:$0xf]  ;;  %v4821_v39 = vld [vmem:[%s5509_s12 + $0x144] sm:$0xf]  ;;  %v3638_v40 = vld [vmem:[%s5509_s12 + $0x154] sm:$0xf0] }
  0xef   : > { %v4398_v3 = vld [vmem:[%s5509_s12 + $0x744] sm:$0xf0]  ;;  %v4861_v4 = vld [vmem:[%s5509_s12 + $0x284] sm:$0xf]  ;;  %v3798_v37 = vld [vmem:[%s5509_s12 + $0x294] sm:$0xf0] }
  0xf0   : > { %v640_v51 = vmax.f32 %v594_v43, 0.0  ;;  %v641_v52 = vmax.f32 %v607_v44, 0.0  ;;  %2843 = vmatpush.bf16.msra.mxu2 %v3921_v33  ;;  %2856 = vmatpush.bf16.msra.mxu3 %v4081_v34  ;;  %v3998_v33 = vld [vmem:[%s5509_s12 + $0x424] sm:$0xf0]  ;;  %v3501_v34 = vor.u32 %v4786_v18, %v3498_v19  ;;  %v3841_v43 = vor.u32 %v4871_v28, %v3838_v31  ;;  %v4961_v28 = vld [vmem:[%s5509_s12 + $0x5a4] sm:$0xf] }
  0xf1   : > { %2819 = vmatpush.bf16.msra.mxu0 %v3561_v41  ;;  %2832 = vmatpush.bf16.msra.mxu1 %v3721_v42  ;;  %v4976_v41 = vld [vmem:[%s5509_s12 + $0x61c] sm:$0xf]  ;;  %v4258_v42 = vld [vmem:[%s5509_s12 + $0x62c] sm:$0xf0]  ;;  %v4001_v44 = vor.u32 %v4911_v32, %v3998_v33  ;;  %v3801_v14 = vor.u32 %v4861_v4, %v3798_v37  ;;  %v4198_v31 = vld [vmem:[%s5509_s12 + $0x5b4] sm:$0xf0] }
  0xf2   : > { %v5730_v61 = vpack.c.bf16 %v640_v51, %v640_v51  ;;  %v5732_v62 = vpack.c.bf16 %v641_v52, %v641_v52  ;;  %v4906_v51 = vld [vmem:[%s5509_s12 + $0x3ec] sm:$0xf]  ;;  %v3978_v52 = vld [vmem:[%s5509_s12 + $0x3fc] sm:$0xf0]  ;;  %v4261_v55 = vor.u32 %v4976_v41, %v4258_v42  ;;  %v5001_v32 = vld [vmem:[%s5509_s12 + $0x6e4] sm:$0xf]  ;;  %v4201_v41 = vor.u32 %v4961_v28, %v4198_v31 }
  0xf3   : > { %v3981_v1 = vor.u32 %v4906_v51, %v3978_v52  ;;  %v4358_v33 = vld [vmem:[%s5509_s12 + $0x6f4] sm:$0xf0]  ;;  %v5081_v51 = vld [vmem:[%s5509_s12 + $0x964] sm:$0xf]  ;;  %v5076_v4 = vld [vmem:[%s5509_s12 + $0x93c] sm:$0xf] }
  0xf4   : > { %2844 = vmatpush.bf16.msra.mxu2 %v3901_v46  ;;  %2857 = vmatpush.bf16.msra.mxu3 %v4061_v47  ;;  %v619_v5 = vpop.f32.mrf.mxu2  ;;  %v632_v6 = vpop.f32.mrf.mxu3  ;;  %v5016_v47 = vld [vmem:[%s5509_s12 + $0x75c] sm:$0xf]  ;;  %v4361_v42 = vor.u32 %v5001_v32, %v4358_v33  ;;  %v4678_v52 = vld [vmem:[%s5509_s12 + $0x974] sm:$0xf0]  ;;  %v4658_v37 = vld [vmem:[%s5509_s12 + $0x94c] sm:$0xf0] }
  0xf5   : > { %v620_v10 = vadd.f32 %v619_v5, %v353_v53  ;;  %v633_v11 = vadd.f32 %v632_v6, %v354_v54  ;;  %2772 = vmatmul.bf16.vlgmr.msrb.gmra.mxu0 %v5730_v61  ;;  %2785 = vmatmul.bf16.vlgmr.msrb.gmra.mxu1 %v5732_v62  ;;  %v595_v2 = vpop.f32.mrf.mxu0  ;;  %v608_v15 = vpop.f32.mrf.mxu1  ;;  %v3481_v53 = vor.u32 %v4781_v36, %v3478_v38  ;;  %v4901_v5 = vld [vmem:[%s5509_s12 + $0x3c4] sm:$0xf]  ;;  %v3958_v6 = vld [vmem:[%s5509_s12 + $0x3d4] sm:$0xf0]  ;;  %v5046_v36 = vld [vmem:[%s5509_s12 + $0x84c] sm:$0xf] }
  0xf6   : > { %2820 = vmatpush.bf16.msra.mxu0 %v3541_v63  ;;  %2833 = vmatpush.bf16.msra.mxu1 %v3701_v0  ;;  %v3641_v54 = vor.u32 %v4821_v39, %v3638_v40  ;;  %v4421_v58 = vor.u32 %v5016_v47, %v4418_v48  ;;  %v5011_v63 = vld [vmem:[%s5509_s12 + $0x734] sm:$0xf]  ;;  %v3821_v0 = vor.u32 %v4866_v49, %v3818_v50  ;;  %v4218_v15 = vld [vmem:[%s5509_s12 + $0x5dc] sm:$0xf0]  ;;  %v5086_v39 = vld [vmem:[%s5509_s12 + $0x98c] sm:$0xf] }
  0xf7   : > { %v642_v20 = vmax.f32 %v620_v10, 0.0  ;;  %v643_v23 = vmax.f32 %v633_v11, 0.0  ;;  %v4738_v10 = vld [vmem:[%s5509_s12 + $0x9ec] sm:$0xf0]  ;;  %v4241_v11 = vor.u32 %v4971_v59, %v4238_v60  ;;  %v4401_v12 = vor.u32 %v5011_v63, %v4398_v3  ;;  %v4538_v38 = vld [vmem:[%s5509_s12 + $0x85c] sm:$0xf0] }
  0xf8   : > { %2845 = vmatpush.bf16.msra.mxu2 %v3881_v7  ;;  %2858 = vmatpush.bf16.msra.mxu3 %v4041_v8  ;;  %v5056_v7 = vld [vmem:[%s5509_s12 + $0x89c] sm:$0xf]  ;;  %v4578_v8 = vld [vmem:[%s5509_s12 + $0x8ac] sm:$0xf0]  ;;  %v3961_v2 = vor.u32 %v4901_v5, %v3958_v6  ;;  %v4741_v19 = vor.u32 %v5096_v9, %v4738_v10  ;;  %v4698_v40 = vld [vmem:[%s5509_s12 + $0x99c] sm:$0xf0]  ;;  %v4541_v47 = vor.u32 %v5046_v36, %v4538_v38 }
  0xf9   : > { %v5749_v29 = vpack.c.bf16 %v642_v20, %v642_v20  ;;  %v5751_v30 = vpack.c.bf16 %v643_v23, %v643_v23  ;;  %v4581_v18 = vor.u32 %v5056_v7, %v4578_v8  ;;  %v5051_v20 = vld [vmem:[%s5509_s12 + $0x874] sm:$0xf]  ;;  %v4558_v23 = vld [vmem:[%s5509_s12 + $0x884] sm:$0xf0]  ;;  %v4701_v48 = vor.u32 %v5086_v39, %v4698_v40  ;;  %v5041_v49 = vld [vmem:[%s5509_s12 + $0x824] sm:$0xf] }
  0xfa   : > { %2821 = vmatpush.bf16.msra.mxu0 %v3521_v16  ;;  %2834 = vmatpush.bf16.msra.mxu1 %v3681_v17  ;;  %v5006_v16 = vld [vmem:[%s5509_s12 + $0x70c] sm:$0xf]  ;;  %v4378_v17 = vld [vmem:[%s5509_s12 + $0x71c] sm:$0xf0]  ;;  %v4518_v50 = vld [vmem:[%s5509_s12 + $0x834] sm:$0xf0] }
  0xfb   : > { %2798 = vmatmul.bf16.vlgmr.msrb.gmra.mxu2 %v5749_v29  ;;  %2811 = vmatmul.bf16.vlgmr.msrb.gmra.mxu3 %v5751_v30  ;;  %v4991_v59 = vld [vmem:[%s5509_s12 + $0x694] sm:$0xf]  ;;  %v4318_v60 = vld [vmem:[%s5509_s12 + $0x6a4] sm:$0xf0]  ;;  %v4521_v63 = vor.u32 %v5041_v49, %v4518_v50  ;;  %v4498_v3 = vld [vmem:[%s5509_s12 + $0x80c] sm:$0xf0] }
  0xfc   : > { %2846 = vmatpush.bf16.msra.mxu2 %v3861_v26  ;;  %2859 = vmatpush.bf16.msra.mxu3 %v4021_v27  ;;  %v621_v45 = vpop.f32.mrf.mxu2  ;;  %v634_v46 = vpop.f32.mrf.mxu3  ;;  %v4221_v26 = vor.u32 %v4966_v13, %v4218_v15  ;;  %v4381_v27 = vor.u32 %v5006_v16, %v4378_v17  ;;  %v4321_v6 = vor.u32 %v4991_v59, %v4318_v60  ;;  %v4946_v7 = vld [vmem:[%s5509_s12 + $0x52c] sm:$0xf]  ;;  %v4138_v8 = vld [vmem:[%s5509_s12 + $0x53c] sm:$0xf0]  ;;  %v5031_v13 = vld [vmem:[%s5509_s12 + $0x7d4] sm:$0xf] }
  0xfd   : > { %v4996_v45 = vld [vmem:[%s5509_s12 + $0x6bc] sm:$0xf]  ;;  %v4338_v46 = vld [vmem:[%s5509_s12 + $0x6cc] sm:$0xf0]  ;;  %v4986_v9 = vld [vmem:[%s5509_s12 + $0x66c] sm:$0xf]  ;;  %v4141_v16 = vor.u32 %v4946_v7, %v4138_v8 }
  0xfe   : > { %2822 = vmatpush.bf16.msra.mxu0 %v3501_v34  ;;  %2835 = vmatpush.bf16.msra.mxu1 %v3661_v35  ;;  %v4561_v34 = vor.u32 %v5051_v20, %v4558_v23  ;;  %v4721_v35 = vor.u32 %v5091_v24, %v4718_v25  ;;  %v4298_v10 = vld [vmem:[%s5509_s12 + $0x67c] sm:$0xf0]  ;;  %v4638_v15 = vld [vmem:[%s5509_s12 + $0x924] sm:$0xf0]  ;;  %v4981_v20 = vld [vmem:[%s5509_s12 + $0x644] sm:$0xf] }
  0xff   : > { %v4301_v17 = vor.u32 %v4986_v9, %v4298_v10  ;;  %v4278_v23 = vld [vmem:[%s5509_s12 + $0x654] sm:$0xf0]  ;;  %v3624_v24 = vld [vmem:[%s5509_s12 + $0x120] sm:$0xf]  ;;  %v4819_v25 = vld [vmem:[%s5509_s12 + $0x130] sm:$0xf0] }
 0x100   : > { %2847 = vmatpush.bf16.msra.mxu2 %v3841_v43  ;;  %2860 = vmatpush.bf16.msra.mxu3 %v4001_v44  ;;  %v4956_v43 = vld [vmem:[%s5509_s12 + $0x57c] sm:$0xf]  ;;  %v4178_v44 = vld [vmem:[%s5509_s12 + $0x58c] sm:$0xf0]  ;;  %v3784_v28 = vld [vmem:[%s5509_s12 + $0x260] sm:$0xf]  ;;  %v4281_v38 = vor.u32 %v4981_v20, %v4278_v23  ;;  %v3625_v39 = vor.u32 %v4819_v25, %v3624_v24 }
 0x101   : > { %v4859_v31 = vld [vmem:[%s5509_s12 + $0x270] sm:$0xf0]  ;;  %v5026_v32 = vld [vmem:[%s5509_s12 + $0x7ac] sm:$0xf]  ;;  %v4458_v33 = vld [vmem:[%s5509_s12 + $0x7bc] sm:$0xf0] }
 0x102   : > { %2823 = vmatpush.bf16.msra.mxu0 %v3481_v53  ;;  %2836 = vmatpush.bf16.msra.mxu1 %v3641_v54  ;;  %v4181_v53 = vor.u32 %v4956_v43, %v4178_v44  ;;  %v4341_v54 = vor.u32 %v4996_v45, %v4338_v46  ;;  %v3785_v40 = vor.u32 %v4859_v31, %v3784_v28  ;;  %v3764_v43 = vld [vmem:[%s5509_s12 + $0x238] sm:$0xf]  ;;  %v4854_v46 = vld [vmem:[%s5509_s12 + $0x248] sm:$0xf0]  ;;  %v5061_v49 = vld [vmem:[%s5509_s12 + $0x8c4] sm:$0xf] }
 0x103   : > { %v4461_v44 = vor.u32 %v5026_v32, %v4458_v33  ;;  %v4598_v50 = vld [vmem:[%s5509_s12 + $0x8d4] sm:$0xf0]  ;;  %v4934_v8 = vld [vmem:[%s5509_s12 + $0x4c8] sm:$0xf0]  ;;  %v3544_v24 = vld [vmem:[%s5509_s12 + $0x80] sm:$0xf] }
 0x104   : > { %2848 = vmatpush.bf16.msra.mxu2 %v3821_v0  ;;  %2861 = vmatpush.bf16.msra.mxu3 %v3981_v1  ;;  %v4681_v0 = vor.u32 %v5081_v51, %v4678_v52  ;;  %v5036_v1 = vld [vmem:[%s5509_s12 + $0x7fc] sm:$0xf]  ;;  %v3944_v51 = vld [vmem:[%s5509_s12 + $0x3a0] sm:$0xf]  ;;  %v4899_v52 = vld [vmem:[%s5509_s12 + $0x3b0] sm:$0xf0]  ;;  %v4601_v60 = vor.u32 %v5061_v49, %v4598_v50 }
 0x105   : > { %2824 = vmatmul.bf16.vlgmr.msra.gmra.mxu0 %v5684_v56  ;;  %2837 = vmatmul.bf16.vlgmr.msra.gmra.mxu1 %v5686_v57  ;;  %v4084_v7 = vld [vmem:[%s5509_s12 + $0x4b8] sm:$0xf]  ;;  %v4799_v25 = vld [vmem:[%s5509_s12 + $0x90] sm:$0xf0]  ;;  %v3704_v28 = vld [vmem:[%s5509_s12 + $0x1c0] sm:$0xf] }
 0x106   : > { %2868 = vmatpush.bf16.msrb.mxu0 %v4261_v55  ;;  %2881 = vmatpush.bf16.msrb.mxu1 %v4421_v58  ;;  %v4951_v55 = vld [vmem:[%s5509_s12 + $0x554] sm:$0xf]  ;;  %v4158_v58 = vld [vmem:[%s5509_s12 + $0x564] sm:$0xf0]  ;;  %v4884_v33 = vld [vmem:[%s5509_s12 + $0x338] sm:$0xf0] }
 0x107   : > { %v4161_v5 = vor.u32 %v4951_v55, %v4158_v58  ;;  %v3765_v58 = vor.u32 %v4854_v46, %v3764_v43  ;;  %v4839_v31 = vld [vmem:[%s5509_s12 + $0x1d0] sm:$0xf0]  ;;  %v3884_v32 = vld [vmem:[%s5509_s12 + $0x328] sm:$0xf]  ;;  %v3684_v43 = vld [vmem:[%s5509_s12 + $0x198] sm:$0xf] }
 0x108   : > { %2849 = vmatpush.bf16.msra.mxu2 %v3801_v14  ;;  %2862 = vmatpush.bf16.msra.mxu3 %v3961_v2  ;;  %v4478_v14 = vld [vmem:[%s5509_s12 + $0x7e4] sm:$0xf0]  ;;  %v5071_v2 = vld [vmem:[%s5509_s12 + $0x914] sm:$0xf] }
 0x109   : > { %v4879_v46 = vld [vmem:[%s5509_s12 + $0x310] sm:$0xf0] }
 0x10a   : > { %2869 = vmatpush.bf16.msrb.mxu0 %v4241_v11  ;;  %2882 = vmatpush.bf16.msrb.mxu1 %v4401_v12  ;;  %v4501_v11 = vor.u32 %v5036_v1, %v4498_v3  ;;  %v4661_v12 = vor.u32 %v5076_v4, %v4658_v37  ;;  %v3945_v1 = vor.u32 %v4899_v52, %v3944_v51  ;;  %v3744_v4 = vld [vmem:[%s5509_s12 + $0x210] sm:$0xf]  ;;  %v4849_v37 = vld [vmem:[%s5509_s12 + $0x220] sm:$0xf0] }
 0x10b   : > { %2850 = vmatmul.bf16.vlgmr.msra.gmra.mxu2 %v5704_v21  ;;  %2863 = vmatmul.bf16.vlgmr.msra.gmra.mxu3 %v5706_v22  ;;  %v3745_v10 = vor.u32 %v4849_v37, %v3744_v4  ;;  %v3504_v51 = vld [vmem:[%s5509_s12 + $0x30] sm:$0xf]  ;;  %v4789_v52 = vld [vmem:[%s5509_s12 + $0x40] sm:$0xf0]  ;;  %v3484_v4 = vld [vmem:[%s5509_s12 + $0x8] sm:$0xf] }
 0x10c   : > { %2894 = vmatpush.bf16.msrb.mxu2 %v4581_v18  ;;  %2907 = vmatpush.bf16.msrb.mxu3 %v4741_v19  ;;  %v4941_v18 = vld [vmem:[%s5509_s12 + $0x504] sm:$0xf]  ;;  %v4118_v19 = vld [vmem:[%s5509_s12 + $0x514] sm:$0xf0]  ;;  %v4784_v37 = vld [vmem:[%s5509_s12 + $0x18] sm:$0xf0] }
 0x10d   : > { %v4121_v36 = vor.u32 %v4941_v18, %v4118_v19  ;;  %v4064_v18 = vld [vmem:[%s5509_s12 + $0x490] sm:$0xf]  ;;  %v4929_v19 = vld [vmem:[%s5509_s12 + $0x4a0] sm:$0xf0] }
 0x10e   : > { %2870 = vmatpush.bf16.msrb.mxu0 %v4221_v26  ;;  %2883 = vmatpush.bf16.msrb.mxu1 %v4381_v27  ;;  %v4481_v26 = vor.u32 %v5031_v13, %v4478_v14  ;;  %v4641_v27 = vor.u32 %v5071_v2, %v4638_v15  ;;  %v4085_v14 = vor.u32 %v4934_v8, %v4084_v7  ;;  %v3724_v2 = vld [vmem:[%s5509_s12 + $0x1e8] sm:$0xf]  ;;  %v4844_v15 = vld [vmem:[%s5509_s12 + $0x1f8] sm:$0xf0] }
 0x10f   : > { %v3725_v23 = vor.u32 %v4844_v15, %v3724_v2  ;;  %v4824_v8 = vld [vmem:[%s5509_s12 + $0x158] sm:$0xf0]  ;;  %v3984_v2 = vld [vmem:[%s5509_s12 + $0x3f0] sm:$0xf]  ;;  %v4909_v15 = vld [vmem:[%s5509_s12 + $0x400] sm:$0xf0] }
 0x110   : > { %2895 = vmatpush.bf16.msrb.mxu2 %v4561_v34  ;;  %2908 = vmatpush.bf16.msrb.mxu3 %v4721_v35  ;;  %v5066_v34 = vld [vmem:[%s5509_s12 + $0x8ec] sm:$0xf]  ;;  %v4618_v35 = vld [vmem:[%s5509_s12 + $0x8fc] sm:$0xf0] }
 0x111   : > { %v4621_v45 = vor.u32 %v5066_v34, %v4618_v35  ;;  %v4044_v34 = vld [vmem:[%s5509_s12 + $0x468] sm:$0xf]  ;;  %v4924_v35 = vld [vmem:[%s5509_s12 + $0x478] sm:$0xf0] }
 0x112   : > { %2871 = vmatpush.bf16.msrb.mxu0 %v4201_v41  ;;  %2884 = vmatpush.bf16.msrb.mxu1 %v4361_v42  ;;  %v3604_v41 = vld [vmem:[%s5509_s12 + $0xf8] sm:$0xf]  ;;  %v4814_v42 = vld [vmem:[%s5509_s12 + $0x108] sm:$0xf0] }
 0x113   : > { %v3605_v55 = vor.u32 %v4814_v42, %v3604_v41  ;;  %v3885_v41 = vor.u32 %v4884_v33, %v3884_v32  ;;  %v4045_v42 = vor.u32 %v4924_v35, %v4044_v34  ;;  %v3964_v32 = vld [vmem:[%s5509_s12 + $0x3c8] sm:$0xf]  ;;  %v4904_v33 = vld [vmem:[%s5509_s12 + $0x3d8] sm:$0xf0]  ;;  %v4584_v34 = vld [vmem:[%s5509_s12 + $0x8a0] sm:$0xf] }
 0x114   : > { %2896 = vmatpush.bf16.msrb.mxu2 %v4541_v47  ;;  %2909 = vmatpush.bf16.msrb.mxu3 %v4701_v48  ;;  %v5021_v47 = vld [vmem:[%s5509_s12 + $0x784] sm:$0xf]  ;;  %v4438_v48 = vld [vmem:[%s5509_s12 + $0x794] sm:$0xf0]  ;;  %v5059_v35 = vld [vmem:[%s5509_s12 + $0x8b0] sm:$0xf0] }
 0x115   : > { %v4441_v59 = vor.u32 %v5021_v47, %v4438_v48  ;;  %v4024_v47 = vld [vmem:[%s5509_s12 + $0x440] sm:$0xf]  ;;  %v4919_v48 = vld [vmem:[%s5509_s12 + $0x450] sm:$0xf0] }
 0x116   : > { %2872 = vmatpush.bf16.msrb.mxu0 %v4181_v53  ;;  %2885 = vmatpush.bf16.msrb.mxu1 %v4341_v54  ;;  %v4104_v53 = vld [vmem:[%s5509_s12 + $0x4e0] sm:$0xf]  ;;  %v4939_v54 = vld [vmem:[%s5509_s12 + $0x4f0] sm:$0xf0] }
 0x117   : > { %v4105_v3 = vor.u32 %v4939_v54, %v4104_v53  ;;  %v4025_v54 = vor.u32 %v4919_v48, %v4024_v47  ;;  %v4384_v47 = vld [vmem:[%s5509_s12 + $0x710] sm:$0xf]  ;;  %v5009_v48 = vld [vmem:[%s5509_s12 + $0x720] sm:$0xf0] }
 0x118   : > { %2897 = vmatpush.bf16.msrb.mxu2 %v4521_v63  ;;  %2910 = vmatpush.bf16.msrb.mxu3 %v4681_v0  ;;  %v3584_v63 = vld [vmem:[%s5509_s12 + $0xd0] sm:$0xf]  ;;  %v4809_v0 = vld [vmem:[%s5509_s12 + $0xe0] sm:$0xf0] }
 0x119   : > { %v3585_v9 = vor.u32 %v4809_v0, %v3584_v63  ;;  %v4004_v63 = vld [vmem:[%s5509_s12 + $0x418] sm:$0xf]  ;;  %v4914_v0 = vld [vmem:[%s5509_s12 + $0x428] sm:$0xf0] }
 0x11a   : > { %2873 = vmatpush.bf16.msrb.mxu0 %v4161_v5  ;;  %2886 = vmatpush.bf16.msrb.mxu1 %v4321_v6  ;;  %v3924_v5 = vld [vmem:[%s5509_s12 + $0x378] sm:$0xf]  ;;  %v4894_v6 = vld [vmem:[%s5509_s12 + $0x388] sm:$0xf0]  ;;  %v4005_v7 = vor.u32 %v4914_v0, %v4004_v63  ;;  %v4364_v63 = vld [vmem:[%s5509_s12 + $0x6e8] sm:$0xf] }
 0x11b   : > { %v3925_v13 = vor.u32 %v4894_v6, %v3924_v5  ;;  %v3644_v5 = vld [vmem:[%s5509_s12 + $0x148] sm:$0xf]  ;;  %v5004_v0 = vld [vmem:[%s5509_s12 + $0x6f8] sm:$0xf0] }
 0x11c   : > { %2898 = vmatpush.bf16.msrb.mxu2 %v4501_v11  ;;  %2911 = vmatpush.bf16.msrb.mxu3 %v4661_v12  ;;  %v3564_v11 = vld [vmem:[%s5509_s12 + $0xa8] sm:$0xf]  ;;  %v4804_v12 = vld [vmem:[%s5509_s12 + $0xb8] sm:$0xf0] }
 0x11d   : > { %v3565_v20 = vor.u32 %v4804_v12, %v3564_v11  ;;  %v4424_v11 = vld [vmem:[%s5509_s12 + $0x760] sm:$0xf]  ;;  %v5019_v12 = vld [vmem:[%s5509_s12 + $0x770] sm:$0xf0] }
 0x11e   : > { %2874 = vmatpush.bf16.msrb.mxu0 %v4141_v16  ;;  %2887 = vmatpush.bf16.msrb.mxu1 %v4301_v17  ;;  %v3904_v16 = vld [vmem:[%s5509_s12 + $0x350] sm:$0xf]  ;;  %v4889_v17 = vld [vmem:[%s5509_s12 + $0x360] sm:$0xf0] }
 0x120   : > { %2899 = vmatpush.bf16.msrb.mxu2 %v4481_v26  ;;  %2912 = vmatpush.bf16.msrb.mxu3 %v4641_v27  ;;  %v3905_v26 = vor.u32 %v4889_v17, %v3904_v16  ;;  %v4065_v27 = vor.u32 %v4929_v19, %v4064_v18  ;;  %v3485_v16 = vor.u32 %v4784_v37, %v3484_v4  ;;  %v4704_v4 = vld [vmem:[%s5509_s12 + $0x990] sm:$0xf]  ;;  %v5089_v37 = vld [vmem:[%s5509_s12 + $0x9a0] sm:$0xf0] }
 0x121   : > { %v3645_v17 = vor.u32 %v4824_v8, %v3644_v5  ;;  %v4425_v19 = vor.u32 %v5019_v12, %v4424_v11  ;;  %v4959_v8 = vld [vmem:[%s5509_s12 + $0x590] sm:$0xf0]  ;;  %v4344_v11 = vld [vmem:[%s5509_s12 + $0x6c0] sm:$0xf] }
 0x122   : > { %2875 = vmatpush.bf16.msrb.mxu0 %v4121_v36  ;;  %2888 = vmatpush.bf16.msrb.mxu1 %v4281_v38  ;;  %v3545_v36 = vor.u32 %v4799_v25, %v3544_v24  ;;  %v3705_v38 = vor.u32 %v4839_v31, %v3704_v28  ;;  %v4404_v24 = vld [vmem:[%s5509_s12 + $0x738] sm:$0xf]  ;;  %v3804_v28 = vld [vmem:[%s5509_s12 + $0x288] sm:$0xf]  ;;  %v4864_v31 = vld [vmem:[%s5509_s12 + $0x298] sm:$0xf0] }
 0x123   : > { %v4999_v12 = vld [vmem:[%s5509_s12 + $0x6d0] sm:$0xf0] }
 0x124   : > { %2900 = vmatpush.bf16.msrb.mxu2 %v4461_v44  ;;  %2913 = vmatpush.bf16.msrb.mxu3 %v4621_v45  ;;  %v4834_v44 = vld [vmem:[%s5509_s12 + $0x1a8] sm:$0xf0]  ;;  %v3864_v45 = vld [vmem:[%s5509_s12 + $0x300] sm:$0xf] }
 0x125   : > { %2876 = vmatmul.bf16.vlgmr.msrb.gmra.mxu0 %v5730_v61  ;;  %2889 = vmatmul.bf16.vlgmr.msrb.gmra.mxu1 %v5732_v62  ;;  %v3685_v50 = vor.u32 %v4834_v44, %v3684_v43  ;;  %v3865_v53 = vor.u32 %v4879_v46, %v3864_v45  ;;  %v4224_v43 = vld [vmem:[%s5509_s12 + $0x5d0] sm:$0xf]  ;;  %v4969_v44 = vld [vmem:[%s5509_s12 + $0x5e0] sm:$0xf0]  ;;  %v4585_v45 = vor.u32 %v5059_v35, %v4584_v34 }
 0x126   : > { %2920 = vmatpush.bf16.msra.mxu0 %v3625_v39  ;;  %2933 = vmatpush.bf16.msra.mxu1 %v3785_v40  ;;  %v3524_v39 = vld [vmem:[%s5509_s12 + $0x58] sm:$0xf]  ;;  %v4794_v40 = vld [vmem:[%s5509_s12 + $0x68] sm:$0xf0]  ;;  %v4144_v34 = vld [vmem:[%s5509_s12 + $0x530] sm:$0xf] }
 0x127   : > { %v3525_v49 = vor.u32 %v4794_v40, %v3524_v39  ;;  %v4949_v35 = vld [vmem:[%s5509_s12 + $0x540] sm:$0xf0] }
 0x128   : > { %2901 = vmatpush.bf16.msrb.mxu2 %v4441_v59  ;;  %2914 = vmatpush.bf16.msrb.mxu3 %v4601_v60  ;;  %v3844_v59 = vld [vmem:[%s5509_s12 + $0x2d8] sm:$0xf]  ;;  %v4874_v60 = vld [vmem:[%s5509_s12 + $0x2e8] sm:$0xf0] }
 0x129   : > { %v3845_v6 = vor.u32 %v4874_v60, %v3844_v59 }
 0x12a   : > { %2921 = vmatpush.bf16.msra.mxu0 %v3605_v55  ;;  %2934 = vmatpush.bf16.msra.mxu1 %v3765_v58  ;;  %v3664_v55 = vld [vmem:[%s5509_s12 + $0x170] sm:$0xf]  ;;  %v4829_v58 = vld [vmem:[%s5509_s12 + $0x180] sm:$0xf0] }
 0x12b   : > { %2902 = vmatmul.bf16.vlgmr.msrb.gmra.mxu2 %v5749_v29  ;;  %2915 = vmatmul.bf16.vlgmr.msrb.gmra.mxu3 %v5751_v30 }
 0x12c   : > { %2946 = vmatpush.bf16.msra.mxu2 %v3945_v1  ;;  %2959 = vmatpush.bf16.msra.mxu3 %v4105_v3  ;;  %v3505_v1 = vor.u32 %v4789_v52, %v3504_v51  ;;  %v3665_v3 = vor.u32 %v4829_v58, %v3664_v55  ;;  %v4724_v51 = vld [vmem:[%s5509_s12 + $0x9b8] sm:$0xf]  ;;  %v5094_v52 = vld [vmem:[%s5509_s12 + $0x9c8] sm:$0xf0]  ;;  %v4204_v55 = vld [vmem:[%s5509_s12 + $0x5a8] sm:$0xf] }
 0x12d   : > { %v4964_v58 = vld [vmem:[%s5509_s12 + $0x5b8] sm:$0xf0]  ;;  %v4725_v60 = vor.u32 %v5094_v52, %v4724_v51 }
 0x12e   : > { %2922 = vmatpush.bf16.msra.mxu0 %v3585_v9  ;;  %2935 = vmatpush.bf16.msra.mxu1 %v3745_v10  ;;  %v4264_v9 = vld [vmem:[%s5509_s12 + $0x620] sm:$0xf]  ;;  %v4979_v10 = vld [vmem:[%s5509_s12 + $0x630] sm:$0xf0]  ;;  %v4205_v5 = vor.u32 %v4964_v58, %v4204_v55  ;;  %v4984_v52 = vld [vmem:[%s5509_s12 + $0x658] sm:$0xf0] }
 0x12f   : > { %v4265_v18 = vor.u32 %v4979_v10, %v4264_v9  ;;  %v4705_v10 = vor.u32 %v5089_v37, %v4704_v4  ;;  %v4857_v55 = vld [vmem:[%s5509_s12 + $0x264] sm:$0xf]  ;;  %v3786_v58 = vld [vmem:[%s5509_s12 + $0x274] sm:$0xf0]  ;;  %v4812_v4 = vld [vmem:[%s5509_s12 + $0xfc] sm:$0xf] }
 0x130   : > { %2947 = vmatpush.bf16.msra.mxu2 %v3925_v13  ;;  %2960 = vmatpush.bf16.msra.mxu3 %v4085_v14  ;;  %v3824_v13 = vld [vmem:[%s5509_s12 + $0x2b0] sm:$0xf]  ;;  %v4869_v14 = vld [vmem:[%s5509_s12 + $0x2c0] sm:$0xf0] }
 0x131   : > { %v3825_v25 = vor.u32 %v4869_v14, %v3824_v13  ;;  %v4524_v13 = vld [vmem:[%s5509_s12 + $0x828] sm:$0xf]  ;;  %v5044_v14 = vld [vmem:[%s5509_s12 + $0x838] sm:$0xf0] }
 0x132   : > { %2923 = vmatpush.bf16.msra.mxu0 %v3565_v20  ;;  %2936 = vmatpush.bf16.msra.mxu1 %v3725_v23  ;;  %v4244_v20 = vld [vmem:[%s5509_s12 + $0x5f8] sm:$0xf]  ;;  %v4974_v23 = vld [vmem:[%s5509_s12 + $0x608] sm:$0xf0] }
 0x133   : > { %v4245_v39 = vor.u32 %v4974_v23, %v4244_v20  ;;  %v4525_v20 = vor.u32 %v5044_v14, %v4524_v13  ;;  %v4604_v13 = vld [vmem:[%s5509_s12 + $0x8c8] sm:$0xf]  ;;  %v5064_v14 = vld [vmem:[%s5509_s12 + $0x8d8] sm:$0xf0] }
 0x134   : > { %2948 = vmatpush.bf16.msra.mxu2 %v3905_v26  ;;  %2961 = vmatpush.bf16.msra.mxu3 %v4065_v27  ;;  %v3985_v26 = vor.u32 %v4909_v15, %v3984_v2  ;;  %v5014_v27 = vld [vmem:[%s5509_s12 + $0x748] sm:$0xf0]  ;;  %v4684_v2 = vld [vmem:[%s5509_s12 + $0x968] sm:$0xf]  ;;  %v5084_v15 = vld [vmem:[%s5509_s12 + $0x978] sm:$0xf0] }
 0x135   : > { %v4405_v40 = vor.u32 %v5014_v27, %v4404_v24  ;;  %v4685_v23 = vor.u32 %v5084_v15, %v4684_v2  ;;  %v4324_v24 = vld [vmem:[%s5509_s12 + $0x698] sm:$0xf]  ;;  %v5039_v27 = vld [vmem:[%s5509_s12 + $0x810] sm:$0xf0]  ;;  %v4897_v2 = vld [vmem:[%s5509_s12 + $0x3a4] sm:$0xf] }
 0x136   : > { %2924 = vmatpush.bf16.msra.mxu0 %v3545_v36  ;;  %2937 = vmatpush.bf16.msra.mxu1 %v3705_v38  ;;  %v4744_v36 = vld [vmem:[%s5509_s12 + $0x9e0] sm:$0xf]  ;;  %v5099_v38 = vld [vmem:[%s5509_s12 + $0x9f0] sm:$0xf0]  ;;  %v3946_v15 = vld [vmem:[%s5509_s12 + $0x3b4] sm:$0xf0] }
 0x137   : > { %v4745_v46 = vor.u32 %v5099_v38, %v4744_v36 }
 0x138   : > { %2949 = vmatpush.bf16.msra.mxu2 %v3885_v41  ;;  %2962 = vmatpush.bf16.msra.mxu3 %v4045_v42  ;;  %v3805_v41 = vor.u32 %v4864_v31, %v3804_v28  ;;  %v3965_v42 = vor.u32 %v4904_v33, %v3964_v32  ;;  %v4664_v28 = vld [vmem:[%s5509_s12 + $0x940] sm:$0xf]  ;;  %v5079_v31 = vld [vmem:[%s5509_s12 + $0x950] sm:$0xf0] }
 0x139   : > { %v4665_v38 = vor.u32 %v5079_v31, %v4664_v28  ;;  %v3949_v28 = vor.u32 %v4897_v2, %v3946_v15  ;;  %v4832_v2 = vld [vmem:[%s5509_s12 + $0x19c] sm:$0xf]  ;;  %v3686_v15 = vld [vmem:[%s5509_s12 + $0x1ac] sm:$0xf0] }
 0x13a   : > { %2925 = vmatpush.bf16.msra.mxu0 %v3525_v49  ;;  %2938 = vmatpush.bf16.msra.mxu1 %v3685_v50  ;;  %v4564_v49 = vld [vmem:[%s5509_s12 + $0x878] sm:$0xf]  ;;  %v5054_v50 = vld [vmem:[%s5509_s12 + $0x888] sm:$0xf0] }
 0x13b   : > { %v4565_v59 = vor.u32 %v5054_v50, %v4564_v49  ;;  %v4284_v49 = vld [vmem:[%s5509_s12 + $0x648] sm:$0xf] }
 0x13c   : > { %2950 = vmatpush.bf16.msra.mxu2 %v3865_v53  ;;  %2963 = vmatpush.bf16.msra.mxu3 %v4025_v54  ;;  %v4225_v53 = vor.u32 %v4969_v44, %v4224_v43  ;;  %v4385_v54 = vor.u32 %v5009_v48, %v4384_v47  ;;  %v4644_v43 = vld [vmem:[%s5509_s12 + $0x918] sm:$0xf]  ;;  %v5074_v44 = vld [vmem:[%s5509_s12 + $0x928] sm:$0xf0]  ;;  %v4124_v47 = vld [vmem:[%s5509_s12 + $0x508] sm:$0xf] }
 0x13d   : > { %v4944_v48 = vld [vmem:[%s5509_s12 + $0x518] sm:$0xf0]  ;;  %v4645_v51 = vor.u32 %v5074_v44, %v4644_v43  ;;  %v4802_v43 = vld [vmem:[%s5509_s12 + $0xac] sm:$0xf]  ;;  %v3566_v44 = vld [vmem:[%s5509_s12 + $0xbc] sm:$0xf0] }
 0x13e   : > { %2926 = vmatpush.bf16.msra.mxu0 %v3505_v1  ;;  %2939 = vmatpush.bf16.msra.mxu1 %v3665_v3  ;;  %v4544_v1 = vld [vmem:[%s5509_s12 + $0x850] sm:$0xf]  ;;  %v5049_v3 = vld [vmem:[%s5509_s12 + $0x860] sm:$0xf0] }
 0x13f   : > { %v4545_v9 = vor.u32 %v5049_v3, %v4544_v1  ;;  %v4125_v1 = vor.u32 %v4944_v48, %v4124_v47  ;;  %v4285_v3 = vor.u32 %v4984_v52, %v4284_v49  ;;  %v4842_v48 = vld [vmem:[%s5509_s12 + $0x1ec] sm:$0xf]  ;;  %v3726_v49 = vld [vmem:[%s5509_s12 + $0x1fc] sm:$0xf0]  ;;  %v4927_v52 = vld [vmem:[%s5509_s12 + $0x494] sm:$0xf] }
 0x140   : > { %2951 = vmatpush.bf16.msra.mxu2 %v3845_v6  ;;  %2964 = vmatpush.bf16.msra.mxu3 %v4005_v7  ;;  %v4365_v6 = vor.u32 %v5004_v0, %v4364_v63  ;;  %v4184_v7 = vld [vmem:[%s5509_s12 + $0x580] sm:$0xf]  ;;  %v4624_v63 = vld [vmem:[%s5509_s12 + $0x8f0] sm:$0xf]  ;;  %v5069_v0 = vld [vmem:[%s5509_s12 + $0x900] sm:$0xf0] }
 0x142   : > { %2927 = vmatpush.bf16.msra.mxu0 %v3485_v16  ;;  %2940 = vmatpush.bf16.msra.mxu1 %v3645_v17  ;;  %v4185_v16 = vor.u32 %v4959_v8, %v4184_v7  ;;  %v4345_v17 = vor.u32 %v4999_v12, %v4344_v11  ;;  %v4852_v7 = vld [vmem:[%s5509_s12 + $0x23c] sm:$0xf]  ;;  %v3766_v8 = vld [vmem:[%s5509_s12 + $0x24c] sm:$0xf0]  ;;  %v4444_v11 = vld [vmem:[%s5509_s12 + $0x788] sm:$0xf] }
 0x143   : > { %v5024_v12 = vld [vmem:[%s5509_s12 + $0x798] sm:$0xf0] }
 0x144   : > { %2952 = vmatpush.bf16.msra.mxu2 %v3825_v25  ;;  %2965 = vmatpush.bf16.msra.mxu3 %v3985_v26  ;;  %v4994_v25 = vld [vmem:[%s5509_s12 + $0x6a8] sm:$0xf0]  ;;  %v4504_v26 = vld [vmem:[%s5509_s12 + $0x800] sm:$0xf] }
 0x145   : > { %2928 = vmatmul.bf16.vlgmr.msra.gmra.mxu0 %v5684_v56  ;;  %2941 = vmatmul.bf16.vlgmr.msra.gmra.mxu1 %v5686_v57  ;;  %v4325_v33 = vor.u32 %v4994_v25, %v4324_v24  ;;  %v4505_v36 = vor.u32 %v5039_v27, %v4504_v26  ;;  %v4605_v24 = vor.u32 %v5064_v14, %v4604_v13  ;;  %v4807_v25 = vld [vmem:[%s5509_s12 + $0xd4] sm:$0xf]  ;;  %v3586_v26 = vld [vmem:[%s5509_s12 + $0xe4] sm:$0xf0] }
 0x146   : > { %2972 = vmatpush.bf16.msrb.mxu0 %v4265_v18  ;;  %2985 = vmatpush.bf16.msrb.mxu1 %v4425_v19  ;;  %v4164_v18 = vld [vmem:[%s5509_s12 + $0x558] sm:$0xf]  ;;  %v4954_v19 = vld [vmem:[%s5509_s12 + $0x568] sm:$0xf0]  ;;  %v4847_v27 = vld [vmem:[%s5509_s12 + $0x214] sm:$0xf] }
 0x147   : > { %v4165_v32 = vor.u32 %v4954_v19, %v4164_v18  ;;  %v5993_v18 = vld [vmem:[%s274_s7] sm:$0x1f] }
 0x148   : > { %2953 = vmatpush.bf16.msra.mxu2 %v3805_v41  ;;  %2966 = vmatpush.bf16.msra.mxu3 %v3965_v42  ;;  %v4484_v41 = vld [vmem:[%s5509_s12 + $0x7d8] sm:$0xf]  ;;  %v5034_v42 = vld [vmem:[%s5509_s12 + $0x7e8] sm:$0xf0] }
 0x149   : > { %v4485_v50 = vor.u32 %v5034_v42, %v4484_v41 }
 0x14a   : > { %2973 = vmatpush.bf16.msrb.mxu0 %v4245_v39  ;;  %2986 = vmatpush.bf16.msrb.mxu1 %v4405_v40  ;;  %v4304_v39 = vld [vmem:[%s5509_s12 + $0x670] sm:$0xf]  ;;  %v4989_v40 = vld [vmem:[%s5509_s12 + $0x680] sm:$0xf0] }
 0x14b   : > { %2954 = vmatmul.bf16.vlgmr.msra.gmra.mxu2 %v5704_v21  ;;  %2967 = vmatmul.bf16.vlgmr.msra.gmra.mxu3 %v5706_v22 }
 0x14c   : > { %2998 = vmatpush.bf16.msrb.mxu2 %v4585_v45  ;;  %3011 = vmatpush.bf16.msrb.mxu3 %v4745_v46  ;;  %v4145_v45 = vor.u32 %v4949_v35, %v4144_v34  ;;  %v4305_v46 = vor.u32 %v4989_v40, %v4304_v39  ;;  %v4892_v34 = vld [vmem:[%s5509_s12 + $0x37c] sm:$0xf]  ;;  %v3926_v35 = vld [vmem:[%s5509_s12 + $0x38c] sm:$0xf0]  ;;  %v3589_v39 = vor.u32 %v4807_v25, %v3586_v26  ;;  %v4787_v25 = vld [vmem:[%s5509_s12 + $0x34] sm:$0xf] }
 0x14d   : > { %v3506_v26 = vld [vmem:[%s5509_s12 + $0x44] sm:$0xf0] }
 0x14e   : > { %2974 = vmatpush.bf16.msrb.mxu0 %v4225_v53  ;;  %2987 = vmatpush.bf16.msrb.mxu1 %v4385_v54  ;;  %v4817_v53 = vld [vmem:[%s5509_s12 + $0x124] sm:$0xf]  ;;  %v3626_v54 = vld [vmem:[%s5509_s12 + $0x134] sm:$0xf0] }
 0x14f   : > { %v3629_v37 = vor.u32 %v4817_v53, %v3626_v54  ;;  %v4066_v53 = vld [vmem:[%s5509_s12 + $0x4a4] sm:$0xf0] }
 0x150   : > { %2999 = vmatpush.bf16.msrb.mxu2 %v4565_v59  ;;  %3012 = vmatpush.bf16.msrb.mxu3 %v4725_v60  ;;  %v4464_v59 = vld [vmem:[%s5509_s12 + $0x7b0] sm:$0xf]  ;;  %v5029_v60 = vld [vmem:[%s5509_s12 + $0x7c0] sm:$0xf0] }
 0x152   : > { %2975 = vmatpush.bf16.msrb.mxu0 %v4205_v5  ;;  %2988 = vmatpush.bf16.msrb.mxu1 %v4365_v6  ;;  %v3789_v5 = vor.u32 %v4857_v55, %v3786_v58  ;;  %v3606_v6 = vld [vmem:[%s5509_s12 + $0x10c] sm:$0xf0]  ;;  %v3569_v55 = vor.u32 %v4802_v43, %v3566_v44  ;;  %v3729_v58 = vor.u32 %v4842_v48, %v3726_v49  ;;  %v4782_v44 = vld [vmem:[%s5509_s12 + $0xc] sm:$0xf] }
 0x153   : > { %v3609_v19 = vor.u32 %v4812_v4, %v3606_v6  ;;  %v4882_v4 = vld [vmem:[%s5509_s12 + $0x32c] sm:$0xf]  ;;  %v4046_v6 = vld [vmem:[%s5509_s12 + $0x47c] sm:$0xf0] }
 0x154   : > { %3000 = vmatpush.bf16.msrb.mxu2 %v4545_v9  ;;  %3013 = vmatpush.bf16.msrb.mxu3 %v4705_v10  ;;  %v4465_v9 = vor.u32 %v5029_v60, %v4464_v59  ;;  %v4625_v10 = vor.u32 %v5069_v0, %v4624_v63  ;;  %v4797_v59 = vld [vmem:[%s5509_s12 + $0x84] sm:$0xf]  ;;  %v3546_v60 = vld [vmem:[%s5509_s12 + $0x94] sm:$0xf0]  ;;  %v4069_v0 = vor.u32 %v4927_v52, %v4066_v53 }
 0x155   : > { %v4977_v52 = vld [vmem:[%s5509_s12 + $0x624] sm:$0xf]  ;;  %v4266_v53 = vld [vmem:[%s5509_s12 + $0x634] sm:$0xf0] }
 0x156   : > { %2976 = vmatpush.bf16.msrb.mxu0 %v4185_v16  ;;  %2989 = vmatpush.bf16.msrb.mxu1 %v4345_v17  ;;  %v4937_v16 = vld [vmem:[%s5509_s12 + $0x4e4] sm:$0xf]  ;;  %v4106_v17 = vld [vmem:[%s5509_s12 + $0x4f4] sm:$0xf0] }
 0x157   : > { %v4109_v31 = vor.u32 %v4937_v16, %v4106_v17  ;;  %v4877_v16 = vld [vmem:[%s5509_s12 + $0x304] sm:$0xf]  ;;  %v3866_v17 = vld [vmem:[%s5509_s12 + $0x314] sm:$0xf0] }
 0x158   : > { %3001 = vmatpush.bf16.msrb.mxu2 %v4525_v20  ;;  %3014 = vmatpush.bf16.msrb.mxu3 %v4685_v23  ;;  %v3769_v20 = vor.u32 %v4852_v7, %v3766_v8  ;;  %v4445_v23 = vor.u32 %v5024_v12, %v4444_v11  ;;  %v3549_v7 = vor.u32 %v4797_v59, %v3546_v60  ;;  %v4792_v11 = vld [vmem:[%s5509_s12 + $0x5c] sm:$0xf]  ;;  %v3526_v12 = vld [vmem:[%s5509_s12 + $0x6c] sm:$0xf0]  ;;  %v4867_v59 = vld [vmem:[%s5509_s12 + $0x2b4] sm:$0xf] }
 0x159   : > { %v3826_v60 = vld [vmem:[%s5509_s12 + $0x2c4] sm:$0xf0] }
 0x15a   : > { %2977 = vmatpush.bf16.msrb.mxu0 %v4165_v32  ;;  %2990 = vmatpush.bf16.msrb.mxu1 %v4325_v33  ;;  %v3746_v32 = vld [vmem:[%s5509_s12 + $0x224] sm:$0xf0]  ;;  %v1038_v33 = vperm.slane %v5993_v18, 0 }
 0x15b   : > { %v3749_v40 = vor.u32 %v4847_v27, %v3746_v32 }
 0x15c   : > { %3002 = vmatpush.bf16.msrb.mxu2 %v4505_v36  ;;  %3015 = vmatpush.bf16.msrb.mxu3 %v4665_v38  ;;  %v4932_v36 = vld [vmem:[%s5509_s12 + $0x4bc] sm:$0xf]  ;;  %v4086_v38 = vld [vmem:[%s5509_s12 + $0x4cc] sm:$0xf0] }
 0x15d   : > { %v4089_v47 = vor.u32 %v4932_v36, %v4086_v38  ;;  %v3846_v38 = vld [vmem:[%s5509_s12 + $0x2ec] sm:$0xf0] }
 0x15e   : > { %2978 = vmatpush.bf16.msrb.mxu0 %v4145_v45  ;;  %2991 = vmatpush.bf16.msrb.mxu1 %v4305_v46  ;;  %v3929_v46 = vor.u32 %v4892_v34, %v3926_v35  ;;  %v3666_v34 = vld [vmem:[%s5509_s12 + $0x184] sm:$0xf0]  ;;  %v4872_v35 = vld [vmem:[%s5509_s12 + $0x2dc] sm:$0xf] }
 0x15f   : > { %v3849_v49 = vor.u32 %v4872_v35, %v3846_v38  ;;  %v4386_v38 = vld [vmem:[%s5509_s12 + $0x724] sm:$0xf0] }
 0x160   : > { %3003 = vmatpush.bf16.msrb.mxu2 %v4485_v50  ;;  %3016 = vmatpush.bf16.msrb.mxu3 %v4645_v51  ;;  %v2721_v41 = vpop.f32.mrf.mxu0  ;;  %v2734_v42 = vpop.f32.mrf.mxu1  ;;  %v4887_v50 = vld [vmem:[%s5509_s12 + $0x354] sm:$0xf]  ;;  %v3906_v51 = vld [vmem:[%s5509_s12 + $0x364] sm:$0xf0] }
 0x161   : > { %v2722_v45 = vadd.f32 %v2721_v41, %v1038_v33  ;;  %v3909_v63 = vor.u32 %v4887_v50, %v3906_v51  ;;  %v4827_v33 = vld [vmem:[%s5509_s12 + $0x174] sm:$0xf]  ;;  %v3646_v51 = vld [vmem:[%s5509_s12 + $0x15c] sm:$0xf0] }
 0x162   : > { %2979 = vmatpush.bf16.msrb.mxu0 %v4125_v1  ;;  %2992 = vmatpush.bf16.msrb.mxu1 %v4285_v3  ;;  %v4837_v1 = vld [vmem:[%s5509_s12 + $0x1c4] sm:$0xf]  ;;  %v3706_v3 = vld [vmem:[%s5509_s12 + $0x1d4] sm:$0xf0]  ;;  %v3669_v43 = vor.u32 %v4827_v33, %v3666_v34  ;;  %v4226_v33 = vld [vmem:[%s5509_s12 + $0x5e4] sm:$0xf0] }
 0x163   : > { %v2735_v54 = vadd.f32 %v2734_v42, %v2722_v45  ;;  %v3709_v8 = vor.u32 %v4837_v1, %v3706_v3  ;;  %v3509_v42 = vor.u32 %v4787_v25, %v3506_v26  ;;  %v3486_v45 = vld [vmem:[%s5509_s12 + $0x1c] sm:$0xf0] }
 0x164   : > { %3004 = vmatpush.bf16.msrb.mxu2 %v4465_v9  ;;  %3017 = vmatpush.bf16.msrb.mxu3 %v4625_v10  ;;  %v3489_v3 = vor.u32 %v4782_v44, %v3486_v45 }
 0x165   : > { %2980 = vmatmul.bf16.vlgmr.msrb.gmra.mxu0 %v5730_v61  ;;  %2993 = vmatmul.bf16.vlgmr.msrb.gmra.mxu1 %v5732_v62 }
 0x166   : > { %3024 = vmatpush.bf16.msra.mxu0 %v3629_v37  ;;  %3037 = vmatpush.bf16.msra.mxu1 %v3789_v5  ;;  %v3886_v37 = vld [vmem:[%s5509_s12 + $0x33c] sm:$0xf0]  ;;  %v4922_v5 = vld [vmem:[%s5509_s12 + $0x46c] sm:$0xf] }
 0x167   : > { %v3889_v13 = vor.u32 %v4882_v4, %v3886_v37  ;;  %v4049_v14 = vor.u32 %v4922_v5, %v4046_v6  ;;  %v4269_v6 = vor.u32 %v4977_v52, %v4266_v53  ;;  %v5002_v53 = vld [vmem:[%s5509_s12 + $0x6ec] sm:$0xf] }
 0x168   : > { %3005 = vmatpush.bf16.msrb.mxu2 %v4445_v23  ;;  %3018 = vmatpush.bf16.msrb.mxu3 %v4605_v24  ;;  %v2723_v9 = vpop.f32.mrf.mxu0  ;;  %v2736_v10 = vpop.f32.mrf.mxu1  ;;  %v3529_v23 = vor.u32 %v4792_v11, %v3526_v12  ;;  %v3689_v24 = vor.u32 %v4832_v2, %v3686_v15  ;;  %v3829_v11 = vor.u32 %v4867_v59, %v3826_v60  ;;  %v3806_v2 = vld [vmem:[%s5509_s12 + $0x29c] sm:$0xf0]  ;;  %v4902_v15 = vld [vmem:[%s5509_s12 + $0x3cc] sm:$0xf]  ;;  %v4546_v59 = vld [vmem:[%s5509_s12 + $0x864] sm:$0xf0] }
 0x169   : > { %v4246_v9 = vld [vmem:[%s5509_s12 + $0x60c] sm:$0xf0]  ;;  %v5012_v10 = vld [vmem:[%s5509_s12 + $0x73c] sm:$0xf]  ;;  %v5087_v60 = vld [vmem:[%s5509_s12 + $0x994] sm:$0xf] }
 0x16a   : > { %3025 = vmatpush.bf16.msra.mxu0 %v3609_v19  ;;  %3038 = vmatpush.bf16.msra.mxu1 %v3769_v20  ;;  %v4917_v19 = vld [vmem:[%s5509_s12 + $0x444] sm:$0xf]  ;;  %v4026_v20 = vld [vmem:[%s5509_s12 + $0x454] sm:$0xf0] }
 0x16b   : > { %3006 = vmatmul.bf16.vlgmr.msrb.gmra.mxu2 %v5749_v29  ;;  %3019 = vmatmul.bf16.vlgmr.msrb.gmra.mxu3 %v5751_v30  ;;  %v4029_v32 = vor.u32 %v4917_v19, %v4026_v20  ;;  %v4586_v19 = vld [vmem:[%s5509_s12 + $0x8b4] sm:$0xf0]  ;;  %v5097_v20 = vld [vmem:[%s5509_s12 + $0x9e4] sm:$0xf] }
 0x16c   : > { %3050 = vmatpush.bf16.msra.mxu2 %v3949_v28  ;;  %3063 = vmatpush.bf16.msra.mxu3 %v4109_v31  ;;  %v3869_v31 = vor.u32 %v4877_v16, %v3866_v17  ;;  %v3966_v16 = vld [vmem:[%s5509_s12 + $0x3dc] sm:$0xf0]  ;;  %v5057_v17 = vld [vmem:[%s5509_s12 + $0x8a4] sm:$0xf] }
 0x16d   : > { %v4589_v34 = vor.u32 %v5057_v17, %v4586_v19 }
 0x16e   : > { %3026 = vmatpush.bf16.msra.mxu0 %v3589_v39  ;;  %3039 = vmatpush.bf16.msra.mxu1 %v3749_v40  ;;  %v2747_v27 = vpop.f32.mrf.mxu2  ;;  %v2760_v28 = vpop.f32.mrf.mxu3  ;;  %v4912_v39 = vld [vmem:[%s5509_s12 + $0x41c] sm:$0xf]  ;;  %v4006_v40 = vld [vmem:[%s5509_s12 + $0x42c] sm:$0xf0] }
 0x16f   : > { %v2748_v36 = vadd.f32 %v2747_v27, %v2735_v54  ;;  %v4009_v50 = vor.u32 %v4912_v39, %v4006_v40  ;;  %v5052_v39 = vld [vmem:[%s5509_s12 + $0x87c] sm:$0xf]  ;;  %v4566_v40 = vld [vmem:[%s5509_s12 + $0x88c] sm:$0xf0] }
 0x170   : > { %3051 = vmatpush.bf16.msra.mxu2 %v3929_v46  ;;  %3064 = vmatpush.bf16.msra.mxu3 %v4089_v47  ;;  %v4822_v46 = vld [vmem:[%s5509_s12 + $0x14c] sm:$0xf] }
 0x171   : > { %v2761_v41 = vadd.f32 %v2760_v28, %v2748_v36  ;;  %v3649_v4 = vor.u32 %v4822_v46, %v3646_v51  ;;  %v5007_v36 = vld [vmem:[%s5509_s12 + $0x714] sm:$0xf]  ;;  %v4569_v51 = vor.u32 %v5052_v39, %v4566_v40  ;;  %v4146_v40 = vld [vmem:[%s5509_s12 + $0x544] sm:$0xf0] }
 0x172   : > { %3027 = vmatpush.bf16.msra.mxu0 %v3569_v55  ;;  %3040 = vmatpush.bf16.msra.mxu1 %v3729_v58  ;;  %v2773_v47 = vpop.f32.mrf.mxu0  ;;  %v2786_v48 = vpop.f32.mrf.mxu1  ;;  %v5017_v55 = vld [vmem:[%s5509_s12 + $0x764] sm:$0xf]  ;;  %v4426_v58 = vld [vmem:[%s5509_s12 + $0x774] sm:$0xf0]  ;;  %v4947_v39 = vld [vmem:[%s5509_s12 + $0x534] sm:$0xf] }
 0x173   : > { %v2774_v54 = vadd.f32 %v2773_v47, %v2761_v41  ;;  %v5092_v41 = vld [vmem:[%s5509_s12 + $0x9bc] sm:$0xf]  ;;  %v4389_v47 = vor.u32 %v5007_v36, %v4386_v38 }
 0x174   : > { %3052 = vmatpush.bf16.msra.mxu2 %v3909_v63  ;;  %3065 = vmatpush.bf16.msra.mxu3 %v4069_v0  ;;  %v4907_v63 = vld [vmem:[%s5509_s12 + $0x3f4] sm:$0xf]  ;;  %v3986_v0 = vld [vmem:[%s5509_s12 + $0x404] sm:$0xf0] }
 0x175   : > { %v2787_v1 = vadd.f32 %v2786_v48, %v2774_v54  ;;  %v3989_v12 = vor.u32 %v4907_v63, %v3986_v0  ;;  %v1039_v48 = vperm.slane %v5993_v18, 1  ;;  %v4366_v54 = vld [vmem:[%s5509_s12 + $0x6fc] sm:$0xf0]  ;;  %v4706_v63 = vld [vmem:[%s5509_s12 + $0x9a4] sm:$0xf0] }
 0x176   : > { %3028 = vmatpush.bf16.msra.mxu0 %v3549_v7  ;;  %3041 = vmatpush.bf16.msra.mxu1 %v3709_v8  ;;  %v2749_v37 = vpop.f32.mrf.mxu2  ;;  %v2762_v5 = vpop.f32.mrf.mxu3  ;;  %v4429_v7 = vor.u32 %v5017_v55, %v4426_v58  ;;  %v4972_v8 = vld [vmem:[%s5509_s12 + $0x5fc] sm:$0xf]  ;;  %v5047_v55 = vld [vmem:[%s5509_s12 + $0x854] sm:$0xf] }
 0x177   : > { %v4249_v26 = vor.u32 %v4972_v8, %v4246_v9  ;;  %v4369_v37 = vor.u32 %v5002_v53, %v4366_v54  ;;  %v4957_v5 = vld [vmem:[%s5509_s12 + $0x584] sm:$0xf]  ;;  %v4709_v8 = vor.u32 %v5087_v60, %v4706_v63  ;;  %v4942_v53 = vld [vmem:[%s5509_s12 + $0x50c] sm:$0xf]  ;;  %v4126_v54 = vld [vmem:[%s5509_s12 + $0x51c] sm:$0xf0] }
 0x178   : > { %3053 = vmatpush.bf16.msra.mxu2 %v3889_v13  ;;  %3066 = vmatpush.bf16.msra.mxu3 %v4049_v14  ;;  %v4406_v13 = vld [vmem:[%s5509_s12 + $0x74c] sm:$0xf0]  ;;  %v4862_v14 = vld [vmem:[%s5509_s12 + $0x28c] sm:$0xf]  ;;  %v4997_v9 = vld [vmem:[%s5509_s12 + $0x6c4] sm:$0xf] }
 0x179   : > { %v4409_v27 = vor.u32 %v5012_v10, %v4406_v13  ;;  %v3809_v28 = vor.u32 %v4862_v14, %v3806_v2  ;;  %v4346_v10 = vld [vmem:[%s5509_s12 + $0x6d4] sm:$0xf0]  ;;  %v4526_v13 = vld [vmem:[%s5509_s12 + $0x83c] sm:$0xf0]  ;;  %v5082_v14 = vld [vmem:[%s5509_s12 + $0x96c] sm:$0xf] }
 0x17a   : > { %3029 = vmatpush.bf16.msra.mxu0 %v3529_v23  ;;  %3042 = vmatpush.bf16.msra.mxu1 %v3689_v24  ;;  %v4746_v23 = vld [vmem:[%s5509_s12 + $0x9f4] sm:$0xf0]  ;;  %v2775_v24 = vpop.f32.mrf.mxu0  ;;  %v2788_v25 = vpop.f32.mrf.mxu1  ;;  %v4686_v2 = vld [vmem:[%s5509_s12 + $0x97c] sm:$0xf0]  ;;  %v4349_v19 = vor.u32 %v4997_v9, %v4346_v10  ;;  %v4626_v9 = vld [vmem:[%s5509_s12 + $0x904] sm:$0xf0]  ;;  %v4129_v10 = vor.u32 %v4942_v53, %v4126_v54 }
 0x17b   : > { %v4749_v35 = vor.u32 %v5097_v20, %v4746_v23  ;;  %v4952_v20 = vld [vmem:[%s5509_s12 + $0x55c] sm:$0xf]  ;;  %v4166_v23 = vld [vmem:[%s5509_s12 + $0x56c] sm:$0xf0]  ;;  %v4689_v25 = vor.u32 %v5082_v14, %v4686_v2  ;;  %v3612_v14 = vld [vmem:[%s5509_s12 + $0x100] sm:$0xf] }
 0x17c   : > { %3054 = vmatpush.bf16.msra.mxu2 %v3869_v31  ;;  %3067 = vmatpush.bf16.msra.mxu3 %v4029_v32  ;;  %v3969_v31 = vor.u32 %v4902_v15, %v3966_v16  ;;  %v4967_v32 = vld [vmem:[%s5509_s12 + $0x5d4] sm:$0xf]  ;;  %v4169_v36 = vor.u32 %v4952_v20, %v4166_v23  ;;  %v5022_v20 = vld [vmem:[%s5509_s12 + $0x78c] sm:$0xf]  ;;  %v4446_v23 = vld [vmem:[%s5509_s12 + $0x79c] sm:$0xf0] }
 0x17d   : > { %v4229_v46 = vor.u32 %v4967_v32, %v4226_v33  ;;  %v5077_v32 = vld [vmem:[%s5509_s12 + $0x944] sm:$0xf]  ;;  %v4666_v33 = vld [vmem:[%s5509_s12 + $0x954] sm:$0xf0]  ;;  %v4815_v2 = vld [vmem:[%s5509_s12 + $0x110] sm:$0xf0] }
 0x17e   : > { %3030 = vmatpush.bf16.msra.mxu0 %v3509_v42  ;;  %3043 = vmatpush.bf16.msra.mxu1 %v3669_v43  ;;  %v4726_v42 = vld [vmem:[%s5509_s12 + $0x9cc] sm:$0xf0]  ;;  %v2799_v43 = vpop.f32.mrf.mxu2  ;;  %v2812_v44 = vpop.f32.mrf.mxu3 }
 0x17f   : > { %v2800_v45 = vadd.f32 %v2799_v43, %v2787_v1  ;;  %v4729_v52 = vor.u32 %v5092_v41, %v4726_v42  ;;  %v4669_v42 = vor.u32 %v5077_v32, %v4666_v33  ;;  %v4987_v43 = vld [vmem:[%s5509_s12 + $0x674] sm:$0xf]  ;;  %v4112_v32 = vld [vmem:[%s5509_s12 + $0x4e8] sm:$0xf]  ;;  %v4940_v33 = vld [vmem:[%s5509_s12 + $0x4f8] sm:$0xf0] }
 0x180   : > { %3055 = vmatpush.bf16.msra.mxu2 %v3849_v49  ;;  %3068 = vmatpush.bf16.msra.mxu3 %v4009_v50  ;;  %v4962_v49 = vld [vmem:[%s5509_s12 + $0x5ac] sm:$0xf]  ;;  %v4206_v50 = vld [vmem:[%s5509_s12 + $0x5bc] sm:$0xf0] }
 0x181   : > { %v6080_v58 = vadd.f32 %v2812_v44, %v2800_v45  ;;  %v4306_v44 = vld [vmem:[%s5509_s12 + $0x684] sm:$0xf0]  ;;  %v5032_v45 = vld [vmem:[%s5509_s12 + $0x7dc] sm:$0xf] }
 0x182   : > { %3031 = vmatpush.bf16.msra.mxu0 %v3489_v3  ;;  %3044 = vmatpush.bf16.msra.mxu1 %v3649_v4  ;;  %v2825_v0 = vpop.f32.mrf.mxu0  ;;  %v2838_v1 = vpop.f32.mrf.mxu1  ;;  %v4209_v4 = vor.u32 %v4962_v49, %v4206_v50 }
 0x183   : > { %v2826_v3 = vadd.f32 %v2825_v0, %v1039_v48  ;;  %v4646_v48 = vld [vmem:[%s5509_s12 + $0x92c] sm:$0xf0]  ;;  %v4286_v0 = vld [vmem:[%s5509_s12 + $0x65c] sm:$0xf0] }
 0x184   : > { %3056 = vmatpush.bf16.msra.mxu2 %v3829_v11  ;;  %3069 = vmatpush.bf16.msra.mxu3 %v3989_v12  ;;  %v5042_v11 = vld [vmem:[%s5509_s12 + $0x82c] sm:$0xf] }
 0x185   : > { %3032 = vmatmul.bf16.vlgmr.msra.gmra.mxu0 %v5684_v56  ;;  %3045 = vmatmul.bf16.vlgmr.msra.gmra.mxu1 %v5686_v57  ;;  %v2839_v12 = vadd.f32 %v2838_v1, %v2826_v3  ;;  %v4529_v24 = vor.u32 %v5042_v11, %v4526_v13  ;;  %v3632_v1 = vld [vmem:[%s5509_s12 + $0x128] sm:$0xf]  ;;  %v4820_v3 = vld [vmem:[%s5509_s12 + $0x138] sm:$0xf0] }
 0x186   : > { %3076 = vmatpush.bf16.msrb.mxu0 %v4269_v6  ;;  %3089 = vmatpush.bf16.msrb.mxu1 %v4429_v7  ;;  %v4186_v6 = vld [vmem:[%s5509_s12 + $0x594] sm:$0xf0]  ;;  %v4549_v7 = vor.u32 %v5047_v55, %v4546_v59  ;;  %v2801_v15 = vpop.f32.mrf.mxu2  ;;  %v2814_v16 = vpop.f32.mrf.mxu3  ;;  %v4982_v55 = vld [vmem:[%s5509_s12 + $0x64c] sm:$0xf] }
 0x187   : > { %v4189_v17 = vor.u32 %v4957_v5, %v4186_v6  ;;  %v5027_v5 = vld [vmem:[%s5509_s12 + $0x7b4] sm:$0xf]  ;;  %v4289_v11 = vor.u32 %v4982_v55, %v4286_v0  ;;  %v3772_v15 = vld [vmem:[%s5509_s12 + $0x240] sm:$0xf]  ;;  %v3732_v55 = vld [vmem:[%s5509_s12 + $0x1f0] sm:$0xf] }
 0x188   : > { %3057 = vmatpush.bf16.msra.mxu2 %v3809_v28  ;;  %3070 = vmatpush.bf16.msra.mxu3 %v3969_v31  ;;  %v5037_v28 = vld [vmem:[%s5509_s12 + $0x804] sm:$0xf]  ;;  %v4506_v31 = vld [vmem:[%s5509_s12 + $0x814] sm:$0xf0] }
 0x189   : > { %v4509_v41 = vor.u32 %v5037_v28, %v4506_v31  ;;  %v4900_v31 = vld [vmem:[%s5509_s12 + $0x3b8] sm:$0xf0] }
 0x18a   : > { %3077 = vmatpush.bf16.msrb.mxu0 %v4249_v26  ;;  %3090 = vmatpush.bf16.msrb.mxu1 %v4409_v27  ;;  %v4992_v26 = vld [vmem:[%s5509_s12 + $0x69c] sm:$0xf]  ;;  %v4326_v27 = vld [vmem:[%s5509_s12 + $0x6ac] sm:$0xf0] }
 0x18b   : > { %3058 = vmatmul.bf16.vlgmr.msra.gmra.mxu2 %v5704_v21  ;;  %3071 = vmatmul.bf16.vlgmr.msra.gmra.mxu3 %v5706_v22  ;;  %v4329_v38 = vor.u32 %v4992_v26, %v4326_v27  ;;  %v3952_v26 = vld [vmem:[%s5509_s12 + $0x3a8] sm:$0xf] }
 0x18c   : > { %3102 = vmatpush.bf16.msrb.mxu2 %v4589_v34  ;;  %3115 = vmatpush.bf16.msrb.mxu3 %v4749_v35  ;;  %v2827_v34 = vpop.f32.mrf.mxu0  ;;  %v2840_v35 = vpop.f32.mrf.mxu1 }
 0x18d   : > { %v3613_v34 = vor.u32 %v4815_v2, %v3612_v14  ;;  %v4840_v14 = vld [vmem:[%s5509_s12 + $0x1d8] sm:$0xf0]  ;;  %v4885_v2 = vld [vmem:[%s5509_s12 + $0x340] sm:$0xf0] }
 0x18e   : > { %3078 = vmatpush.bf16.msrb.mxu0 %v4229_v46  ;;  %3091 = vmatpush.bf16.msrb.mxu1 %v4389_v47  ;;  %v4486_v46 = vld [vmem:[%s5509_s12 + $0x7ec] sm:$0xf0]  ;;  %v5072_v47 = vld [vmem:[%s5509_s12 + $0x91c] sm:$0xf]  ;;  %v2851_v49 = vpop.f32.mrf.mxu2  ;;  %v2864_v50 = vpop.f32.mrf.mxu3 }
 0x18f   : > { %v2852_v59 = vadd.f32 %v2851_v49, %v2839_v12  ;;  %v4489_v60 = vor.u32 %v5032_v45, %v4486_v46  ;;  %v4649_v63 = vor.u32 %v5072_v47, %v4646_v48  ;;  %v3633_v12 = vor.u32 %v4820_v3, %v3632_v1  ;;  %v3932_v45 = vld [vmem:[%s5509_s12 + $0x380] sm:$0xf]  ;;  %v4895_v46 = vld [vmem:[%s5509_s12 + $0x390] sm:$0xf0]  ;;  %v4890_v1 = vld [vmem:[%s5509_s12 + $0x368] sm:$0xf0] }
 0x190   : > { %3103 = vmatpush.bf16.msrb.mxu2 %v4569_v51  ;;  %3116 = vmatpush.bf16.msrb.mxu3 %v4729_v52  ;;  %v4149_v51 = vor.u32 %v4947_v39, %v4146_v40  ;;  %v4309_v52 = vor.u32 %v4987_v43, %v4306_v44  ;;  %v3592_v39 = vld [vmem:[%s5509_s12 + $0xd8] sm:$0xf]  ;;  %v4810_v40 = vld [vmem:[%s5509_s12 + $0xe8] sm:$0xf0]  ;;  %v4092_v47 = vld [vmem:[%s5509_s12 + $0x4c0] sm:$0xf]  ;;  %v3933_v53 = vor.u32 %v4895_v46, %v3932_v45 }
 0x191   : > { %v6120_v6 = vadd.f32 %v2864_v50, %v2852_v59  ;;  %v3752_v43 = vld [vmem:[%s5509_s12 + $0x218] sm:$0xf]  ;;  %v4850_v44 = vld [vmem:[%s5509_s12 + $0x228] sm:$0xf0]  ;;  %v4935_v48 = vld [vmem:[%s5509_s12 + $0x4d0] sm:$0xf0]  ;;  %v3593_v49 = vor.u32 %v4810_v40, %v3592_v39 }
 0x192   : > { %3079 = vmatpush.bf16.msrb.mxu0 %v4209_v4  ;;  %3092 = vmatpush.bf16.msrb.mxu1 %v4369_v37  ;;  %v3792_v4 = vld [vmem:[%s5509_s12 + $0x268] sm:$0xf]  ;;  %v4860_v37 = vld [vmem:[%s5509_s12 + $0x278] sm:$0xf0]  ;;  %v3753_v50 = vor.u32 %v4850_v44, %v3752_v43  ;;  %v4093_v54 = vor.u32 %v4935_v48, %v4092_v47  ;;  %v4845_v59 = vld [vmem:[%s5509_s12 + $0x200] sm:$0xf0] }
 0x193   : > { %v3793_v13 = vor.u32 %v4860_v37, %v3792_v4  ;;  %v4072_v3 = vld [vmem:[%s5509_s12 + $0x498] sm:$0xf]  ;;  %v4930_v4 = vld [vmem:[%s5509_s12 + $0x4a8] sm:$0xf0]  ;;  %v3852_v45 = vld [vmem:[%s5509_s12 + $0x2e0] sm:$0xf] }
 0x194   : > { %3104 = vmatpush.bf16.msrb.mxu2 %v4549_v7  ;;  %3117 = vmatpush.bf16.msrb.mxu3 %v4709_v8  ;;  %v4466_v7 = vld [vmem:[%s5509_s12 + $0x7c4] sm:$0xf0]  ;;  %v5067_v8 = vld [vmem:[%s5509_s12 + $0x8f4] sm:$0xf]  ;;  %v3512_v39 = vld [vmem:[%s5509_s12 + $0x38] sm:$0xf] }
 0x195   : > { %v4469_v16 = vor.u32 %v5027_v5, %v4466_v7  ;;  %v3733_v7 = vor.u32 %v4845_v59, %v3732_v55  ;;  %v4790_v40 = vld [vmem:[%s5509_s12 + $0x48] sm:$0xf0]  ;;  %v3672_v43 = vld [vmem:[%s5509_s12 + $0x178] sm:$0xf]  ;;  %v4875_v48 = vld [vmem:[%s5509_s12 + $0x2f0] sm:$0xf0] }
 0x196   : > { %3080 = vmatpush.bf16.msrb.mxu0 %v4189_v17  ;;  %3093 = vmatpush.bf16.msrb.mxu1 %v4349_v19  ;;  %v4629_v17 = vor.u32 %v5067_v8, %v4626_v9  ;;  %v4855_v19 = vld [vmem:[%s5509_s12 + $0x250] sm:$0xf0]  ;;  %v2853_v27 = vpop.f32.mrf.mxu2  ;;  %v2866_v28 = vpop.f32.mrf.mxu3  ;;  %v3552_v8 = vld [vmem:[%s5509_s12 + $0x88] sm:$0xf]  ;;  %v4800_v9 = vld [vmem:[%s5509_s12 + $0x98] sm:$0xf0] }
 0x197   : > { %v3773_v35 = vor.u32 %v4855_v19, %v3772_v15  ;;  %v4052_v15 = vld [vmem:[%s5509_s12 + $0x470] sm:$0xf]  ;;  %v4835_v27 = vld [vmem:[%s5509_s12 + $0x1b0] sm:$0xf0]  ;;  %v3872_v28 = vld [vmem:[%s5509_s12 + $0x308] sm:$0xf] }
 0x198   : > { %3105 = vmatpush.bf16.msrb.mxu2 %v4529_v24  ;;  %3118 = vmatpush.bf16.msrb.mxu3 %v4689_v25  ;;  %v5062_v24 = vld [vmem:[%s5509_s12 + $0x8cc] sm:$0xf]  ;;  %v4606_v25 = vld [vmem:[%s5509_s12 + $0x8dc] sm:$0xf0]  ;;  %v4785_v55 = vld [vmem:[%s5509_s12 + $0x20] sm:$0xf0] }
 0x199   : > { %v4830_v44 = vld [vmem:[%s5509_s12 + $0x188] sm:$0xf0]  ;;  %v3652_v59 = vld [vmem:[%s5509_s12 + $0x150] sm:$0xf] }
 0x19a   : > { %3081 = vmatpush.bf16.msrb.mxu0 %v4169_v36  ;;  %3094 = vmatpush.bf16.msrb.mxu1 %v4329_v38  ;;  %v4449_v36 = vor.u32 %v5022_v20, %v4446_v23  ;;  %v4609_v38 = vor.u32 %v5062_v24, %v4606_v25  ;;  %v3532_v20 = vld [vmem:[%s5509_s12 + $0x60] sm:$0xf]  ;;  %v4795_v23 = vld [vmem:[%s5509_s12 + $0x70] sm:$0xf0] }
 0x19c   : > { %3106 = vmatpush.bf16.msrb.mxu2 %v4509_v41  ;;  %3119 = vmatpush.bf16.msrb.mxu3 %v4669_v42  ;;  %v3953_v41 = vor.u32 %v4900_v31, %v3952_v26  ;;  %v4113_v42 = vor.u32 %v4940_v33, %v4112_v32  ;;  %v3692_v26 = vld [vmem:[%s5509_s12 + $0x1a0] sm:$0xf]  ;;  %v4880_v33 = vld [vmem:[%s5509_s12 + $0x318] sm:$0xf0] }
 0x19e   : > { %3082 = vmatpush.bf16.msrb.mxu0 %v4149_v51  ;;  %3095 = vmatpush.bf16.msrb.mxu1 %v4309_v52  ;;  %v3572_v51 = vld [vmem:[%s5509_s12 + $0xb0] sm:$0xf]  ;;  %v4805_v52 = vld [vmem:[%s5509_s12 + $0xc0] sm:$0xf0] }
 0x19f   : > { %v3573_v5 = vor.u32 %v4805_v52, %v3572_v51  ;;  %v3492_v52 = vld [vmem:[%s5509_s12 + $0x10] sm:$0xf] }
 0x1a0   : > { %3107 = vmatpush.bf16.msrb.mxu2 %v4489_v60  ;;  %3120 = vmatpush.bf16.msrb.mxu3 %v4649_v63  ;;  %v3912_v60 = vld [vmem:[%s5509_s12 + $0x358] sm:$0xf] }
 0x1a2   : > { %3083 = vmatpush.bf16.msrb.mxu0 %v4129_v10  ;;  %3096 = vmatpush.bf16.msrb.mxu1 %v4289_v11  ;;  %v2877_v63 = vpop.f32.mrf.mxu0  ;;  %v2890_v0 = vpop.f32.mrf.mxu1  ;;  %v3913_v11 = vor.u32 %v4890_v1, %v3912_v60  ;;  %v4825_v60 = vld [vmem:[%s5509_s12 + $0x160] sm:$0xf0] }
 0x1a3   : > { %v2878_v37 = vadd.f32 %v2877_v63, %v6120_v6  ;;  %v3892_v6 = vld [vmem:[%s5509_s12 + $0x330] sm:$0xf] }
 0x1a4   : > { %3108 = vmatpush.bf16.msrb.mxu2 %v4469_v16  ;;  %3121 = vmatpush.bf16.msrb.mxu3 %v4629_v17  ;;  %v4925_v16 = vld [vmem:[%s5509_s12 + $0x480] sm:$0xf0]  ;;  %v3553_v17 = vor.u32 %v4800_v9, %v3552_v8  ;;  %v3893_v24 = vor.u32 %v4885_v2, %v3892_v6  ;;  %v4870_v8 = vld [vmem:[%s5509_s12 + $0x2c8] sm:$0xf0]  ;;  %v3232_v6 = vmax.f32 %v6080_v58, 0.0 }
 0x1a5   : > { %3084 = vmatmul.bf16.vlgmr.msrb.gmra.mxu0 %v5730_v61  ;;  %3097 = vmatmul.bf16.vlgmr.msrb.gmra.mxu1 %v5732_v62  ;;  %v2891_v10 = vadd.f32 %v2890_v0, %v2878_v37  ;;  %v4053_v25 = vor.u32 %v4925_v16, %v4052_v15  ;;  %v3853_v0 = vor.u32 %v4875_v48, %v3852_v45  ;;  %v4432_v37 = vld [vmem:[%s5509_s12 + $0x768] sm:$0xf]  ;;  %v4865_v58 = vld [vmem:[%s5509_s12 + $0x2a0] sm:$0xf0]  ;;  %v4572_v48 = vld [vmem:[%s5509_s12 + $0x880] sm:$0xf] }
 0x1a6   : > { %3128 = vmatpush.bf16.msra.mxu0 %v3633_v12  ;;  %3141 = vmatpush.bf16.msra.mxu1 %v3793_v13  ;;  %v4073_v12 = vor.u32 %v4930_v4, %v4072_v3  ;;  %v3712_v13 = vld [vmem:[%s5509_s12 + $0x1c8] sm:$0xf]  ;;  %v4980_v4 = vld [vmem:[%s5509_s12 + $0x638] sm:$0xf0] }
 0x1a7   : > { %v3713_v19 = vor.u32 %v4840_v14, %v3712_v13  ;;  %v4272_v3 = vld [vmem:[%s5509_s12 + $0x628] sm:$0xf]  ;;  %v3653_v13 = vor.u32 %v4825_v60, %v3652_v59  ;;  %v4252_v14 = vld [vmem:[%s5509_s12 + $0x600] sm:$0xf]  ;;  %v4372_v60 = vld [vmem:[%s5509_s12 + $0x6f0] sm:$0xf] }
 0x1a8   : > { %3109 = vmatpush.bf16.msrb.mxu2 %v4449_v36  ;;  %3122 = vmatpush.bf16.msrb.mxu3 %v4609_v38  ;;  %v3533_v36 = vor.u32 %v4795_v23, %v3532_v20  ;;  %v3693_v38 = vor.u32 %v4835_v27, %v3692_v26  ;;  %v4273_v15 = vor.u32 %v4980_v4, %v4272_v3  ;;  %v5015_v26 = vld [vmem:[%s5509_s12 + $0x750] sm:$0xf0]  ;;  %v3812_v27 = vld [vmem:[%s5509_s12 + $0x290] sm:$0xf]  ;;  %v5050_v3 = vld [vmem:[%s5509_s12 + $0x868] sm:$0xf0] }
 0x1a9   : > { %v4712_v4 = vld [vmem:[%s5509_s12 + $0x998] sm:$0xf] }
 0x1aa   : > { %3129 = vmatpush.bf16.msra.mxu0 %v3613_v34  ;;  %3142 = vmatpush.bf16.msra.mxu1 %v3773_v35  ;;  %v2879_v31 = vpop.f32.mrf.mxu0  ;;  %v2892_v32 = vpop.f32.mrf.mxu1  ;;  %v4032_v34 = vld [vmem:[%s5509_s12 + $0x448] sm:$0xf]  ;;  %v4920_v35 = vld [vmem:[%s5509_s12 + $0x458] sm:$0xf0] }
 0x1ab   : > { %3110 = vmatmul.bf16.vlgmr.msrb.gmra.mxu2 %v5749_v29  ;;  %3123 = vmatmul.bf16.vlgmr.msrb.gmra.mxu3 %v5751_v30  ;;  %v3972_v31 = vld [vmem:[%s5509_s12 + $0x3d0] sm:$0xf]  ;;  %v4905_v32 = vld [vmem:[%s5509_s12 + $0x3e0] sm:$0xf0] }
 0x1ac   : > { %3154 = vmatpush.bf16.msra.mxu2 %v3953_v41  ;;  %3167 = vmatpush.bf16.msra.mxu3 %v4113_v42  ;;  %v3873_v41 = vor.u32 %v4880_v33, %v3872_v28  ;;  %v4033_v42 = vor.u32 %v4920_v35, %v4032_v34  ;;  %v4592_v33 = vld [vmem:[%s5509_s12 + $0x8a8] sm:$0xf]  ;;  %v5060_v34 = vld [vmem:[%s5509_s12 + $0x8b8] sm:$0xf0] }
 0x1ad   : > { %v4752_v35 = vld [vmem:[%s5509_s12 + $0x9e8] sm:$0xf] }
 0x1ae   : > { %3130 = vmatpush.bf16.msra.mxu0 %v3593_v49  ;;  %3143 = vmatpush.bf16.msra.mxu1 %v3753_v50  ;;  %v2903_v46 = vpop.f32.mrf.mxu2  ;;  %v2916_v47 = vpop.f32.mrf.mxu3  ;;  %v4012_v49 = vld [vmem:[%s5509_s12 + $0x420] sm:$0xf]  ;;  %v4915_v50 = vld [vmem:[%s5509_s12 + $0x430] sm:$0xf0] }
 0x1af   : > { %v2904_v51 = vadd.f32 %v2903_v46, %v2891_v10  ;;  %v4013_v1 = vor.u32 %v4915_v50, %v4012_v49  ;;  %v3992_v10 = vld [vmem:[%s5509_s12 + $0x3f8] sm:$0xf]  ;;  %v5055_v49 = vld [vmem:[%s5509_s12 + $0x890] sm:$0xf0]  ;;  %v4732_v50 = vld [vmem:[%s5509_s12 + $0x9c0] sm:$0xf] }
 0x1b0   : > { %3155 = vmatpush.bf16.msra.mxu2 %v3933_v53  ;;  %3168 = vmatpush.bf16.msra.mxu3 %v4093_v54  ;;  %v3513_v53 = vor.u32 %v4790_v40, %v3512_v39  ;;  %v3673_v54 = vor.u32 %v4830_v44, %v3672_v43  ;;  %v3813_v40 = vor.u32 %v4865_v58, %v3812_v27  ;;  %v4970_v43 = vld [vmem:[%s5509_s12 + $0x5e8] sm:$0xf0]  ;;  %v4392_v46 = vld [vmem:[%s5509_s12 + $0x718] sm:$0xf]  ;;  %v4512_v27 = vld [vmem:[%s5509_s12 + $0x808] sm:$0xf] }
 0x1b1   : > { %v2917_v63 = vadd.f32 %v2916_v47, %v2904_v51  ;;  %v4593_v44 = vor.u32 %v5060_v34, %v4592_v33  ;;  %v5010_v47 = vld [vmem:[%s5509_s12 + $0x728] sm:$0xf0]  ;;  %v5095_v51 = vld [vmem:[%s5509_s12 + $0x9d0] sm:$0xf0]  ;;  %v4672_v33 = vld [vmem:[%s5509_s12 + $0x948] sm:$0xf] }
 0x1b2   : > { %3131 = vmatpush.bf16.msra.mxu0 %v3573_v5  ;;  %3144 = vmatpush.bf16.msra.mxu1 %v3733_v7  ;;  %v5020_v5 = vld [vmem:[%s5509_s12 + $0x778] sm:$0xf0]  ;;  %v3832_v7 = vld [vmem:[%s5509_s12 + $0x2b8] sm:$0xf]  ;;  %v4733_v59 = vor.u32 %v5095_v51, %v4732_v50 }
 0x1b3   : > { %v3233_v9 = vmax.f32 %v2917_v63, 0.0  ;;  %v4433_v16 = vor.u32 %v5020_v5, %v4432_v37  ;;  %v3833_v20 = vor.u32 %v4870_v8, %v3832_v7  ;;  %v5005_v63 = vld [vmem:[%s5509_s12 + $0x700] sm:$0xf0]  ;;  %v5090_v37 = vld [vmem:[%s5509_s12 + $0x9a8] sm:$0xf0] }
 0x1b4   : > { %3156 = vmatpush.bf16.msra.mxu2 %v3913_v11  ;;  %3169 = vmatpush.bf16.msra.mxu3 %v4073_v12  ;;  %v4910_v11 = vld [vmem:[%s5509_s12 + $0x408] sm:$0xf0]  ;;  %v3493_v12 = vor.u32 %v4785_v55, %v3492_v52  ;;  %v1040_v52 = vperm.slane %v5993_v18, 2  ;;  %v4573_v55 = vor.u32 %v5055_v49, %v4572_v48  ;;  %v4373_v8 = vor.u32 %v5005_v63, %v4372_v60  ;;  %v5080_v34 = vld [vmem:[%s5509_s12 + $0x958] sm:$0xf0] }
 0x1b5   : > { %v3241_v2 = vrot.slane %v3233_v9, 6  ;;  %v3993_v23 = vor.u32 %v4910_v11, %v3992_v10  ;;  %v4192_v9 = vld [vmem:[%s5509_s12 + $0x588] sm:$0xf]  ;;  %v4960_v10 = vld [vmem:[%s5509_s12 + $0x598] sm:$0xf0] }
 0x1b6   : > { %3132 = vmatpush.bf16.msra.mxu0 %v3553_v17  ;;  %3145 = vmatpush.bf16.msra.mxu1 %v3713_v19  ;;  %v4975_v17 = vld [vmem:[%s5509_s12 + $0x610] sm:$0xf0]  ;;  %v4412_v19 = vld [vmem:[%s5509_s12 + $0x740] sm:$0xf]  ;;  %v4985_v60 = vld [vmem:[%s5509_s12 + $0x660] sm:$0xf0] }
 0x1b7   : > { %v6202_v28 = vsel %vm3244_vm2, %v3232_v6, %v3241_v2  ;;  %v4413_v39 = vor.u32 %v5015_v26, %v4412_v19  ;;  %v5045_v6 = vld [vmem:[%s5509_s12 + $0x840] sm:$0xf0]  ;;  %v4692_v2 = vld [vmem:[%s5509_s12 + $0x970] sm:$0xf]  ;;  %v4172_v19 = vld [vmem:[%s5509_s12 + $0x560] sm:$0xf] }
 0x1b8   : > { %3157 = vmatpush.bf16.msra.mxu2 %v3893_v24  ;;  %3170 = vmatpush.bf16.msra.mxu3 %v4053_v25  ;;  %v2905_v24 = vpop.f32.mrf.mxu2  ;;  %v2918_v25 = vpop.f32.mrf.mxu3  ;;  %v4995_v26 = vld [vmem:[%s5509_s12 + $0x6b0] sm:$0xf0]  ;;  %v4652_v48 = vld [vmem:[%s5509_s12 + $0x920] sm:$0xf]  ;;  %v4472_v63 = vld [vmem:[%s5509_s12 + $0x7b8] sm:$0xf] }
 0x1b9   : > { %v4332_v25 = vld [vmem:[%s5509_s12 + $0x6a0] sm:$0xf]  ;;  %v5075_v49 = vld [vmem:[%s5509_s12 + $0x930] sm:$0xf0] }
 0x1ba   : > { %3133 = vmatpush.bf16.msra.mxu0 %v3533_v36  ;;  %3146 = vmatpush.bf16.msra.mxu1 %v3693_v38  ;;  %v5100_v36 = vld [vmem:[%s5509_s12 + $0x9f8] sm:$0xf0]  ;;  %v4253_v38 = vor.u32 %v4975_v17, %v4252_v14  ;;  %v4532_v14 = vld [vmem:[%s5509_s12 + $0x830] sm:$0xf] }
 0x1bb   : > { %v4753_v45 = vor.u32 %v5100_v36, %v4752_v35  ;;  %v4333_v36 = vor.u32 %v4995_v26, %v4332_v25 }
 0x1bc   : > { %3158 = vmatpush.bf16.msra.mxu2 %v3873_v41  ;;  %3171 = vmatpush.bf16.msra.mxu3 %v4033_v42  ;;  %v3973_v41 = vor.u32 %v4905_v32, %v3972_v31  ;;  %v4232_v42 = vld [vmem:[%s5509_s12 + $0x5d8] sm:$0xf]  ;;  %v5040_v32 = vld [vmem:[%s5509_s12 + $0x818] sm:$0xf0] }
 0x1be   : > { %3134 = vmatpush.bf16.msra.mxu0 %v3513_v53  ;;  %3147 = vmatpush.bf16.msra.mxu1 %v3673_v54  ;;  %v4212_v53 = vld [vmem:[%s5509_s12 + $0x5b0] sm:$0xf]  ;;  %v4965_v54 = vld [vmem:[%s5509_s12 + $0x5c0] sm:$0xf0] }
 0x1bf   : > { %v4213_v7 = vor.u32 %v4965_v54, %v4212_v53 }
 0x1c0   : > { %3159 = vmatpush.bf16.msra.mxu2 %v3853_v0  ;;  %3172 = vmatpush.bf16.msra.mxu3 %v4013_v1  ;;  %v4552_v0 = vld [vmem:[%s5509_s12 + $0x858] sm:$0xf] }
 0x1c2   : > { %3135 = vmatpush.bf16.msra.mxu0 %v3493_v12  ;;  %3148 = vmatpush.bf16.msra.mxu1 %v3653_v13  ;;  %v2929_v1 = vpop.f32.mrf.mxu0  ;;  %v2942_v18 = vpop.f32.mrf.mxu1  ;;  %v4553_v12 = vor.u32 %v5050_v3, %v4552_v0  ;;  %v4352_v13 = vld [vmem:[%s5509_s12 + $0x6c8] sm:$0xf]  ;;  %v5030_v0 = vld [vmem:[%s5509_s12 + $0x7c8] sm:$0xf0] }
 0x1c3   : > { %v2930_v5 = vadd.f32 %v2929_v1, %v1040_v52  ;;  %v4632_v1 = vld [vmem:[%s5509_s12 + $0x8f8] sm:$0xf] }
 0x1c4   : > { %3160 = vmatpush.bf16.msra.mxu2 %v3833_v20  ;;  %3173 = vmatpush.bf16.msra.mxu3 %v3993_v23  ;;  %v4955_v20 = vld [vmem:[%s5509_s12 + $0x570] sm:$0xf0]  ;;  %v4533_v23 = vor.u32 %v5045_v6, %v4532_v14 }
 0x1c5   : > { %3136 = vmatmul.bf16.vlgmr.msra.gmra.mxu0 %v5684_v56  ;;  %3149 = vmatmul.bf16.vlgmr.msra.gmra.mxu1 %v5686_v57  ;;  %v4233_v56 = vor.u32 %v4970_v43, %v4232_v42  ;;  %v4393_v57 = vor.u32 %v5010_v47, %v4392_v46  ;;  %v2943_v11 = vadd.f32 %v2942_v18, %v2930_v5  ;;  %v4312_v42 = vld [vmem:[%s5509_s12 + $0x678] sm:$0xf]  ;;  %v4990_v43 = vld [vmem:[%s5509_s12 + $0x688] sm:$0xf0]  ;;  %v5035_v47 = vld [vmem:[%s5509_s12 + $0x7f0] sm:$0xf0] }
 0x1c6   : > { %3180 = vmatpush.bf16.msrb.mxu0 %v4273_v15  ;;  %3193 = vmatpush.bf16.msrb.mxu1 %v4433_v16  ;;  %v5085_v15 = vld [vmem:[%s5509_s12 + $0x980] sm:$0xf0]  ;;  %v4193_v16 = vor.u32 %v4960_v10, %v4192_v9  ;;  %v4173_v35 = vor.u32 %v4955_v20, %v4172_v19  ;;  %v4313_v52 = vor.u32 %v4990_v43, %v4312_v42  ;;  %v5070_v18 = vld [vmem:[%s5509_s12 + $0x908] sm:$0xf0] }
 0x1c7   : > { %v4693_v24 = vor.u32 %v5085_v15, %v4692_v2  ;;  %v4633_v5 = vor.u32 %v5070_v18, %v4632_v1  ;;  %v5025_v10 = vld [vmem:[%s5509_s12 + $0x7a0] sm:$0xf0] }
 0x1c8   : > { %3161 = vmatpush.bf16.msra.mxu2 %v3813_v40  ;;  %3174 = vmatpush.bf16.msra.mxu3 %v3973_v41  ;;  %v4513_v40 = vor.u32 %v5040_v32, %v4512_v27  ;;  %v4673_v41 = vor.u32 %v5080_v34, %v4672_v33 }
 0x1ca   : > { %3181 = vmatpush.bf16.msrb.mxu0 %v4253_v38  ;;  %3194 = vmatpush.bf16.msrb.mxu1 %v4413_v39  ;;  %v2931_v58 = vpop.f32.mrf.mxu0  ;;  %v2944_v31 = vpop.f32.mrf.mxu1  ;;  %v4152_v38 = vld [vmem:[%s5509_s12 + $0x538] sm:$0xf]  ;;  %v4950_v39 = vld [vmem:[%s5509_s12 + $0x548] sm:$0xf0] }
 0x1cb   : > { %3162 = vmatmul.bf16.vlgmr.msra.gmra.mxu2 %v5704_v21  ;;  %3175 = vmatmul.bf16.vlgmr.msra.gmra.mxu3 %v5706_v22  ;;  %v4713_v21 = vor.u32 %v5090_v37, %v4712_v4  ;;  %v5000_v22 = vld [vmem:[%s5509_s12 + $0x6d8] sm:$0xf0]  ;;  %v4153_v51 = vor.u32 %v4950_v39, %v4152_v38  ;;  %v4473_v37 = vor.u32 %v5030_v0, %v4472_v63  ;;  %v5175_v58 = vld [vmem:[%s274_s7] sm:$0x1f] }
 0x1cc   : > { %3206 = vmatpush.bf16.msrb.mxu2 %v4593_v44  ;;  %3219 = vmatpush.bf16.msrb.mxu3 %v4753_v45  ;;  %v4353_v17 = vor.u32 %v5000_v22, %v4352_v13  ;;  %v4492_v44 = vld [vmem:[%s5509_s12 + $0x7e0] sm:$0xf]  ;;  %v1041_v31 = vperm.slane %v5175_v58, 3  ;;  %v1042_v18 = vperm.slane %v5175_v58, 4 }
 0x1cd   : > { %v4493_v54 = vor.u32 %v5035_v47, %v4492_v44 }
 0x1ce   : > { %3182 = vmatpush.bf16.msrb.mxu0 %v4233_v56  ;;  %3195 = vmatpush.bf16.msrb.mxu1 %v4393_v57  ;;  %v2955_v45 = vpop.f32.mrf.mxu2  ;;  %v2968_v46 = vpop.f32.mrf.mxu3  ;;  %v4132_v56 = vld [vmem:[%s5509_s12 + $0x510] sm:$0xf]  ;;  %v4945_v57 = vld [vmem:[%s5509_s12 + $0x520] sm:$0xf0] }
 0x1cf   : > { %v2956_v50 = vadd.f32 %v2955_v45, %v2943_v11  ;;  %v4133_v3 = vor.u32 %v4945_v57, %v4132_v56  ;;  %v4612_v11 = vld [vmem:[%s5509_s12 + $0x8d0] sm:$0xf] }
 0x1d0   : > { %3207 = vmatpush.bf16.msrb.mxu2 %v4573_v55  ;;  %3220 = vmatpush.bf16.msrb.mxu3 %v4733_v59  ;;  %v4653_v55 = vor.u32 %v5075_v49, %v4652_v48  ;;  %v4292_v59 = vld [vmem:[%s5509_s12 + $0x650] sm:$0xf] }
 0x1d1   : > { %v2969_v53 = vadd.f32 %v2968_v46, %v2956_v50  ;;  %v4293_v4 = vor.u32 %v4985_v60, %v4292_v59 }
 0x1d2   : > { %3183 = vmatpush.bf16.msrb.mxu0 %v4213_v7  ;;  %3196 = vmatpush.bf16.msrb.mxu1 %v4373_v8  ;;  %v4452_v7 = vld [vmem:[%s5509_s12 + $0x790] sm:$0xf] }
 0x1d4   : > { %3208 = vmatpush.bf16.msrb.mxu2 %v4553_v12  ;;  %3221 = vmatpush.bf16.msrb.mxu3 %v4713_v21  ;;  %v5065_v12 = vld [vmem:[%s5509_s12 + $0x8e0] sm:$0xf0]  ;;  %v4453_v21 = vor.u32 %v5025_v10, %v4452_v7 }
 0x1d5   : > { %v4613_v13 = vor.u32 %v5065_v12, %v4612_v11 }
 0x1d6   : > { %3184 = vmatpush.bf16.msrb.mxu0 %v4193_v16  ;;  %3197 = vmatpush.bf16.msrb.mxu1 %v4353_v17  ;;  %v2957_v8 = vpop.f32.mrf.mxu2  ;;  %v2970_v9 = vpop.f32.mrf.mxu3 }
 0x1d8   : > { %3209 = vmatpush.bf16.msrb.mxu2 %v4533_v23  ;;  %3222 = vmatpush.bf16.msrb.mxu3 %v4693_v24 }
 0x1da   : > { %3185 = vmatpush.bf16.msrb.mxu0 %v4173_v35  ;;  %3198 = vmatpush.bf16.msrb.mxu1 %v4333_v36 }
 0x1dc   : > { %3210 = vmatpush.bf16.msrb.mxu2 %v4513_v40  ;;  %3223 = vmatpush.bf16.msrb.mxu3 %v4673_v41 }
 0x1de   : > { %3186 = vmatpush.bf16.msrb.mxu0 %v4153_v51  ;;  %3199 = vmatpush.bf16.msrb.mxu1 %v4313_v52 }
 0x1e0   : > { %3211 = vmatpush.bf16.msrb.mxu2 %v4493_v54  ;;  %3224 = vmatpush.bf16.msrb.mxu3 %v4653_v55 }
 0x1e2   : > { %3187 = vmatpush.bf16.msrb.mxu0 %v4133_v3  ;;  %3200 = vmatpush.bf16.msrb.mxu1 %v4293_v4  ;;  %v2981_v22 = vpop.f32.mrf.mxu0  ;;  %v2994_v14 = vpop.f32.mrf.mxu1 }
 0x1e3   : > { %v2982_v6 = vadd.f32 %v2981_v22, %v2969_v53 }
 0x1e4   : > { %3212 = vmatpush.bf16.msrb.mxu2 %v4473_v37  ;;  %3225 = vmatpush.bf16.msrb.mxu3 %v4633_v5 }
 0x1e5   : > { %3188 = vmatmul.bf16.vlgmr.msrb.gmra.mxu0 %v5730_v61  ;;  %3201 = vmatmul.bf16.vlgmr.msrb.gmra.mxu1 %v5732_v62  ;;  %v2995_v2 = vadd.f32 %v2994_v14, %v2982_v6 }
 0x1e8   : > { %3213 = vmatpush.bf16.msrb.mxu2 %v4453_v21  ;;  %3226 = vmatpush.bf16.msrb.mxu3 %v4613_v13 }
 0x1ea   : > { %v2983_v15 = vpop.f32.mrf.mxu0  ;;  %v2996_v16 = vpop.f32.mrf.mxu1 }
 0x1eb   : > { %3214 = vmatmul.bf16.vlgmr.msrb.gmra.mxu2 %v5749_v29  ;;  %3227 = vmatmul.bf16.vlgmr.msrb.gmra.mxu3 %v5751_v30 }
 0x1ee   : > { %v3007_v17 = vpop.f32.mrf.mxu2  ;;  %v3020_v19 = vpop.f32.mrf.mxu3 }
 0x1ef   : > { %v3008_v39 = vadd.f32 %v3007_v17, %v2995_v2 }
 0x1f1   : > { %v3021_v43 = vadd.f32 %v3020_v19, %v3008_v39 }
 0x1f3   : > { %v3234_v48 = vmax.f32 %v3021_v43, 0.0 }
 0x1f5   : > { %v3242_v51 = vrot.slane %v3234_v48, 4 }
 0x1f6   : > { %v3009_v20 = vpop.f32.mrf.mxu2  ;;  %v3022_v23 = vpop.f32.mrf.mxu3 }
 0x202   : > { %v3033_v61 = vpop.f32.mrf.mxu0  ;;  %v3046_v62 = vpop.f32.mrf.mxu1 }
 0x203   : > { %v3034_v32 = vadd.f32 %v3033_v61, %v1041_v31 }
 0x205   : > { %v3047_v33 = vadd.f32 %v3046_v62, %v3034_v32 }
 0x20a   : > { %v3035_v24 = vpop.f32.mrf.mxu0  ;;  %v3048_v25 = vpop.f32.mrf.mxu1 }
 0x20e   : > { %v3059_v26 = vpop.f32.mrf.mxu2  ;;  %v3072_v29 = vpop.f32.mrf.mxu3 }
 0x20f   : > { %v3060_v36 = vadd.f32 %v3059_v26, %v3047_v33 }
 0x211   : > { %v3073_v38 = vadd.f32 %v3072_v29, %v3060_v36 }
 0x216   : > { %v3061_v27 = vpop.f32.mrf.mxu2  ;;  %v3074_v30 = vpop.f32.mrf.mxu3 }
 0x222   : > { %v3085_v34 = vpop.f32.mrf.mxu0  ;;  %v3098_v35 = vpop.f32.mrf.mxu1 }
 0x223   : > { %v3086_v40 = vadd.f32 %v3085_v34, %v3073_v38 }
 0x225   : > { %v3099_v44 = vadd.f32 %v3098_v35, %v3086_v40 }
 0x22a   : > { %v3087_v41 = vpop.f32.mrf.mxu0  ;;  %v3100_v42 = vpop.f32.mrf.mxu1 }
 0x22e   : > { %v3111_v45 = vpop.f32.mrf.mxu2  ;;  %v3124_v46 = vpop.f32.mrf.mxu3 }
 0x22f   : > { %v3112_v47 = vadd.f32 %v3111_v45, %v3099_v44 }
 0x231   : > { %v3125_v49 = vadd.f32 %v3124_v46, %v3112_v47 }
 0x233   : > { %v3235_v50 = vmax.f32 %v3125_v49, 0.0 }
 0x235   : > { %v3243_v52 = vrot.slane %v3235_v50, 2 }
 0x236   : > { %v3113_v56 = vpop.f32.mrf.mxu2  ;;  %v3126_v57 = vpop.f32.mrf.mxu3 }
 0x237   : > { %v3247_v53 = vsel %vm3246_vm3, %v3242_v51, %v3243_v52 }
 0x238   : > { %v3249_v54 = vsel %vm3248_vm4, %v6202_v28, %v3247_v53 }
 0x239   : > { %3251 = vst [vmem:[%s313_s17] sm:$0xff] %v3249_v54 }
 0x242   : > { %v3137_v55 = vpop.f32.mrf.mxu0  ;;  %v3150_v59 = vpop.f32.mrf.mxu1 }
 0x243   : > { %v3138_v37 = vadd.f32 %v3137_v55, %v1042_v18 }
 0x245   : > { %v3151_v5 = vadd.f32 %v3150_v59, %v3138_v37 }
 0x24a   : > { %v3139_v60 = vpop.f32.mrf.mxu0  ;;  %v3152_v63 = vpop.f32.mrf.mxu1 }
 0x24e   : > { %v3163_v0 = vpop.f32.mrf.mxu2  ;;  %v3176_v1 = vpop.f32.mrf.mxu3 }
 0x24f   : > { %v3164_v7 = vadd.f32 %v3163_v0, %v3151_v5 }
 0x251   : > { %v3177_v10 = vadd.f32 %v3176_v1, %v3164_v7 }
 0x256   : > { %v3165_v3 = vpop.f32.mrf.mxu2  ;;  %v3178_v4 = vpop.f32.mrf.mxu3 }
 0x262   : > { %v3189_v8 = vpop.f32.mrf.mxu0  ;;  %v3202_v9 = vpop.f32.mrf.mxu1 }
 0x263   : > { %v3190_v11 = vadd.f32 %v3189_v8, %v3177_v10 }
 0x265   : > { %v3203_v28 = vadd.f32 %v3202_v9, %v3190_v11 }
 0x26a   : > { %v3191_v12 = vpop.f32.mrf.mxu0  ;;  %v3204_v21 = vpop.f32.mrf.mxu1 }
 0x26e   : > { %v3215_v13 = vpop.f32.mrf.mxu2  ;;  %v3228_v22 = vpop.f32.mrf.mxu3 }
 0x26f   : > { %v3216_v14 = vadd.f32 %v3215_v13, %v3203_v28 }
 0x271   : > { %v3229_v6 = vadd.f32 %v3228_v22, %v3216_v14 }
 0x273   : > { %v3236_v2 = vmax.f32 %v3229_v6, 0.0 }
 0x275   : > { %3252 = vst [vmem:[%s313_s17 + $0x8] sm:$0x3] %v3236_v2 }
 0x276   : > { %v3217_v15 = vpop.f32.mrf.mxu2  ;;  %v3230_v16 = vpop.f32.mrf.mxu3 }
 0x277 PF: > { %p14_p8 = scmp.ge.s32.totalorder %s5399_s23, 12   ;;  %s6308_s18 = smov %s5330_s19 }
 0x278   : > { %s6309_s19 = smov %s5334_s20  ;;  %s6310_s20 = smov %s5409_s26 }
 0x279   : > { %s6311_s21 = smov %s5399_s23  ;;  %16 = sbr.rel (!%p14_p8) target bundleno = 7 (0x7), region = 98 }
 0x27e   :  { %3275 = vsyncpa [#allocation3], 1 }
 0x27f   :  { %3277 = vsyncpa [#allocation3 + $0x1], 1 }
 0x280   :  { %3278 = vsyncpa [#allocation5], 1 }

// kernel: decoder_forward.5
= control target key start
LH: loop header
LB: loop body
LE: loop exit
PB: predicated region body
PF: predicated region fallthrough
CT: control target
= control target key end

     0   :  { %vm901_vm0 = vcmask 523264   ;;  %vm1246_vm8 = vcmask 1043456   ;;  %s2960_s1 = inlined_call_operand.vmem [shape: bf16[576,392], index: 1, kind: input, shape index: {}]   ;;  %s2961_s0 = inlined_call_operand.vmem [shape: bf16[4,576], index: 0, kind: input, shape index: {}]   ;;  %s2962_s2 = inlined_call_operand.vmem [shape: f32[4,1], index: 2, kind: input, shape index: {}]   ;;  %s2963_s3 = inlined_call_operand.vmem [shape: f32[4,392], index: 3, kind: output, shape index: {}]  }
   0x1   :  { %v1373_v0 = vld [vmem:[%s2960_s1 + $0xe0] sm:$0xf]  ;;  %v1873_v1 = vld [vmem:[%s2960_s1 + $0xec] sm:$0xf0] }
   0x2   :  { %v1501_v2 = vld [vmem:[%s2960_s1 + $0x1e0] sm:$0xf]  ;;  %v1374_v3 = vor.u32 %v1873_v1, %v1373_v0  ;;  %v1905_v4 = vld [vmem:[%s2960_s1 + $0x1ec] sm:$0xf0] }
   0x3   :  { %v1629_v5 = vld [vmem:[%s2960_s1 + $0x2e0] sm:$0xf]  ;;  %v1937_v6 = vld [vmem:[%s2960_s1 + $0x2ec] sm:$0xf0]  ;;  %v1502_v7 = vor.u32 %v1905_v4, %v1501_v2 }
   0x4   :  { %v1630_v8 = vor.u32 %v1937_v6, %v1629_v5  ;;  %v1757_v9 = vld [vmem:[%s2960_s1 + $0x3e0] sm:$0xf]  ;;  %v1969_v10 = vld [vmem:[%s2960_s1 + $0x3ec] sm:$0xf0]  ;;  %904 = vmatpush.bf16.msra.mxu0 %v1374_v3 }
   0x5   :  { %v1357_v11 = vld [vmem:[%s2960_s1 + $0xc0] sm:$0xf]  ;;  %v1758_v12 = vor.u32 %v1969_v10, %v1757_v9  ;;  %v1869_v13 = vld [vmem:[%s2960_s1 + $0xcc] sm:$0xf0]  ;;  %917 = vmatpush.bf16.msra.mxu1 %v1502_v7 }
   0x6   :  { %v1485_v14 = vld [vmem:[%s2960_s1 + $0x1c0] sm:$0xf]  ;;  %v1901_v15 = vld [vmem:[%s2960_s1 + $0x1cc] sm:$0xf0]  ;;  %930 = vmatpush.bf16.msra.mxu2 %v1630_v8  ;;  %v1358_v16 = vor.u32 %v1869_v13, %v1357_v11 }
   0x7   :  { %v1486_v17 = vor.u32 %v1901_v15, %v1485_v14  ;;  %v1613_v18 = vld [vmem:[%s2960_s1 + $0x2c0] sm:$0xf]  ;;  %v1933_v19 = vld [vmem:[%s2960_s1 + $0x2cc] sm:$0xf0]  ;;  %943 = vmatpush.bf16.msra.mxu3 %v1758_v12 }
   0x8   :  { %v1741_v20 = vld [vmem:[%s2960_s1 + $0x3c0] sm:$0xf]  ;;  %v1614_v21 = vor.u32 %v1933_v19, %v1613_v18  ;;  %v1965_v22 = vld [vmem:[%s2960_s1 + $0x3cc] sm:$0xf0]  ;;  %905 = vmatpush.bf16.msra.mxu0 %v1358_v16 }
   0x9   :  { %v1341_v23 = vld [vmem:[%s2960_s1 + $0xa0] sm:$0xf]  ;;  %v1865_v24 = vld [vmem:[%s2960_s1 + $0xac] sm:$0xf0]  ;;  %v1742_v25 = vor.u32 %v1965_v22, %v1741_v20  ;;  %918 = vmatpush.bf16.msra.mxu1 %v1486_v17 }
   0xa   :  { %v1469_v26 = vld [vmem:[%s2960_s1 + $0x1a0] sm:$0xf]  ;;  %v1897_v27 = vld [vmem:[%s2960_s1 + $0x1ac] sm:$0xf0]  ;;  %v1342_v29 = vor.u32 %v1865_v24, %v1341_v23  ;;  %931 = vmatpush.bf16.msra.mxu2 %v1614_v21 }
   0xb   :  { %v1597_v28 = vld [vmem:[%s2960_s1 + $0x2a0] sm:$0xf]  ;;  %v1929_v30 = vld [vmem:[%s2960_s1 + $0x2ac] sm:$0xf0]  ;;  %v1470_v33 = vor.u32 %v1897_v27, %v1469_v26  ;;  %944 = vmatpush.bf16.msra.mxu3 %v1742_v25 }
   0xc   :  { %v1725_v31 = vld [vmem:[%s2960_s1 + $0x3a0] sm:$0xf]  ;;  %v1961_v32 = vld [vmem:[%s2960_s1 + $0x3ac] sm:$0xf0]  ;;  %v1598_v34 = vor.u32 %v1929_v30, %v1597_v28  ;;  %906 = vmatpush.bf16.msra.mxu0 %v1342_v29 }
   0xd   :  { %v1325_v35 = vld [vmem:[%s2960_s1 + $0x80] sm:$0xf]  ;;  %v1861_v36 = vld [vmem:[%s2960_s1 + $0x8c] sm:$0xf0]  ;;  %v1726_v38 = vor.u32 %v1961_v32, %v1725_v31  ;;  %919 = vmatpush.bf16.msra.mxu1 %v1470_v33  ;;  %v1871_v31 = vld [vmem:[%s2960_s1 + $0xe4] sm:$0xf] }
   0xe   :  { %v1453_v37 = vld [vmem:[%s2960_s1 + $0x180] sm:$0xf]  ;;  %v1893_v39 = vld [vmem:[%s2960_s1 + $0x18c] sm:$0xf0]  ;;  %v1326_v44 = vor.u32 %v1861_v36, %v1325_v35  ;;  %932 = vmatpush.bf16.msra.mxu2 %v1598_v34  ;;  %v1375_v33 = vld [vmem:[%s2960_s1 + $0xf0] sm:$0xf0] }
   0xf   :  { %v1581_v40 = vld [vmem:[%s2960_s1 + $0x280] sm:$0xf]  ;;  %v1925_v41 = vld [vmem:[%s2960_s1 + $0x28c] sm:$0xf0]  ;;  %v1454_v45 = vor.u32 %v1893_v39, %v1453_v37  ;;  %945 = vmatpush.bf16.msra.mxu3 %v1726_v38  ;;  %v1903_v34 = vld [vmem:[%s2960_s1 + $0x1e4] sm:$0xf] }
  0x10   :  { %v1709_v42 = vld [vmem:[%s2960_s1 + $0x380] sm:$0xf]  ;;  %v1957_v43 = vld [vmem:[%s2960_s1 + $0x38c] sm:$0xf0]  ;;  %v1582_v46 = vor.u32 %v1925_v41, %v1581_v40  ;;  %907 = vmatpush.bf16.msra.mxu0 %v1326_v44  ;;  %v1503_v35 = vld [vmem:[%s2960_s1 + $0x1f0] sm:$0xf0]  ;;  %v1378_v44 = vor.u32 %v1871_v31, %v1375_v33 }
  0x11   :  { %v1309_v47 = vld [vmem:[%s2960_s1 + $0x60] sm:$0xf]  ;;  %v1857_v48 = vld [vmem:[%s2960_s1 + $0x6c] sm:$0xf0]  ;;  %v1710_v50 = vor.u32 %v1957_v43, %v1709_v42  ;;  %920 = vmatpush.bf16.msra.mxu1 %v1454_v45  ;;  %v1935_v38 = vld [vmem:[%s2960_s1 + $0x2e4] sm:$0xf]  ;;  %v1506_v45 = vor.u32 %v1903_v34, %v1503_v35 }
  0x12   :  { %v1437_v49 = vld [vmem:[%s2960_s1 + $0x160] sm:$0xf]  ;;  %v1889_v51 = vld [vmem:[%s2960_s1 + $0x16c] sm:$0xf0]  ;;  %v1310_v56 = vor.u32 %v1857_v48, %v1309_v47  ;;  %933 = vmatpush.bf16.msra.mxu2 %v1582_v46  ;;  %v1631_v39 = vld [vmem:[%s2960_s1 + $0x2f0] sm:$0xf0] }
  0x13   :  { %v1565_v52 = vld [vmem:[%s2960_s1 + $0x260] sm:$0xf]  ;;  %v1921_v53 = vld [vmem:[%s2960_s1 + $0x26c] sm:$0xf0]  ;;  %v1438_v57 = vor.u32 %v1889_v51, %v1437_v49  ;;  %946 = vmatpush.bf16.msra.mxu3 %v1710_v50  ;;  %v1867_v46 = vld [vmem:[%s2960_s1 + $0xc4] sm:$0xf]  ;;  %v1634_v49 = vor.u32 %v1935_v38, %v1631_v39 }
  0x14   :  { %v1693_v54 = vld [vmem:[%s2960_s1 + $0x360] sm:$0xf]  ;;  %v1953_v55 = vld [vmem:[%s2960_s1 + $0x36c] sm:$0xf0]  ;;  %v1566_v58 = vor.u32 %v1921_v53, %v1565_v52  ;;  %908 = vmatpush.bf16.msra.mxu0 %v1310_v56  ;;  %v1359_v47 = vld [vmem:[%s2960_s1 + $0xd0] sm:$0xf0] }
  0x15   :  { %v1293_v59 = vld [vmem:[%s2960_s1 + $0x40] sm:$0xf]  ;;  %v1853_v60 = vld [vmem:[%s2960_s1 + $0x4c] sm:$0xf0]  ;;  %v1694_v62 = vor.u32 %v1953_v55, %v1693_v54  ;;  %921 = vmatpush.bf16.msra.mxu1 %v1438_v57  ;;  %v1899_v48 = vld [vmem:[%s2960_s1 + $0x1c4] sm:$0xf] }
  0x16   :  { %v1421_v61 = vld [vmem:[%s2960_s1 + $0x140] sm:$0xf]  ;;  %v1885_v63 = vld [vmem:[%s2960_s1 + $0x14c] sm:$0xf0]  ;;  %v1294_v4 = vor.u32 %v1853_v60, %v1293_v59  ;;  %934 = vmatpush.bf16.msra.mxu2 %v1566_v58  ;;  %v1487_v50 = vld [vmem:[%s2960_s1 + $0x1d0] sm:$0xf0]  ;;  %v1362_v59 = vor.u32 %v1867_v46, %v1359_v47 }
  0x17   :  { %v1549_v0 = vld [vmem:[%s2960_s1 + $0x240] sm:$0xf]  ;;  %v1917_v1 = vld [vmem:[%s2960_s1 + $0x24c] sm:$0xf0]  ;;  %v1422_v5 = vor.u32 %v1885_v63, %v1421_v61  ;;  %947 = vmatpush.bf16.msra.mxu3 %v1694_v62  ;;  %v1931_v51 = vld [vmem:[%s2960_s1 + $0x2c4] sm:$0xf]  ;;  %v1490_v60 = vor.u32 %v1899_v48, %v1487_v50 }
  0x18   :  { %v1677_v2 = vld [vmem:[%s2960_s1 + $0x340] sm:$0xf]  ;;  %v1949_v3 = vld [vmem:[%s2960_s1 + $0x34c] sm:$0xf0]  ;;  %v1550_v6 = vor.u32 %v1917_v1, %v1549_v0  ;;  %909 = vmatpush.bf16.msra.mxu0 %v1294_v4  ;;  %v1615_v52 = vld [vmem:[%s2960_s1 + $0x2d0] sm:$0xf0] }
  0x19   :  { %v1277_v7 = vld [vmem:[%s2960_s1 + $0x20] sm:$0xf]  ;;  %v1849_v8 = vld [vmem:[%s2960_s1 + $0x2c] sm:$0xf0]  ;;  %v1678_v10 = vor.u32 %v1949_v3, %v1677_v2  ;;  %922 = vmatpush.bf16.msra.mxu1 %v1422_v5  ;;  %v1863_v61 = vld [vmem:[%s2960_s1 + $0xa4] sm:$0xf]  ;;  %v1618_v63 = vor.u32 %v1931_v51, %v1615_v52 }
  0x1a   :  { %v1405_v9 = vld [vmem:[%s2960_s1 + $0x120] sm:$0xf]  ;;  %v1881_v11 = vld [vmem:[%s2960_s1 + $0x12c] sm:$0xf0]  ;;  %v1278_v17 = vor.u32 %v1849_v8, %v1277_v7  ;;  %935 = vmatpush.bf16.msra.mxu2 %v1550_v6  ;;  %v1343_v0 = vld [vmem:[%s2960_s1 + $0xb0] sm:$0xf0] }
  0x1b   :  { %v1533_v12 = vld [vmem:[%s2960_s1 + $0x220] sm:$0xf]  ;;  %v1913_v13 = vld [vmem:[%s2960_s1 + $0x22c] sm:$0xf0]  ;;  %v1406_v21 = vor.u32 %v1881_v11, %v1405_v9  ;;  %948 = vmatpush.bf16.msra.mxu3 %v1678_v10  ;;  %v1895_v1 = vld [vmem:[%s2960_s1 + $0x1a4] sm:$0xf]  ;;  %v1346_v10 = vor.u32 %v1863_v61, %v1343_v0 }
  0x1c   :  { %v1661_v14 = vld [vmem:[%s2960_s1 + $0x320] sm:$0xf]  ;;  %v1945_v15 = vld [vmem:[%s2960_s1 + $0x32c] sm:$0xf0]  ;;  %v1534_v22 = vor.u32 %v1913_v13, %v1533_v12  ;;  %910 = vmatpush.bf16.msra.mxu0 %v1278_v17  ;;  %v1471_v2 = vld [vmem:[%s2960_s1 + $0x1b0] sm:$0xf0] }
  0x1d   :  { %v1261_v16 = vld [vmem:[%s2960_s1] sm:$0xf]  ;;  %v1845_v18 = vld [vmem:[%s2960_s1 + $0xc] sm:$0xf0]  ;;  %v1662_v26 = vor.u32 %v1945_v15, %v1661_v14  ;;  %923 = vmatpush.bf16.msra.mxu1 %v1406_v21  ;;  %v1927_v3 = vld [vmem:[%s2960_s1 + $0x2a4] sm:$0xf]  ;;  %v1474_v11 = vor.u32 %v1895_v1, %v1471_v2 }
  0x1e   :  { %v1389_v19 = vld [vmem:[%s2960_s1 + $0x100] sm:$0xf]  ;;  %v1877_v20 = vld [vmem:[%s2960_s1 + $0x10c] sm:$0xf0]  ;;  %v1262_v32 = vor.u32 %v1845_v18, %v1261_v16  ;;  %936 = vmatpush.bf16.msra.mxu2 %v1534_v22  ;;  %v1599_v4 = vld [vmem:[%s2960_s1 + $0x2b0] sm:$0xf0] }
  0x1f   :  { %v1517_v23 = vld [vmem:[%s2960_s1 + $0x200] sm:$0xf]  ;;  %v1909_v24 = vld [vmem:[%s2960_s1 + $0x20c] sm:$0xf0]  ;;  %v1390_v36 = vor.u32 %v1877_v20, %v1389_v19  ;;  %949 = vmatpush.bf16.msra.mxu3 %v1662_v26  ;;  %v1859_v8 = vld [vmem:[%s2960_s1 + $0x84] sm:$0xf]  ;;  %v1602_v14 = vor.u32 %v1927_v3, %v1599_v4 }
  0x20   :  { %v15_v25 = vld [vmem:[%s2961_s0] sm:$0xff]  ;;  %v1941_v28 = vld [vmem:[%s2960_s1 + $0x30c] sm:$0xf0]  ;;  %v1518_v37 = vor.u32 %v1909_v24, %v1517_v23  ;;  %911 = vmatpush.bf16.msra.mxu0 %v1262_v32  ;;  %v1327_v9 = vld [vmem:[%s2960_s1 + $0x90] sm:$0xf0]  ;;  %v2005_v17 = vmov 0  }
  0x21   :  { %v1645_v27 = vld [vmem:[%s2960_s1 + $0x300] sm:$0xf]  ;;  %168 = vst [vmem:[#allocation1] ss:$4 sm:$0xff] %v15_v25  ;;  %v1985_v30 = vld [vmem:[%s2960_s1 + $0x46c] sm:$0xf0]  ;;  %924 = vmatpush.bf16.msra.mxu1 %v1390_v36  ;;  %1988 = vset.pattern.permute.xlu0 %v2005_v17  ;;  %v1330_v23 = vor.u32 %v1859_v8, %v1327_v9 }
  0x22   :  { %v1821_v29 = vld [vmem:[%s2960_s1 + $0x460] sm:$0xf]  ;;  %v1646_v40 = vor.u32 %v1941_v28, %v1645_v27  ;;  %v1981_v43 = vld [vmem:[%s2960_s1 + $0x44c] sm:$0xf0]  ;;  %937 = vmatpush.bf16.msra.mxu2 %v1518_v37  ;;  %v1891_v12 = vld [vmem:[%s2960_s1 + $0x184] sm:$0xf] }
  0x23   :  { %v1822_v41 = vor.u32 %v1985_v30, %v1821_v29  ;;  %v1805_v42 = vld [vmem:[%s2960_s1 + $0x440] sm:$0xf]  ;;  %v1977_v55 = vld [vmem:[%s2960_s1 + $0x42c] sm:$0xf0]  ;;  %v16_v13 = vld [vmem:[%s2961_s0 + $0x8] sm:$0x3] }
  0x24   :  { %v1789_v54 = vld [vmem:[%s2960_s1 + $0x420] sm:$0xf]  ;;  %950 = vmatpush.bf16.msra.mxu3 %v1646_v40  ;;  %v1806_v56 = vor.u32 %v1981_v43, %v1805_v42  ;;  %v1973_v7 = vld [vmem:[%s2960_s1 + $0x40c] sm:$0xf0]  ;;  %v1455_v15 = vld [vmem:[%s2960_s1 + $0x190] sm:$0xf0] }
  0x25   :  { %960 = vmatpush.bf16.msrb.mxu0 %v1822_v41  ;;  %969 = vmatpush.bf16.msrb.mxu1 %v1378_v44  ;;  %v1773_v5 = vld [vmem:[%s2960_s1 + $0x400] sm:$0xf]  ;;  %v1790_v6 = vor.u32 %v1977_v55, %v1789_v54  ;;  %v1923_v16 = vld [vmem:[%s2960_s1 + $0x284] sm:$0xf]  ;;  %171 = vst [vmem:[#allocation1 + $0x20] ss:$4 sm:$0xff] %v16_v13  ;;  %v1458_v24 = vor.u32 %v1891_v12, %v1455_v15 }
  0x26   :  { %982 = vmatpush.bf16.msrb.mxu2 %v1506_v45  ;;  %v1583_v18 = vld [vmem:[%s2960_s1 + $0x290] sm:$0xf0]  ;;  %v1967_v19 = vld [vmem:[%s2960_s1 + $0x3e4] sm:$0xf]  ;;  %v1774_v21 = vor.u32 %v1973_v7, %v1773_v5  ;;  %v161_v22 = vld [vmem:[%s2962_s2] sm:$0xf] }
  0x27   :  { %v1759_v20 = vld [vmem:[%s2960_s1 + $0x3f0] sm:$0xf0]  ;;  %v1855_v25 = vld [vmem:[%s2960_s1 + $0x64] sm:$0xf]  ;;  %v1586_v27 = vor.u32 %v1923_v16, %v1583_v18  ;;  %164 = vperm.xlu0 %1988, %v161_v22   ;;  %v1874_v15 = vld [vmem:[%s2960_s1 + $0xf4] sm:$0xf0] }
  0x28   :  { %v2269_v53 = vld.sshfl [vmem:[#allocation1] sm:$0xff pattern:$0x73625140]  ;;  %v2277_v57 = vld.sshfl [vmem:[#allocation1 + $0x10] sm:$0xff pattern:$0x73625140]  ;;  %995 = vmatpush.bf16.msrb.mxu3 %v1634_v49  ;;  %v1762_v28 = vor.u32 %v1967_v19, %v1759_v20 }
  0x29   :  { %v2279_v58 = vld.sshfl [vmem:[#allocation1 + $0x18] sm:$0xff pattern:$0x73625140]  ;;  %v2284_v62 = vld.sshfl [vmem:[#allocation1 + $0x8] sm:$0xff pattern:$0x73625140]  ;;  %912 = vmatmul.bf16.vlgmr.msra.gmra.mxu0 %v2269_v53  ;;  %938 = vmatmul.bf16.vlgmr.msra.gmra.mxu2 %v2277_v57 }
  0x2a   :  { %951 = vmatmul.bf16.vlgmr.msra.gmra.mxu3 %v2279_v58  ;;  %961 = vmatpush.bf16.msrb.mxu0 %v1806_v56  ;;  %v1311_v26 = vld [vmem:[%s2960_s1 + $0x70] sm:$0xf0]  ;;  %v1887_v29 = vld [vmem:[%s2960_s1 + $0x164] sm:$0xf]  ;;  %v1509_v18 = vld [vmem:[%s2960_s1 + $0x1e8] sm:$0xf] }
  0x2b   :  { %925 = vmatmul.bf16.vlgmr.msra.gmra.mxu1 %v2284_v62  ;;  %983 = vmatpush.bf16.msrb.mxu2 %v1490_v60  ;;  %v1439_v30 = vld [vmem:[%s2960_s1 + $0x170] sm:$0xf0]  ;;  %v1919_v31 = vld [vmem:[%s2960_s1 + $0x264] sm:$0xf]  ;;  %v1314_v35 = vor.u32 %v1855_v25, %v1311_v26  ;;  %v1906_v19 = vld [vmem:[%s2960_s1 + $0x1f4] sm:$0xf0] }
  0x2c   :  { %970 = vmatpush.bf16.msrb.mxu1 %v1362_v59  ;;  %996 = vmatpush.bf16.msrb.mxu3 %v1618_v63  ;;  %v1567_v32 = vld [vmem:[%s2960_s1 + $0x270] sm:$0xf0]  ;;  %v1963_v33 = vld [vmem:[%s2960_s1 + $0x3c4] sm:$0xf]  ;;  %v1442_v36 = vor.u32 %v1887_v29, %v1439_v30  ;;  %v1365_v29 = vld [vmem:[%s2960_s1 + $0xc8] sm:$0xf] }
  0x2d   :  { %v1743_v34 = vld [vmem:[%s2960_s1 + $0x3d0] sm:$0xf0]  ;;  %v1851_v37 = vld [vmem:[%s2960_s1 + $0x44] sm:$0xf]  ;;  %v1570_v39 = vor.u32 %v1919_v31, %v1567_v32  ;;  %v1870_v30 = vld [vmem:[%s2960_s1 + $0xd4] sm:$0xf0] }
  0x2e   :  { %962 = vmatpush.bf16.msrb.mxu0 %v1790_v6  ;;  %v1295_v38 = vld [vmem:[%s2960_s1 + $0x50] sm:$0xf0]  ;;  %v1746_v40 = vor.u32 %v1963_v33, %v1743_v34  ;;  %v1883_v41 = vld [vmem:[%s2960_s1 + $0x144] sm:$0xf]  ;;  %v1493_v31 = vld [vmem:[%s2960_s1 + $0x1c8] sm:$0xf] }
  0x2f   :  { %984 = vmatpush.bf16.msrb.mxu2 %v1474_v11  ;;  %v1423_v42 = vld [vmem:[%s2960_s1 + $0x150] sm:$0xf0]  ;;  %v1915_v43 = vld [vmem:[%s2960_s1 + $0x244] sm:$0xf]  ;;  %v1298_v48 = vor.u32 %v1851_v37, %v1295_v38  ;;  %v1902_v32 = vld [vmem:[%s2960_s1 + $0x1d4] sm:$0xf0] }
  0x30   :  { %971 = vmatpush.bf16.msrb.mxu1 %v1346_v10  ;;  %997 = vmatpush.bf16.msrb.mxu3 %v1602_v14  ;;  %v1551_v44 = vld [vmem:[%s2960_s1 + $0x250] sm:$0xf0]  ;;  %v1959_v45 = vld [vmem:[%s2960_s1 + $0x3a4] sm:$0xf]  ;;  %v1426_v49 = vor.u32 %v1883_v41, %v1423_v42  ;;  %v1381_v14 = vld [vmem:[%s2960_s1 + $0xe8] sm:$0xf] }
  0x31   :  { %v1727_v46 = vld [vmem:[%s2960_s1 + $0x3b0] sm:$0xf0]  ;;  %v2389_v47 = vld.sshfl [vmem:[#allocation1 + $0x20] sm:$0xff pattern:$0x73625140]  ;;  %v1554_v52 = vor.u32 %v1915_v43, %v1551_v44 }
  0x32   :  { %963 = vmatpush.bf16.msrb.mxu0 %v1774_v21  ;;  %v1847_v50 = vld [vmem:[%s2960_s1 + $0x24] sm:$0xf]  ;;  %v1279_v51 = vld [vmem:[%s2960_s1 + $0x30] sm:$0xf0]  ;;  %v1730_v54 = vor.u32 %v1959_v45, %v1727_v46  ;;  %v1349_v41 = vld [vmem:[%s2960_s1 + $0xa8] sm:$0xf] }
  0x33   :  { %985 = vmatpush.bf16.msrb.mxu2 %v1458_v24  ;;  %v1879_v55 = vld [vmem:[%s2960_s1 + $0x124] sm:$0xf]  ;;  %v1407_v56 = vld [vmem:[%s2960_s1 + $0x130] sm:$0xf0]  ;;  %v1282_v0 = vor.u32 %v1847_v50, %v1279_v51  ;;  %v1866_v42 = vld [vmem:[%s2960_s1 + $0xb4] sm:$0xf0] }
  0x34   :  { %972 = vmatpush.bf16.msrb.mxu1 %v1330_v23  ;;  %998 = vmatpush.bf16.msrb.mxu3 %v1586_v27  ;;  %v1911_v59 = vld [vmem:[%s2960_s1 + $0x224] sm:$0xf]  ;;  %v1535_v60 = vld [vmem:[%s2960_s1 + $0x230] sm:$0xf0]  ;;  %v1410_v1 = vor.u32 %v1879_v55, %v1407_v56  ;;  %v1382_v23 = vor.u32 %v1874_v15, %v1381_v14  ;;  %v1510_v27 = vor.u32 %v1906_v19, %v1509_v18  ;;  %v1477_v43 = vld [vmem:[%s2960_s1 + $0x1a8] sm:$0xf] }
  0x35   :  { %v1955_v61 = vld [vmem:[%s2960_s1 + $0x384] sm:$0xf]  ;;  %v1711_v63 = vld [vmem:[%s2960_s1 + $0x390] sm:$0xf0]  ;;  %v1538_v5 = vor.u32 %v1911_v59, %v1535_v60  ;;  %v1898_v44 = vld [vmem:[%s2960_s1 + $0x1b4] sm:$0xf0] }
  0x36   :  { %1008 = vmatpush.bf16.msra.mxu0 %v1762_v28  ;;  %v1843_v2 = vld [vmem:[%s2960_s1 + $0x4] sm:$0xf]  ;;  %v1263_v3 = vld [vmem:[%s2960_s1 + $0x10] sm:$0xf0]  ;;  %v1714_v6 = vor.u32 %v1955_v61, %v1711_v63  ;;  %v1333_v55 = vld [vmem:[%s2960_s1 + $0x88] sm:$0xf] }
  0x37   :  { %986 = vmatpush.bf16.msrb.mxu2 %v1442_v36  ;;  %v1875_v4 = vld [vmem:[%s2960_s1 + $0x104] sm:$0xf]  ;;  %v1391_v7 = vld [vmem:[%s2960_s1 + $0x110] sm:$0xf0]  ;;  %v1266_v16 = vor.u32 %v1843_v2, %v1263_v3  ;;  %v1862_v56 = vld [vmem:[%s2960_s1 + $0x94] sm:$0xf0] }
  0x38   :  { %973 = vmatpush.bf16.msrb.mxu1 %v1314_v35  ;;  %999 = vmatpush.bf16.msrb.mxu3 %v1570_v39  ;;  %v1907_v8 = vld [vmem:[%s2960_s1 + $0x204] sm:$0xf]  ;;  %v1519_v9 = vld [vmem:[%s2960_s1 + $0x210] sm:$0xf0]  ;;  %v1394_v17 = vor.u32 %v1875_v4, %v1391_v7  ;;  %v1366_v35 = vor.u32 %v1870_v30, %v1365_v29  ;;  %v1494_v39 = vor.u32 %v1902_v32, %v1493_v31  ;;  %v1461_v59 = vld [vmem:[%s2960_s1 + $0x188] sm:$0xf] }
  0x39   :  { %1835 = vmatmul.msk.bf16.vlgmr.msrb.gmra.mxu0 %vm901_vm0, %v2389_v47  ;;  %v1951_v10 = vld [vmem:[%s2960_s1 + $0x364] sm:$0xf]  ;;  %v1695_v11 = vld [vmem:[%s2960_s1 + $0x370] sm:$0xf0]  ;;  %v1522_v20 = vor.u32 %v1907_v8, %v1519_v9  ;;  %v1894_v60 = vld [vmem:[%s2960_s1 + $0x194] sm:$0xf0]  ;;  %v1334_v4 = vor.u32 %v1862_v56, %v1333_v55 }
  0x3a   :  { %1009 = vmatpush.bf16.msra.mxu0 %v1746_v40  ;;  %v1983_v12 = vld [vmem:[%s2960_s1 + $0x464] sm:$0xf]  ;;  %v1823_v13 = vld [vmem:[%s2960_s1 + $0x470] sm:$0xf0]  ;;  %v1698_v21 = vor.u32 %v1951_v10, %v1695_v11  ;;  %v1637_v61 = vld [vmem:[%s2960_s1 + $0x2e8] sm:$0xf] }
  0x3b   :  { %987 = vmatpush.bf16.msrb.mxu2 %v1426_v49  ;;  %v1826_v22 = vor.u32 %v1983_v12, %v1823_v13  ;;  %v1947_v24 = vld [vmem:[%s2960_s1 + $0x344] sm:$0xf]  ;;  %v1679_v25 = vld [vmem:[%s2960_s1 + $0x350] sm:$0xf0]  ;;  %v1350_v49 = vor.u32 %v1866_v42, %v1349_v41  ;;  %v1938_v63 = vld [vmem:[%s2960_s1 + $0x2f4] sm:$0xf0] }
  0x3c   :  { %974 = vmatpush.bf16.msrb.mxu1 %v1298_v48  ;;  %1000 = vmatpush.bf16.msrb.mxu3 %v1554_v52  ;;  %v1979_v26 = vld [vmem:[%s2960_s1 + $0x444] sm:$0xf]  ;;  %v1807_v28 = vld [vmem:[%s2960_s1 + $0x450] sm:$0xf0]  ;;  %v1682_v33 = vor.u32 %v1947_v24, %v1679_v25  ;;  %v1970_v2 = vld [vmem:[%s2960_s1 + $0x3f4] sm:$0xf0] }
  0x3d   :  { %v1810_v34 = vor.u32 %v1979_v26, %v1807_v28  ;;  %v1943_v36 = vld [vmem:[%s2960_s1 + $0x324] sm:$0xf]  ;;  %v1663_v37 = vld [vmem:[%s2960_s1 + $0x330] sm:$0xf0]  ;;  %v1317_v7 = vld [vmem:[%s2960_s1 + $0x68] sm:$0xf] }
  0x3e   :  { %1010 = vmatpush.bf16.msra.mxu0 %v1730_v54  ;;  %v1975_v38 = vld [vmem:[%s2960_s1 + $0x424] sm:$0xf]  ;;  %v1791_v40 = vld [vmem:[%s2960_s1 + $0x430] sm:$0xf0]  ;;  %v1666_v45 = vor.u32 %v1943_v36, %v1663_v37  ;;  %v1478_v54 = vor.u32 %v1898_v44, %v1477_v43  ;;  %v1858_v8 = vld [vmem:[%s2960_s1 + $0x74] sm:$0xf0] }
  0x3f   :  { %988 = vmatpush.bf16.msrb.mxu2 %v1410_v1  ;;  %v1939_v46 = vld [vmem:[%s2960_s1 + $0x304] sm:$0xf]  ;;  %v1794_v48 = vor.u32 %v1975_v38, %v1791_v40  ;;  %v1647_v50 = vld [vmem:[%s2960_s1 + $0x310] sm:$0xf0]  ;;  %v1765_v1 = vld [vmem:[%s2960_s1 + $0x3e8] sm:$0xf] }
  0x40   :  { %975 = vmatpush.bf16.msrb.mxu1 %v1282_v0  ;;  %1001 = vmatpush.bf16.msrb.mxu3 %v1538_v5  ;;  %v1971_v51 = vld [vmem:[%s2960_s1 + $0x404] sm:$0xf]  ;;  %v1775_v52 = vld [vmem:[%s2960_s1 + $0x410] sm:$0xf0]  ;;  %v1650_v0 = vor.u32 %v1939_v46, %v1647_v50  ;;  %v1462_v5 = vor.u32 %v1894_v60, %v1461_v59  ;;  %v1445_v9 = vld [vmem:[%s2960_s1 + $0x168] sm:$0xf]  ;;  %v1766_v10 = vor.u32 %v1970_v2, %v1765_v1 }
  0x41   :  { %v1778_v3 = vor.u32 %v1971_v51, %v1775_v52  ;;  %v1890_v11 = vld [vmem:[%s2960_s1 + $0x174] sm:$0xf0]  ;;  %v1621_v12 = vld [vmem:[%s2960_s1 + $0x2c8] sm:$0xf]  ;;  %v1872_v59 = vld [vmem:[%s2960_s1 + $0xec] sm:$0xf] }
  0x42   :  { %1011 = vmatpush.bf16.msra.mxu0 %v1714_v6  ;;  %v1638_v6 = vor.u32 %v1938_v63, %v1637_v61  ;;  %v1934_v13 = vld [vmem:[%s2960_s1 + $0x2d4] sm:$0xf0]  ;;  %v1749_v14 = vld [vmem:[%s2960_s1 + $0x3c8] sm:$0xf]  ;;  %v1383_v60 = vld [vmem:[%s2960_s1 + $0xf8] sm:$0xf0] }
  0x43   :  { %989 = vmatpush.bf16.msrb.mxu2 %v1394_v17  ;;  %v1966_v15 = vld [vmem:[%s2960_s1 + $0x3d4] sm:$0xf0]  ;;  %v1446_v17 = vor.u32 %v1890_v11, %v1445_v9  ;;  %v1622_v18 = vor.u32 %v1934_v13, %v1621_v12  ;;  %v1301_v19 = vld [vmem:[%s2960_s1 + $0x48] sm:$0xf]  ;;  %v1868_v9 = vld [vmem:[%s2960_s1 + $0xcc] sm:$0xf] }
  0x44   :  { %976 = vmatpush.bf16.msrb.mxu1 %v1266_v16  ;;  %1002 = vmatpush.bf16.msrb.mxu3 %v1522_v20  ;;  %v1318_v16 = vor.u32 %v1858_v8, %v1317_v7  ;;  %v1854_v20 = vld [vmem:[%s2960_s1 + $0x54] sm:$0xf0]  ;;  %v1605_v24 = vld [vmem:[%s2960_s1 + $0x2a8] sm:$0xf] }
  0x45   :  { %v1930_v25 = vld [vmem:[%s2960_s1 + $0x2b4] sm:$0xf0]  ;;  %v1733_v26 = vld [vmem:[%s2960_s1 + $0x3a8] sm:$0xf]  ;;  %v1302_v28 = vor.u32 %v1854_v20, %v1301_v19 }
  0x46   :  { %1012 = vmatpush.bf16.msra.mxu0 %v1698_v21  ;;  %990 = vmatmul.bf16.vlgmr.msrb.gmra.mxu2 %v2284_v62  ;;  %v1429_v21 = vld [vmem:[%s2960_s1 + $0x148] sm:$0xf]  ;;  %v1606_v30 = vor.u32 %v1930_v25, %v1605_v24  ;;  %v1850_v32 = vld [vmem:[%s2960_s1 + $0x34] sm:$0xf0] }
  0x47   :  { %1034 = vmatpush.bf16.msra.mxu2 %v1382_v23  ;;  %977 = vmatmul.bf16.vlgmr.msrb.gmra.mxu1 %v2269_v53  ;;  %v1886_v23 = vld [vmem:[%s2960_s1 + $0x154] sm:$0xf0]  ;;  %v1285_v31 = vld [vmem:[%s2960_s1 + $0x28] sm:$0xf] }
  0x48   :  { %1025 = vmatpush.bf16.msra.mxu1 %v1826_v22  ;;  %1047 = vmatpush.bf16.msra.mxu3 %v1510_v27  ;;  %v1750_v22 = vor.u32 %v1966_v15, %v1749_v14  ;;  %v1962_v27 = vld [vmem:[%s2960_s1 + $0x3b4] sm:$0xf0]  ;;  %v1430_v29 = vor.u32 %v1886_v23, %v1429_v21  ;;  %v1589_v36 = vld [vmem:[%s2960_s1 + $0x288] sm:$0xf]  ;;  %v1286_v40 = vor.u32 %v1850_v32, %v1285_v31  ;;  %v1864_v21 = vld [vmem:[%s2960_s1 + $0xac] sm:$0xf] }
  0x49   :  { %1003 = vmatmul.bf16.vlgmr.msrb.gmra.mxu3 %v2277_v57  ;;  %v1926_v37 = vld [vmem:[%s2960_s1 + $0x294] sm:$0xf0]  ;;  %v1717_v38 = vld [vmem:[%s2960_s1 + $0x388] sm:$0xf] }
  0x4a   :  { %1013 = vmatpush.bf16.msra.mxu0 %v1682_v33  ;;  %v1413_v33 = vld [vmem:[%s2960_s1 + $0x128] sm:$0xf]  ;;  %v1590_v43 = vor.u32 %v1926_v37, %v1589_v36  ;;  %v1846_v44 = vld [vmem:[%s2960_s1 + $0x14] sm:$0xf0]  ;;  %v1511_v36 = vld [vmem:[%s2960_s1 + $0x1f8] sm:$0xf0] }
  0x4b   :  { %1035 = vmatpush.bf16.msra.mxu2 %v1366_v35  ;;  %v1882_v35 = vld [vmem:[%s2960_s1 + $0x134] sm:$0xf0]  ;;  %v1269_v41 = vld [vmem:[%s2960_s1 + $0x8] sm:$0xf]  ;;  %v1936_v37 = vld [vmem:[%s2960_s1 + $0x2ec] sm:$0xf] }
  0x4c   :  { %1026 = vmatpush.bf16.msra.mxu1 %v1810_v34  ;;  %1048 = vmatpush.bf16.msra.mxu3 %v1494_v39  ;;  %v1734_v34 = vor.u32 %v1962_v27, %v1733_v26  ;;  %v1958_v39 = vld [vmem:[%s2960_s1 + $0x394] sm:$0xf0]  ;;  %v1414_v42 = vor.u32 %v1882_v35, %v1413_v33  ;;  %v1701_v51 = vld [vmem:[%s2960_s1 + $0x368] sm:$0xf]  ;;  %v1270_v56 = vor.u32 %v1846_v44, %v1269_v41  ;;  %v1860_v33 = vld [vmem:[%s2960_s1 + $0x8c] sm:$0xf] }
  0x4d   :  { %v1878_v46 = vld [vmem:[%s2960_s1 + $0x114] sm:$0xf0]  ;;  %v1557_v2 = vld [vmem:[%s2960_s1 + $0x248] sm:$0xf]  ;;  %v1904_v35 = vld [vmem:[%s2960_s1 + $0x1ec] sm:$0xf] }
  0x4e   :  { %1014 = vmatpush.bf16.msra.mxu0 %v1666_v45  ;;  %v1397_v45 = vld [vmem:[%s2960_s1 + $0x108] sm:$0xf]  ;;  %v1922_v50 = vld [vmem:[%s2960_s1 + $0x274] sm:$0xf0]  ;;  %v1767_v41 = vld [vmem:[%s2960_s1 + $0x3f8] sm:$0xf0] }
  0x4f   :  { %1036 = vmatpush.bf16.msra.mxu2 %v1350_v49  ;;  %v1573_v49 = vld [vmem:[%s2960_s1 + $0x268] sm:$0xf]  ;;  %v1954_v52 = vld [vmem:[%s2960_s1 + $0x374] sm:$0xf0]  ;;  %v1398_v61 = vor.u32 %v1878_v46, %v1397_v45  ;;  %v1514_v45 = vor.u32 %v1904_v35, %v1511_v36  ;;  %v1856_v46 = vld [vmem:[%s2960_s1 + $0x6c] sm:$0xf] }
  0x50   :  { %1027 = vmatpush.bf16.msra.mxu1 %v1794_v48  ;;  %1049 = vmatpush.bf16.msra.mxu3 %v1478_v54  ;;  %v1718_v48 = vor.u32 %v1958_v39, %v1717_v38  ;;  %v1829_v54 = vld [vmem:[%s2960_s1 + $0x468] sm:$0xf]  ;;  %v1986_v55 = vld [vmem:[%s2960_s1 + $0x474] sm:$0xf0]  ;;  %v1574_v63 = vor.u32 %v1922_v50, %v1573_v49  ;;  %v1639_v39 = vld [vmem:[%s2960_s1 + $0x2f8] sm:$0xf0] }
  0x51   :  { %v1830_v1 = vor.u32 %v1986_v55, %v1829_v54  ;;  %v1813_v7 = vld [vmem:[%s2960_s1 + $0x448] sm:$0xf]  ;;  %v1982_v8 = vld [vmem:[%s2960_s1 + $0x454] sm:$0xf0]  ;;  %v1642_v49 = vor.u32 %v1936_v37, %v1639_v39  ;;  %v1932_v54 = vld [vmem:[%s2960_s1 + $0x2cc] sm:$0xf] }
  0x52   :  { %1015 = vmatpush.bf16.msra.mxu0 %v1650_v0  ;;  %v1702_v0 = vor.u32 %v1954_v52, %v1701_v51  ;;  %v1814_v13 = vor.u32 %v1982_v8, %v1813_v7  ;;  %v1541_v14 = vld [vmem:[%s2960_s1 + $0x228] sm:$0xf]  ;;  %v1914_v15 = vld [vmem:[%s2960_s1 + $0x234] sm:$0xf0]  ;;  %v1900_v51 = vld [vmem:[%s2960_s1 + $0x1cc] sm:$0xf] }
  0x53   :  { %1037 = vmatpush.bf16.msra.mxu2 %v1334_v4  ;;  %v1685_v4 = vld [vmem:[%s2960_s1 + $0x348] sm:$0xf]  ;;  %v1978_v20 = vld [vmem:[%s2960_s1 + $0x434] sm:$0xf0]  ;;  %v1542_v23 = vor.u32 %v1914_v15, %v1541_v14  ;;  %v1495_v52 = vld [vmem:[%s2960_s1 + $0x1d8] sm:$0xf0] }
  0x54   :  { %1028 = vmatpush.bf16.msra.mxu1 %v1778_v3  ;;  %1050 = vmatpush.bf16.msra.mxu3 %v1462_v5  ;;  %v1918_v3 = vld [vmem:[%s2960_s1 + $0x254] sm:$0xf0]  ;;  %v1386_v5 = vor.u32 %v1872_v59, %v1383_v60  ;;  %v1797_v19 = vld [vmem:[%s2960_s1 + $0x428] sm:$0xf]  ;;  %v1623_v55 = vld [vmem:[%s2960_s1 + $0x2d8] sm:$0xf0] }
  0x55   :  { %1016 = vmatmul.bf16.vlgmr.msra.gmra.mxu0 %v2279_v58  ;;  %v1558_v11 = vor.u32 %v1918_v3, %v1557_v2  ;;  %v1525_v24 = vld [vmem:[%s2960_s1 + $0x208] sm:$0xf]  ;;  %v1910_v25 = vld [vmem:[%s2960_s1 + $0x214] sm:$0xf0]  ;;  %v1798_v27 = vor.u32 %v1978_v20, %v1797_v19  ;;  %v1751_v59 = vld [vmem:[%s2960_s1 + $0x3d8] sm:$0xf0] }
  0x56   :  { %1060 = vmatpush.bf16.msrb.mxu0 %v1638_v6  ;;  %v1950_v6 = vld [vmem:[%s2960_s1 + $0x354] sm:$0xf0]  ;;  %v1526_v38 = vor.u32 %v1910_v25, %v1525_v24  ;;  %v1896_v3 = vld [vmem:[%s2960_s1 + $0x1ac] sm:$0xf]  ;;  %v1735_v8 = vld [vmem:[%s2960_s1 + $0x3b8] sm:$0xf0] }
  0x57   :  { %1038 = vmatpush.bf16.msra.mxu2 %v1318_v16  ;;  %1836 = vmatmul.msk.bf16.vlgmr.msra.gmra.mxu1 %vm901_vm0, %v2389_v47  ;;  %v1686_v12 = vor.u32 %v1950_v6, %v1685_v4  ;;  %v1669_v16 = vld [vmem:[%s2960_s1 + $0x328] sm:$0xf]  ;;  %v1974_v32 = vld [vmem:[%s2960_s1 + $0x414] sm:$0xf0]  ;;  %v1479_v4 = vld [vmem:[%s2960_s1 + $0x1b8] sm:$0xf0] }
  0x58   :  { %1073 = vmatpush.bf16.msrb.mxu1 %v1766_v10  ;;  %1051 = vmatpush.bf16.msra.mxu3 %v1446_v17  ;;  %v1367_v10 = vld [vmem:[%s2960_s1 + $0xd8] sm:$0xf0]  ;;  %v1960_v7 = vld [vmem:[%s2960_s1 + $0x3ac] sm:$0xf] }
  0x59   :  { %v1370_v17 = vor.u32 %v1868_v9, %v1367_v10  ;;  %v1607_v6 = vld [vmem:[%s2960_s1 + $0x2b8] sm:$0xf0]  ;;  %v1482_v10 = vor.u32 %v1896_v3, %v1479_v4  ;;  %v1738_v14 = vor.u32 %v1960_v7, %v1735_v8  ;;  %v1892_v15 = vld [vmem:[%s2960_s1 + $0x18c] sm:$0xf] }
  0x5a   :  { %1061 = vmatpush.bf16.msrb.mxu0 %v1622_v18  ;;  %v1946_v18 = vld [vmem:[%s2960_s1 + $0x334] sm:$0xf0]  ;;  %v1956_v19 = vld [vmem:[%s2960_s1 + $0x38c] sm:$0xf]  ;;  %v1719_v20 = vld [vmem:[%s2960_s1 + $0x398] sm:$0xf0] }
  0x5b   :  { %1039 = vmatpush.bf16.msra.mxu2 %v1302_v28  ;;  %v1670_v26 = vor.u32 %v1946_v18, %v1669_v16  ;;  %v1653_v28 = vld [vmem:[%s2960_s1 + $0x308] sm:$0xf]  ;;  %v1463_v16 = vld [vmem:[%s2960_s1 + $0x198] sm:$0xf0]  ;;  %v1884_v39 = vld [vmem:[%s2960_s1 + $0x14c] sm:$0xf] }
  0x5c   :  { %1074 = vmatpush.bf16.msrb.mxu1 %v1750_v22  ;;  %1052 = vmatpush.bf16.msra.mxu3 %v1430_v29  ;;  %v1351_v22 = vld [vmem:[%s2960_s1 + $0xb8] sm:$0xf0]  ;;  %v1942_v29 = vld [vmem:[%s2960_s1 + $0x314] sm:$0xf0]  ;;  %v1876_v4 = vld [vmem:[%s2960_s1 + $0x10c] sm:$0xf] }
  0x5d   :  { %v1354_v31 = vor.u32 %v1864_v21, %v1351_v22  ;;  %v1591_v18 = vld [vmem:[%s2960_s1 + $0x298] sm:$0xf0]  ;;  %v1466_v22 = vor.u32 %v1892_v15, %v1463_v16  ;;  %v1940_v8 = vld [vmem:[%s2960_s1 + $0x30c] sm:$0xf] }
  0x5e   :  { %1062 = vmatpush.bf16.msrb.mxu0 %v1606_v30  ;;  %v1781_v30 = vld [vmem:[%s2960_s1 + $0x408] sm:$0xf]  ;;  %v1271_v24 = vld [vmem:[%s2960_s1 + $0x18] sm:$0xf0] }
  0x5f   :  { %1040 = vmatpush.bf16.msra.mxu2 %v1286_v40  ;;  %v1968_v40 = vld [vmem:[%s2960_s1 + $0x3ec] sm:$0xf]  ;;  %v1527_v7 = vld [vmem:[%s2960_s1 + $0x218] sm:$0xf0] }
  0x60   :  { %1075 = vmatpush.bf16.msrb.mxu1 %v1734_v34  ;;  %1053 = vmatpush.bf16.msra.mxu3 %v1414_v42  ;;  %v1335_v34 = vld [vmem:[%s2960_s1 + $0x98] sm:$0xf0]  ;;  %v1654_v42 = vor.u32 %v1942_v29, %v1653_v28  ;;  %v1770_v50 = vor.u32 %v1968_v40, %v1767_v41  ;;  %v1920_v29 = vld [vmem:[%s2960_s1 + $0x26c] sm:$0xf] }
  0x61   :  { %v1338_v44 = vor.u32 %v1860_v33, %v1335_v34  ;;  %v1447_v28 = vld [vmem:[%s2960_s1 + $0x178] sm:$0xf0]  ;;  %v1984_v33 = vld [vmem:[%s2960_s1 + $0x46c] sm:$0xf] }
  0x62   :  { %1063 = vmatpush.bf16.msrb.mxu0 %v1590_v43  ;;  %v1782_v43 = vor.u32 %v1974_v32, %v1781_v30  ;;  %v1575_v30 = vld [vmem:[%s2960_s1 + $0x278] sm:$0xf0]  ;;  %v1916_v41 = vld [vmem:[%s2960_s1 + $0x24c] sm:$0xf] }
  0x63   :  { %1041 = vmatpush.bf16.msra.mxu2 %v1270_v56  ;;  %v1964_v56 = vld [vmem:[%s2960_s1 + $0x3cc] sm:$0xf]  ;;  %v1703_v32 = vld [vmem:[%s2960_s1 + $0x378] sm:$0xf0]  ;;  %v1578_v37 = vor.u32 %v1920_v29, %v1575_v30 }
  0x64   :  { %1076 = vmatpush.bf16.msrb.mxu1 %v1718_v48  ;;  %1054 = vmatpush.bf16.msra.mxu3 %v1398_v61  ;;  %v1319_v48 = vld [vmem:[%s2960_s1 + $0x78] sm:$0xf0]  ;;  %v1498_v61 = vor.u32 %v1900_v51, %v1495_v52  ;;  %v1754_v2 = vor.u32 %v1964_v56, %v1751_v59  ;;  %v1880_v52 = vld [vmem:[%s2960_s1 + $0x12c] sm:$0xf] }
  0x65   :  { %v1322_v60 = vor.u32 %v1856_v46, %v1319_v48  ;;  %v1831_v34 = vld [vmem:[%s2960_s1 + $0x478] sm:$0xf0]  ;;  %v1980_v46 = vld [vmem:[%s2960_s1 + $0x44c] sm:$0xf] }
  0x66   :  { %1064 = vmatpush.bf16.msrb.mxu0 %v1574_v63  ;;  %1042 = vmatmul.bf16.vlgmr.msra.gmra.mxu2 %v2269_v53  ;;  %v1852_v63 = vld [vmem:[%s2960_s1 + $0x4c] sm:$0xf]  ;;  %v1431_v40 = vld [vmem:[%s2960_s1 + $0x158] sm:$0xf0] }
  0x67   :  { %1090 = vmatpush.bf16.msrb.mxu2 %v1830_v1  ;;  %1055 = vmatmul.bf16.vlgmr.msra.gmra.mxu3 %v2284_v62  ;;  %v1626_v1 = vor.u32 %v1932_v54, %v1623_v55  ;;  %v1815_v48 = vld [vmem:[%s2960_s1 + $0x458] sm:$0xf0]  ;;  %v1912_v55 = vld [vmem:[%s2960_s1 + $0x22c] sm:$0xf] }
  0x68   :  { %1077 = vmatpush.bf16.msrb.mxu1 %v1702_v0  ;;  %1099 = vmatpush.bf16.msrb.mxu3 %v1386_v5  ;;  %v1303_v0 = vld [vmem:[%s2960_s1 + $0x58] sm:$0xf0]  ;;  %v1928_v5 = vld [vmem:[%s2960_s1 + $0x2ac] sm:$0xf]  ;;  %v1818_v56 = vor.u32 %v1980_v46, %v1815_v48 }
  0x69   :  { %v1306_v9 = vor.u32 %v1852_v63, %v1303_v0  ;;  %v1415_v54 = vld [vmem:[%s2960_s1 + $0x138] sm:$0xf0]  ;;  %v1976_v63 = vld [vmem:[%s2960_s1 + $0x42c] sm:$0xf] }
  0x6a   :  { %1065 = vmatpush.bf16.msrb.mxu0 %v1558_v11  ;;  %v1848_v11 = vld [vmem:[%s2960_s1 + $0x2c] sm:$0xf]  ;;  %v1543_v59 = vld [vmem:[%s2960_s1 + $0x238] sm:$0xf0] }
  0x6b   :  { %1091 = vmatpush.bf16.msrb.mxu2 %v1814_v13  ;;  %v1610_v13 = vor.u32 %v1928_v5, %v1607_v6  ;;  %v1799_v0 = vld [vmem:[%s2960_s1 + $0x438] sm:$0xf0]  ;;  %v1908_v5 = vld [vmem:[%s2960_s1 + $0x20c] sm:$0xf] }
  0x6c   :  { %1078 = vmatpush.bf16.msrb.mxu1 %v1686_v12  ;;  %1100 = vmatpush.bf16.msrb.mxu3 %v1370_v17  ;;  %v1287_v12 = vld [vmem:[%s2960_s1 + $0x38] sm:$0xf0]  ;;  %v1924_v17 = vld [vmem:[%s2960_s1 + $0x28c] sm:$0xf]  ;;  %v1802_v6 = vor.u32 %v1976_v63, %v1799_v0 }
  0x6d   :  { %v1290_v21 = vor.u32 %v1848_v11, %v1287_v12  ;;  %v1594_v25 = vor.u32 %v1924_v17, %v1591_v18  ;;  %v1783_v11 = vld [vmem:[%s2960_s1 + $0x418] sm:$0xf0] }
  0x6e   :  { %1066 = vmatpush.bf16.msrb.mxu0 %v1542_v23  ;;  %v1844_v23 = vld [vmem:[%s2960_s1 + $0xc] sm:$0xf] }
  0x6f   :  { %1092 = vmatpush.bf16.msrb.mxu2 %v1798_v27  ;;  %v1888_v27 = vld [vmem:[%s2960_s1 + $0x16c] sm:$0xf]  ;;  %v1274_v35 = vor.u32 %v1844_v23, %v1271_v24 }
  0x70   :  { %1079 = vmatpush.bf16.msrb.mxu1 %v1670_v26  ;;  %1101 = vmatpush.bf16.msrb.mxu3 %v1354_v31  ;;  %v1722_v26 = vor.u32 %v1956_v19, %v1719_v20  ;;  %v1952_v31 = vld [vmem:[%s2960_s1 + $0x36c] sm:$0xf]  ;;  %v1450_v36 = vor.u32 %v1888_v27, %v1447_v28 }
  0x72   :  { %1067 = vmatpush.bf16.msrb.mxu0 %v1526_v38  ;;  %v1706_v38 = vor.u32 %v1952_v31, %v1703_v32 }
  0x73   :  { %1093 = vmatpush.bf16.msrb.mxu2 %v1782_v43  ;;  %v1559_v43 = vld [vmem:[%s2960_s1 + $0x258] sm:$0xf0] }
  0x74   :  { %1080 = vmatpush.bf16.msrb.mxu1 %v1654_v42  ;;  %1102 = vmatpush.bf16.msrb.mxu3 %v1338_v44  ;;  %v1834_v42 = vor.u32 %v1984_v33, %v1831_v34  ;;  %v1948_v44 = vld [vmem:[%s2960_s1 + $0x34c] sm:$0xf] }
  0x75   :  { %1068 = vmatmul.bf16.vlgmr.msrb.gmra.mxu0 %v2277_v57 }
  0x76   :  { %1112 = vmatpush.bf16.msra.mxu0 %v1514_v45  ;;  %1837 = vmatmul.msk.bf16.vlgmr.msrb.gmra.mxu2 %vm901_vm0, %v2389_v47  ;;  %v1687_v45 = vld [vmem:[%s2960_s1 + $0x358] sm:$0xf0] }
  0x77   :  { %1138 = vmatpush.bf16.msra.mxu2 %v1770_v50  ;;  %1081 = vmatmul.bf16.vlgmr.msrb.gmra.mxu1 %v2279_v58  ;;  %v1562_v50 = vor.u32 %v1916_v41, %v1559_v43  ;;  %v1690_v51 = vor.u32 %v1948_v44, %v1687_v45 }
  0x78   :  { %1125 = vmatpush.bf16.msra.mxu1 %v1642_v49  ;;  %1103 = vmatpush.bf16.msrb.mxu3 %v1322_v60  ;;  %v1434_v49 = vor.u32 %v1884_v39, %v1431_v40  ;;  %v1944_v60 = vld [vmem:[%s2960_s1 + $0x32c] sm:$0xf] }
  0x7a   :  { %1113 = vmatpush.bf16.msra.mxu0 %v1498_v61  ;;  %v1671_v61 = vld [vmem:[%s2960_s1 + $0x338] sm:$0xf0] }
  0x7b   :  { %1139 = vmatpush.bf16.msra.mxu2 %v1754_v2  ;;  %v1546_v2 = vor.u32 %v1912_v55, %v1543_v59  ;;  %v1674_v3 = vor.u32 %v1944_v60, %v1671_v61 }
  0x7c   :  { %1126 = vmatpush.bf16.msra.mxu1 %v1626_v1  ;;  %1104 = vmatpush.bf16.msrb.mxu3 %v1306_v9  ;;  %v1418_v1 = vor.u32 %v1880_v52, %v1415_v54  ;;  %v1655_v9 = vld [vmem:[%s2960_s1 + $0x318] sm:$0xf0] }
  0x7e   :  { %1114 = vmatpush.bf16.msra.mxu0 %v1482_v10  ;;  %v1972_v10 = vld [vmem:[%s2960_s1 + $0x40c] sm:$0xf] }
  0x7f   :  { %1140 = vmatpush.bf16.msra.mxu2 %v1738_v14  ;;  %v1658_v14 = vor.u32 %v1940_v8, %v1655_v9  ;;  %v1786_v15 = vor.u32 %v1972_v10, %v1783_v11 }
  0x80   :  { %1127 = vmatpush.bf16.msra.mxu1 %v1610_v13  ;;  %1105 = vmatpush.bf16.msrb.mxu3 %v1290_v21  ;;  %v1530_v13 = vor.u32 %v1908_v5, %v1527_v7 }
  0x82   :  { %1115 = vmatpush.bf16.msra.mxu0 %v1466_v22 }
  0x83   :  { %1141 = vmatpush.bf16.msra.mxu2 %v1722_v26 }
  0x84   :  { %1128 = vmatpush.bf16.msra.mxu1 %v1594_v25  ;;  %1106 = vmatpush.bf16.msrb.mxu3 %v1274_v35 }
  0x86   :  { %1116 = vmatpush.bf16.msra.mxu0 %v1450_v36 }
  0x87   :  { %1142 = vmatpush.bf16.msra.mxu2 %v1706_v38  ;;  %1107 = vmatmul.bf16.vlgmr.msrb.gmra.mxu3 %v2269_v53  ;;  %v1399_v53 = vld [vmem:[%s2960_s1 + $0x118] sm:$0xf0] }
  0x88   :  { %1129 = vmatpush.bf16.msra.mxu1 %v1578_v37  ;;  %1155 = vmatpush.bf16.msra.mxu3 %v1834_v42  ;;  %v1402_v12 = vor.u32 %v1876_v4, %v1399_v53 }
  0x8a   :  { %1117 = vmatpush.bf16.msra.mxu0 %v1434_v49 }
  0x8b   :  { %1143 = vmatpush.bf16.msra.mxu2 %v1690_v51 }
  0x8c   :  { %1130 = vmatpush.bf16.msra.mxu1 %v1562_v50  ;;  %1156 = vmatpush.bf16.msra.mxu3 %v1818_v56 }
  0x8e   :  { %1118 = vmatpush.bf16.msra.mxu0 %v1418_v1 }
  0x8f   :  { %1144 = vmatpush.bf16.msra.mxu2 %v1674_v3 }
  0x90   :  { %1131 = vmatpush.bf16.msra.mxu1 %v1546_v2  ;;  %1157 = vmatpush.bf16.msra.mxu3 %v1802_v6 }
  0x92   :  { %1119 = vmatpush.bf16.msra.mxu0 %v1402_v12 }
  0x93   :  { %1145 = vmatpush.bf16.msra.mxu2 %v1658_v14 }
  0x94   :  { %1132 = vmatpush.bf16.msra.mxu1 %v1530_v13  ;;  %1158 = vmatpush.bf16.msra.mxu3 %v1786_v15 }
  0x95   :  { %1120 = vmatmul.bf16.vlgmr.msra.gmra.mxu0 %v2284_v62 }
  0x96   :  { %1146 = vmatmul.bf16.vlgmr.msra.gmra.mxu2 %v2279_v58 }
  0x97   :  { %1133 = vmatmul.bf16.vlgmr.msra.gmra.mxu1 %v2277_v57  ;;  %1838 = vmatmul.msk.bf16.vlgmr.msra.gmra.mxu3 %vm901_vm0, %v2389_v47  ;;  %vm1252_vm0 = vcmask 64516  }
  0x99   :  { %v2933_v22 = vpop.permute.xlu0 %164 }
  0xa6   :  { %v913_v16 = vpop.f32.mrf.mxu0 }
  0xa7   :  { %v914_v23 = vadd.f32 %v913_v16, %v2933_v22 }
  0xa8   :  { %v926_v17 = vpop.f32.mrf.mxu1 }
  0xa9   :  { %v927_v26 = vadd.f32 %v926_v17, %v914_v23 }
  0xac   :  { %v939_v18 = vpop.f32.mrf.mxu2 }
  0xad   :  { %v952_v19 = vpop.f32.mrf.mxu3  ;;  %v940_v57 = vadd.f32 %v939_v18, %v927_v26 }
  0xae   :  { %v915_v20 = vpop.f32.mrf.mxu0 }
  0xaf   :  { %v953_v58 = vadd.f32 %v952_v19, %v940_v57 }
  0xb0   :  { %v928_v21 = vpop.f32.mrf.mxu1 }
  0xb4   :  { %v941_v24 = vpop.f32.mrf.mxu2 }
  0xb5   :  { %v954_v25 = vpop.f32.mrf.mxu3 }
  0xb6   :  { %v965_v62 = vpop.f32.mrf.mxu0 }
  0xb7   :  { %v966_v28 = vadd.f32 %v965_v62, %v953_v58 }
  0xb9   :  { %v1839_v47 = vmul.f32 -1.442695, %v966_v28 }
  0xbb   :  { %1989 = vpow2.f32 %v1839_v47 }
  0xbe   :  { %v967_v27 = vpop.f32.mrf.mxu0 }
  0xc1   :  { %v1990_v37 = vpop.eup %1989 }
  0xc2   :  { %v1176_v41 = vadd.f32 1.0, %v1990_v37 }
  0xc4   :  { %v978_v29 = vpop.f32.mrf.mxu1  ;;  %1991 = vrcp.f32 %v1176_v41  ;;  %vm1185_vm1 = vweird.f32 %v1176_v41  ;;  %v1191_v3 = vand.u32 2147483648, %v1176_v41  ;;  %v1189_v6 = vand.u32 2147483647, %v1176_v41 }
  0xc5   :  { %v979_v30 = vadd.f32 %v978_v29, %v2933_v22 }
  0xc6   :  { %v1192_v13 = vor.u32 1.1754944e-38, %v1191_v3  ;;  %vm1190_vm9 = vcmp.eq.f32.partialorder %v1189_v6, 8.507059e+37 }
  0xc9   :  { %v991_v31 = vpop.f32.mrf.mxu2 }
  0xca   :  { %v992_v34 = vadd.f32 %v991_v31, %v979_v30  ;;  %v1992_v48 = vpop.eup %1991 }
  0xcb   :  { %v1181_v50 = vmul.f32 %v1992_v48, %v1176_v41  ;;  %vm1186_vm2 = vweird.f32 %v1992_v48 }
  0xcc   :  { %v1004_v32 = vpop.f32.mrf.mxu3  ;;  %v980_v33 = vpop.f32.mrf.mxu1  ;;  %vm2937_vm5 = vmor %vm1185_vm1, %vm1186_vm2 }
  0xcd   :  { %v1005_v35 = vadd.f32 %v1004_v32, %v992_v34  ;;  %v1182_v52 = vsub.f32 1.0, %v1181_v50 }
  0xcf   :  { %v1183_v59 = vmul.f32 %v1992_v48, %v1182_v52 }
  0xd1   :  { %v993_v39 = vpop.f32.mrf.mxu2  ;;  %v1184_v63 = vadd.f32 %v1992_v48, %v1183_v59 }
  0xd2   :  { %v1017_v36 = vpop.f32.mrf.mxu0 }
  0xd3   :  { %v1018_v38 = vadd.f32 %v1017_v36, %v1005_v35  ;;  %v1188_v11 = vsel %vm2937_vm5, %v1992_v48, %v1184_v63 }
  0xd4   :  { %v1006_v40 = vpop.f32.mrf.mxu3  ;;  %v1030_v42 = vpop.f32.mrf.mxu1  ;;  %v1193_v16 = vsel %vm1190_vm9, %v1192_v13, %v1188_v11 }
  0xd5   :  { %v1031_v43 = vadd.f32 %v1030_v42, %v1018_v38 }
  0xd7   :  { %v1840_v44 = vmul.f32 -1.442695, %v1031_v43 }
  0xd9   :  { %1993 = vpow2.f32 %v1840_v44 }
  0xda   :  { %v1019_v45 = vpop.f32.mrf.mxu0 }
  0xdc   :  { %v1032_v46 = vpop.f32.mrf.mxu1 }
  0xdf   :  { %v1994_v49 = vpop.eup %1993 }
  0xe0   :  { %v1177_v51 = vadd.f32 1.0, %v1994_v49 }
  0xe2   :  { %1995 = vrcp.f32 %v1177_v51  ;;  %v1206_v0 = vand.u32 2147483648, %v1177_v51  ;;  %vm1200_vm3 = vweird.f32 %v1177_v51  ;;  %v1204_v2 = vand.u32 2147483647, %v1177_v51 }
  0xe4   :  { %v1207_v10 = vor.u32 1.1754944e-38, %v1206_v0  ;;  %vm1205_vm7 = vcmp.eq.f32.partialorder %v1204_v2, 8.507059e+37 }
  0xe8   :  { %v1996_v56 = vpop.eup %1995 }
  0xe9   :  { %v1043_v54 = vpop.f32.mrf.mxu2  ;;  %v1196_v60 = vmul.f32 %v1996_v56, %v1177_v51  ;;  %vm1201_vm4 = vweird.f32 %v1996_v56 }
  0xea   :  { %v1056_v55 = vpop.f32.mrf.mxu3  ;;  %vm1202_vm6 = vmor %vm1200_vm3, %vm1201_vm4  ;;  %v1044_v17 = vadd.f32 %v1043_v54, %v2933_v22 }
  0xeb   :  { %v1197_v61 = vsub.f32 1.0, %v1196_v60  ;;  %vm1253_vm3 = vmor %vm1252_vm0, %vm1246_vm8 }
  0xec   :  { %v1057_v21 = vadd.f32 %v1056_v55, %v1044_v17 }
  0xed   :  { %v1198_v1 = vmul.f32 %v1996_v56, %v1197_v61 }
  0xef   :  { %v1199_v7 = vadd.f32 %v1996_v56, %v1198_v1 }
  0xf1   :  { %v1045_v4 = vpop.f32.mrf.mxu2  ;;  %v1203_v12 = vsel %vm1202_vm6, %v1996_v56, %v1199_v7 }
  0xf2   :  { %v1069_v53 = vpop.f32.mrf.mxu0  ;;  %v1058_v8 = vpop.f32.mrf.mxu3  ;;  %v1208_v14 = vsel %vm1205_vm7, %v1207_v10, %v1203_v12 }
  0xf3   :  { %v1244_v15 = vrot.slane %v1208_v14, 4  ;;  %v1070_v24 = vadd.f32 %v1069_v53, %v1057_v21 }
  0xf4   :  { %v1082_v9 = vpop.f32.mrf.mxu1 }
  0xf5   :  { %v1247_v18 = vsel %vm1246_vm8, %v1193_v16, %v1244_v15  ;;  %v1083_v25 = vadd.f32 %v1082_v9, %v1070_v24 }
  0xf6   :  { %1251 = vst [vmem:[%s2963_s3] sm:$0xff] %v1247_v18 }
  0xf9   :  { %v1095_v23 = vpop.f32.mrf.mxu2 }
  0xfa   :  { %v1071_v19 = vpop.f32.mrf.mxu0  ;;  %v1096_v26 = vadd.f32 %v1095_v23, %v1083_v25 }
  0xfc   :  { %v1084_v20 = vpop.f32.mrf.mxu1  ;;  %v1841_v27 = vmul.f32 -1.442695, %v1096_v26 }
  0xfe   :  { %1997 = vpow2.f32 %v1841_v27 }
 0x101   :  { %v1097_v62 = vpop.f32.mrf.mxu2 }
 0x104   :  { %v1998_v32 = vpop.eup %1997 }
 0x105   :  { %v1178_v37 = vadd.f32 1.0, %v1998_v32 }
 0x107   :  { %1999 = vrcp.f32 %v1178_v37  ;;  %vm1215_vm12 = vweird.f32 %v1178_v37  ;;  %v1221_v59 = vand.u32 2147483648, %v1178_v37  ;;  %v1219_v61 = vand.u32 2147483647, %v1178_v37 }
 0x109   :  { %v1222_v3 = vor.u32 1.1754944e-38, %v1221_v59  ;;  %vm1220_vm2 = vcmp.eq.f32.partialorder %v1219_v61, 8.507059e+37 }
 0x10a   :  { %v1108_v57 = vpop.f32.mrf.mxu3 }
 0x10b   :  { %v1109_v58 = vadd.f32 %v1108_v57, %v2933_v22 }
 0x10d   :  { %v2000_v22 = vpop.eup %1999 }
 0x10e   :  { %v1211_v45 = vmul.f32 %v2000_v22, %v1178_v37  ;;  %vm1216_vm10 = vweird.f32 %v2000_v22 }
 0x10f   :  { %vm2949_vm13 = vmor %vm1215_vm12, %vm1216_vm10 }
 0x110   :  { %v1212_v46 = vsub.f32 1.0, %v1211_v45 }
 0x112   :  { %v1121_v28 = vpop.f32.mrf.mxu0  ;;  %v1110_v30 = vpop.f32.mrf.mxu3  ;;  %v1213_v49 = vmul.f32 %v2000_v22, %v1212_v46 }
 0x113   :  { %v1122_v47 = vadd.f32 %v1121_v28, %v1109_v58 }
 0x114   :  { %v1134_v29 = vpop.f32.mrf.mxu1  ;;  %v1214_v54 = vadd.f32 %v2000_v22, %v1213_v49 }
 0x115   :  { %v1135_v31 = vadd.f32 %v1134_v29, %v1122_v47 }
 0x116   :  { %v1218_v1 = vsel %vm2949_vm13, %v2000_v22, %v1214_v54 }
 0x117   :  { %v1223_v5 = vsel %vm1220_vm2, %v1222_v3, %v1218_v1 }
 0x119   :  { %v1147_v33 = vpop.f32.mrf.mxu2 }
 0x11a   :  { %v1148_v34 = vadd.f32 %v1147_v33, %v1135_v31  ;;  %v1123_v35 = vpop.f32.mrf.mxu0  ;;  %v1160_v38 = vpop.f32.mrf.mxu3 }
 0x11c   :  { %v1136_v36 = vpop.f32.mrf.mxu1  ;;  %v1161_v39 = vadd.f32 %v1160_v38, %v1148_v34 }
 0x11e   :  { %v1842_v40 = vmul.f32 -1.442695, %v1161_v39 }
 0x120   :  { %2001 = vpow2.f32 %v1842_v40 }
 0x121   :  { %v1149_v41 = vpop.f32.mrf.mxu2 }
 0x122   :  { %v1162_v42 = vpop.f32.mrf.mxu3 }
 0x126   :  { %v2002_v43 = vpop.eup %2001 }
 0x127   :  { %v1179_v44 = vadd.f32 1.0, %v2002_v43 }
 0x129   :  { %2003 = vrcp.f32 %v1179_v44  ;;  %v1236_v52 = vand.u32 2147483648, %v1179_v44  ;;  %v1234_v56 = vand.u32 2147483647, %v1179_v44  ;;  %vm1230_vm14 = vweird.f32 %v1179_v44 }
 0x12b   :  { %v1237_v0 = vor.u32 1.1754944e-38, %v1236_v52  ;;  %vm1235_vm1 = vcmp.eq.f32.partialorder %v1234_v56, 8.507059e+37 }
 0x12f   :  { %v2004_v48 = vpop.eup %2003 }
 0x130   :  { %v1226_v50 = vmul.f32 %v2004_v48, %v1179_v44  ;;  %vm1231_vm11 = vweird.f32 %v2004_v48 }
 0x131   :  { %vm1232_vm15 = vmor %vm1230_vm14, %vm1231_vm11 }
 0x132   :  { %v1227_v51 = vsub.f32 1.0, %v1226_v50 }
 0x134   :  { %v1228_v55 = vmul.f32 %v2004_v48, %v1227_v51 }
 0x136   :  { %v1229_v63 = vadd.f32 %v2004_v48, %v1228_v55 }
 0x138   :  { %v1233_v2 = vsel %vm1232_vm15, %v2004_v48, %v1229_v63 }
 0x139   :  { %v1238_v4 = vsel %vm1235_vm1, %v1237_v0, %v1233_v2 }
 0x13a   :  { %v1245_v53 = vrot.slane %v1238_v4, 4 }
 0x13c   :  { %v1248_v6 = vsel %vm1246_vm8, %v1223_v5, %v1245_v53 }
 0x13d   :  { %1254 = vst.msk [vmem:[%s2963_s3 + $0x8] sm:$0xff] %vm1253_vm3, %v1248_v6 }

</bundles_post_ra>
